<compile_context>
chip_gen: v6e
topology: v6e:2x2x1
jax: 0.10.0
libtpu: 0.0.40
codegen_flags: <defaults>
</compile_context>

<pallas_src>
import math

import numpy as np
import jax
import jax.numpy as jnp
from jax.experimental import pallas as pl
from jax.experimental.pallas import tpu as pltpu

# ---------------- small synthetic configuration ----------------
STATE_DIM = 17          # HalfCheetah observation dim
ACT_DIM = 6             # HalfCheetah action dim
MAX_LEN = 20            # max_length (timestep embedding table size)
H = 64                  # hidden size (n_embd)
N_LAYER = 2
N_HEAD = 4
HEAD_DIM = H // N_HEAD
MLP_DIM = 4 * H
LN_EPS = 1e-5
RETURN_SCALE = 1000.0   # self.scale
EMB_IN = 1 + STATE_DIM + ACT_DIM + H  # packed per-token input width (rtg|state|act|t_emb)
HEAD_OUT = 1 + STATE_DIM + ACT_DIM    # 24 useful head columns (return | state | action)
HEAD_PAD = 128                        # lane-dense padded head output width


# ---------------- in-kernel helpers ----------------
def _layernorm(x, g, b):
    mu = jnp.mean(x, axis=-1, keepdims=True)
    var = jnp.mean(jnp.square(x - mu), axis=-1, keepdims=True)
    return (x - mu) * jax.lax.rsqrt(var + LN_EPS) * g + b


def _gelu_new(x):
    c = math.sqrt(2.0 / math.pi)
    return 0.5 * x * (1.0 + jnp.tanh(c * (x + 0.044715 * x * x * x)))


# ---------------- the fused forward kernel ----------------
def _dt_kernel(emb_ref, mask_ref, gvec_ref, lvec_ref,
               w_emb_ref, w_qkv_ref, w_ao_ref, w_fc_ref, w_mp_ref, w_head_ref,
               out_ref):
    f32 = jnp.float32
    bf16 = jnp.bfloat16
    BT = emb_ref.shape[0]          # B * T (batch folded into the sublane axis)

    gvec = gvec_ref[...]           # (8, 3H)  f32  global bias / LN vectors
    lvec = lvec_ref[...]           # (L, 8, MLP_DIM) f32 per-layer bias / LN vectors
    mask_bias = mask_ref[...]      # (3BT, 3BT) f32 additive mask (0 / -1e30)

    # ---- fused modality embeddings: one (BT, 88) x (88, 3H) bf16 matmul ----
    emb_all = jnp.dot(emb_ref[...], w_emb_ref[...],
                      preferred_element_type=f32) + gvec[0:1, 0:3 * H]
    # grouped token order (batch folded): rows [0,BT)=return, [BT,2BT)=state, [2BT,3BT)=action
    x = jnp.concatenate([emb_all[:, 0:H],
                         emb_all[:, H:2 * H],
                         emb_all[:, 2 * H:3 * H]], axis=0)          # (3BT, H)
    h = _layernorm(x, gvec[1:2, 0:H], gvec[2:3, 0:H])               # embed_ln

    inv_sqrt_d = 1.0 / math.sqrt(HEAD_DIM)
    qkT = (((1,), (1,)), ((), ()))     # (S,D) x (S,D) -> (S,S), contract head dim

    for l in range(N_LAYER):
        lv = lvec[l]                   # (8, MLP_DIM)

        # ---- attention block (pre-LN) ----
        a_in = _layernorm(h, lv[0:1, 0:H], lv[1:2, 0:H])
        qkv = jnp.dot(a_in.astype(bf16), w_qkv_ref[l],
                      preferred_element_type=f32) + lv[2:3, 0:3 * H]   # (3BT, 3H)
        qkv_b = qkv.astype(bf16)

        pv_parts = []
        for hh in range(N_HEAD):
            d0 = hh * HEAD_DIM
            q_h = qkv_b[:, d0:d0 + HEAD_DIM]
            k_h = qkv_b[:, H + d0:H + d0 + HEAD_DIM]
            v_h = qkv_b[:, 2 * H + d0:2 * H + d0 + HEAD_DIM]
            sc = jax.lax.dot_general(q_h, k_h, qkT,
                                     preferred_element_type=f32) * inv_sqrt_d
            sc = sc + mask_bias
            sc = sc - jnp.max(sc, axis=-1, keepdims=True)
            p = jnp.exp(sc)
            p = p * pl.reciprocal(jnp.sum(p, axis=-1, keepdims=True), approx=True)
            pv_parts.append(jnp.dot(p.astype(bf16), v_h,
                                    preferred_element_type=f32))       # (3BT, D)
        pv = jnp.concatenate(pv_parts, axis=-1)                        # (3BT, H)

        attn = jnp.dot(pv.astype(bf16), w_ao_ref[l],
                       preferred_element_type=f32) + lv[3:4, 0:H]
        h = h + attn

        # ---- MLP block (pre-LN) ----
        m_in = _layernorm(h, lv[4:5, 0:H], lv[5:6, 0:H])
        m = jnp.dot(m_in.astype(bf16), w_fc_ref[l],
                    preferred_element_type=f32) + lv[6:7, 0:MLP_DIM]
        m = _gelu_new(m)
        m = jnp.dot(m.astype(bf16), w_mp_ref[l],
                    preferred_element_type=f32) + lv[7:8, 0:H]
        h = h + m

    y = _layernorm(h, gvec[3:4, 0:H], gvec[4:5, 0:H])                  # ln_f, (3BT, H)

    # return/state preds from action tokens, action preds from state tokens
    # (matches h.view(B,T,3,H).permute(0,2,1,3)[:,2] / [:,1]).
    y_state_tok = y[BT:2 * BT]
    y_action_tok = y[2 * BT:3 * BT]
    head_in = jnp.concatenate([y_action_tok, y_state_tok], axis=-1).astype(bf16)  # (BT, 2H)
    raw = jnp.dot(head_in, w_head_ref[...],
                  preferred_element_type=f32) + gvec[5:6, 0:HEAD_PAD]  # (BT, 128)
    lane = jax.lax.broadcasted_iota(jnp.int32, raw.shape, 1)
    # lanes [0,18): return+state preds (no tanh); lanes >= 18: action preds (tanh);
    # zero-padded lanes give tanh(0)=0 and are discarded in glue.
    out_ref[...] = jnp.where(lane < 1 + STATE_DIM, raw, jnp.tanh(raw))


# ---------------- BlockSpec helper (single grid step, full-array blocks) ----------------
def _full_spec(shape):
    shape = tuple(int(s) for s in shape)
    zeros = (0,) * len(shape)
    return pl.BlockSpec(shape, lambda i, _z=zeros: _z)


# ---------------- parameter init (deterministic, synthetic) ----------------
def init_params(key):
    keys = iter(jax.random.split(key, 64))

    def nrm(shape, s=0.02):
        return (s * jax.random.normal(next(keys), shape)).astype(jnp.float32)

    p = {}
    p['wt'] = nrm((MAX_LEN, H))                                     # embed_timestep table
    p['wr'] = nrm((1, H));         p['br'] = jnp.zeros((1, H), jnp.float32)
    p['ws'] = nrm((STATE_DIM, H)); p['bs'] = jnp.zeros((1, H), jnp.float32)
    p['wa'] = nrm((ACT_DIM, H));   p['ba'] = jnp.zeros((1, H), jnp.float32)

    p['lni_g'] = jnp.ones((1, H), jnp.float32); p['lni_b'] = jnp.zeros((1, H), jnp.float32)

    p['ln1_g'] = jnp.ones((N_LAYER, H), jnp.float32)
    p['ln1_b'] = jnp.zeros((N_LAYER, H), jnp.float32)
    p['w_qkv'] = nrm((N_LAYER, H, 3 * H))
    p['b_qkv'] = jnp.zeros((N_LAYER, 3 * H), jnp.float32)
    p['w_ao'] = nrm((N_LAYER, H, H))
    p['b_ao'] = jnp.zeros((N_LAYER, H), jnp.float32)
    p['ln2_g'] = jnp.ones((N_LAYER, H), jnp.float32)
    p['ln2_b'] = jnp.zeros((N_LAYER, H), jnp.float32)
    p['w_fc'] = nrm((N_LAYER, H, MLP_DIM))
    p['b_fc'] = jnp.zeros((N_LAYER, MLP_DIM), jnp.float32)
    p['w_mp'] = nrm((N_LAYER, MLP_DIM, H))
    p['b_mp'] = jnp.zeros((N_LAYER, H), jnp.float32)

    p['lnf_g'] = jnp.ones((1, H), jnp.float32); p['lnf_b'] = jnp.zeros((1, H), jnp.float32)

    p['w_ret'] = nrm((H, 1));         p['b_ret'] = jnp.zeros((1, 1), jnp.float32)
    p['w_st'] = nrm((H, STATE_DIM));  p['b_st'] = jnp.zeros((1, STATE_DIM), jnp.float32)
    p['w_act'] = nrm((H, ACT_DIM));   p['b_act'] = jnp.zeros((1, ACT_DIM), jnp.float32)

    p['state_mean'] = nrm((1, STATE_DIM), s=0.1)
    p['state_std'] = jnp.ones((1, STATE_DIM), jnp.float32)
    return p


# ---------------- glue-side weight packing (tiny, one-time under jit) ----------------
def _pack_params(p):
    f32, bf16 = jnp.float32, jnp.bfloat16
    inv_std = 1.0 / p['state_std']                                  # (1, state_dim)

    # fused embedding weight: [rtg | state | action | t_emb] (88) -> [r_emb|s_emb|a_emb] (3H)
    # return scaling and state mean/std normalization are folded into the weights/bias.
    w_emb = jnp.zeros((EMB_IN, 3 * H), f32)
    w_emb = w_emb.at[0:1, 0:H].set(p['wr'] * (1.0 / RETURN_SCALE))
    w_emb = w_emb.at[1:1 + STATE_DIM, H:2 * H].set(p['ws'] * inv_std.T)
    w_emb = w_emb.at[1 + STATE_DIM:1 + STATE_DIM + ACT_DIM, 2 * H:3 * H].set(p['wa'])
    eye = jnp.eye(H, dtype=f32)
    r0 = 1 + STATE_DIM + ACT_DIM
    w_emb = (w_emb.at[r0:r0 + H, 0:H].set(eye)
                  .at[r0:r0 + H, H:2 * H].set(eye)
                  .at[r0:r0 + H, 2 * H:3 * H].set(eye))
    b_state = p['bs'] - (p['state_mean'] * inv_std) @ p['ws']       # (1, H)
    b_emb = jnp.concatenate([p['br'], b_state, p['ba']], axis=-1)   # (1, 3H)

    # fused, lane-dense (zero-padded) prediction-head weight / bias
    w_head = jnp.zeros((2 * H, HEAD_PAD), f32)
    w_head = (w_head.at[0:H, 0:1].set(p['w_ret'])                   # action tokens -> return
                    .at[0:H, 1:1 + STATE_DIM].set(p['w_st'])        # action tokens -> state
                    .at[H:2 * H, 1 + STATE_DIM:HEAD_OUT].set(p['w_act']))  # state tok -> action
    bh = jnp.zeros((1, HEAD_PAD), f32)
    bh = (bh.at[:, 0:1].set(p['b_ret'])
            .at[:, 1:1 + STATE_DIM].set(p['b_st'])
            .at[:, 1 + STATE_DIM:HEAD_OUT].set(p['b_act']))

    # global vector pack: 1 DMA for all non-layer biases / LN params
    gvec = jnp.zeros((8, 3 * H), f32)
    gvec = (gvec.at[0:1, :].set(b_emb)
                .at[1:2, 0:H].set(p['lni_g'])
                .at[2:3, 0:H].set(p['lni_b'])
                .at[3:4, 0:H].set(p['lnf_g'])
                .at[4:5, 0:H].set(p['lnf_b'])
                .at[5:6, 0:HEAD_PAD].set(bh))

    # per-layer vector pack: 1 DMA for all layer biases / LN params
    lvec = jnp.zeros((N_LAYER, 8, MLP_DIM), f32)
    lvec = (lvec.at[:, 0, 0:H].set(p['ln1_g'])
                .at[:, 1, 0:H].set(p['ln1_b'])
                .at[:, 2, 0:3 * H].set(p['b_qkv'])
                .at[:, 3, 0:H].set(p['b_ao'])
                .at[:, 4, 0:H].set(p['ln2_g'])
                .at[:, 5, 0:H].set(p['ln2_b'])
                .at[:, 6, 0:MLP_DIM].set(p['b_fc'])
                .at[:, 7, 0:H].set(p['b_mp']))

    return (w_emb.astype(bf16), gvec, lvec,
            p['w_qkv'].astype(bf16), p['w_ao'].astype(bf16),
            p['w_fc'].astype(bf16), p['w_mp'].astype(bf16),
            w_head.astype(bf16))


def _grouped_causal_bias(B, T):
    # grouped row g = k*(B*T) + b*T + t (k: 0=ret,1=state,2=act) -> interleaved pos 3t+k.
    # attend iff same batch and pos_i >= pos_j. Precomputed host-side (B, T static).
    BT = B * T
    g = np.arange(3 * BT)
    k = g // BT
    b = (g % BT) // T
    t = g % T
    pos = 3 * t + k
    allowed = (b[:, None] == b[None, :]) & (pos[:, None] >= pos[None, :])
    return jnp.asarray(np.where(allowed, 0.0, -1e30).astype(np.float32))


# ---------------- forward ----------------
@jax.jit
def decision_transformer_forward(params, states, actions, returns_to_go, timesteps):
    B, T, _ = states.shape
    BT = B * T
    S = 3 * BT

    t_emb = params['wt'][timesteps]                                  # (B, T, H) gather in glue
    (w_emb, gvec, lvec, w_qkv, w_ao, w_fc, w_mp, w_head) = _pack_params(params)

    # packed per-token activation input: [rtg | state | action | t_emb], raw values
    # (scaling / normalization folded into w_emb); bf16 for the MXU.
    emb_in = jnp.concatenate([returns_to_go, states, actions, t_emb],
                             axis=-1).reshape(BT, EMB_IN).astype(jnp.bfloat16)
    mask_bias = _grouped_causal_bias(B, T)                           # (S, S) constant

    inputs = [emb_in, mask_bias, gvec, lvec, w_emb, w_qkv, w_ao, w_fc, w_mp, w_head]
    in_specs = [_full_spec(a.shape) for a in inputs]

    # advisory cost estimate (flops / transcendentals / bytes)
    flops = 2 * BT * EMB_IN * 3 * H
    flops += N_LAYER * (2 * S * H * 3 * H          # QKV
                        + N_HEAD * 2 * (2 * S * S * HEAD_DIM)   # scores + PV
                        + 2 * S * H * H            # out proj
                        + 2 * 2 * S * H * MLP_DIM)  # MLP
    flops += 2 * BT * (2 * H) * HEAD_PAD
    transcendentals = N_LAYER * (N_HEAD * S * S + S * MLP_DIM) + BT * HEAD_PAD
    bytes_accessed = sum(int(np.prod(a.shape)) * a.dtype.itemsize for a in inputs)
    bytes_accessed += BT * HEAD_PAD * 4

    out = pl.pallas_call(
        _dt_kernel,
        out_shape=jax.ShapeDtypeStruct((BT, HEAD_PAD), jnp.float32),
        grid=(1,),
        in_specs=in_specs,
        out_specs=_full_spec((BT, HEAD_PAD)),
        compiler_params=pltpu.CompilerParams(dimension_semantics=("arbitrary",)),
        cost_estimate=pl.CostEstimate(flops=int(flops),
                                      transcendentals=int(transcendentals),
                                      bytes_accessed=int(bytes_accessed)),
    )(*inputs)

    out = out.reshape(B, T, HEAD_PAD)
    return_preds = out[..., 0:1]                                     # (B, T, 1)
    state_preds = out[..., 1:1 + STATE_DIM]                          # (B, T, state_dim)
    action_preds = out[..., 1 + STATE_DIM:HEAD_OUT]                  # (B, T, act_dim)
    return state_preds, action_preds, return_preds


# ---------------- pure-JAX reference (interleaved order, f32) for validation ----------------
def _reference_forward(p, states, actions, rtg, timesteps):
    B, T, _ = states.shape
    S = 3 * T
    st = (states - p['state_mean']) / p['state_std']
    rt = rtg / RETURN_SCALE
    te = p['wt'][timesteps]
    r_emb = rt @ p['wr'] + p['br'] + te
    s_emb = st @ p['ws'] + p['bs'] + te
    a_emb = actions @ p['wa'] + p['ba'] + te
    x = jnp.stack([r_emb, s_emb, a_emb], axis=2).reshape(B, S, H)

    def ln(v, g, b):
        mu = v.mean(-1, keepdims=True)
        var = ((v - mu) ** 2).mean(-1, keepdims=True)
        return (v - mu) / jnp.sqrt(var + LN_EPS) * g + b

    h = ln(x, p['lni_g'], p['lni_b'])
    causal = jnp.tril(jnp.ones((S, S), bool))
    for l in range(N_LAYER):
        a_in = ln(h, p['ln1_g'][l], p['ln1_b'][l])
        qkv = a_in @ p['w_qkv'][l] + p['b_qkv'][l]
        q, k, v = jnp.split(qkv, 3, axis=-1)
        q = q.reshape(B, S, N_HEAD, HEAD_DIM).transpose(0, 2, 1, 3)
        k = k.reshape(B, S, N_HEAD, HEAD_DIM).transpose(0, 2, 1, 3)
        v = v.reshape(B, S, N_HEAD, HEAD_DIM).transpose(0, 2, 1, 3)
        sc = (q @ k.transpose(0, 1, 3, 2)) / math.sqrt(HEAD_DIM)
        sc = jnp.where(causal, sc, -1e30)
        pr = jax.nn.softmax(sc, axis=-1)
        o = (pr @ v).transpose(0, 2, 1, 3).reshape(B, S, H)
        h = h + o @ p['w_ao'][l] + p['b_ao'][l]
        m_in = ln(h, p['ln2_g'][l], p['ln2_b'][l])
        m = m_in @ p['w_fc'][l] + p['b_fc'][l]
        m = 0.5 * m * (1.0 + jnp.tanh(math.sqrt(2.0 / math.pi) * (m + 0.044715 * m ** 3)))
        h = h + m @ p['w_mp'][l] + p['b_mp'][l]
    y = ln(h, p['lnf_g'], p['lnf_b']).reshape(B, T, 3, H)
    ha, hs = y[:, :, 2], y[:, :, 1]
    ret = ha @ p['w_ret'] + p['b_ret']
    stp = ha @ p['w_st'] + p['b_st']
    act = jnp.tanh(hs @ p['w_act'] + p['b_act'])
    return stp, act, ret


if __name__ == "__main__":
    key = jax.random.PRNGKey(0)
    kp, ks, ka, kr, kt = jax.random.split(key, 5)
    params = init_params(kp)

    B, T = 2, 8
    states = jax.random.normal(ks, (B, T, STATE_DIM), jnp.float32)
    actions = jax.random.normal(ka, (B, T, ACT_DIM), jnp.float32)
    returns_to_go = jax.random.normal(kr, (B, T, 1), jnp.float32) * 100.0
    timesteps = jax.random.randint(kt, (B, T), 0, MAX_LEN)

    sp, ap, rp = decision_transformer_forward(params, states, actions, returns_to_go, timesteps)
    jax.block_until_ready((sp, ap, rp))

    assert sp.shape == (B, T, STATE_DIM)
    assert ap.shape == (B, T, ACT_DIM)
    assert rp.shape == (B, T, 1)
    assert bool(jnp.all(jnp.isfinite(sp)))
    assert bool(jnp.all(jnp.isfinite(ap)))
    assert bool(jnp.all(jnp.isfinite(rp)))

    # numerical check against the pure-JAX f32 (interleaved-order, exact-softmax) reference
    sp_r, ap_r, rp_r = _reference_forward(params, states, actions, returns_to_go, timesteps)
    assert bool(jnp.allclose(sp, sp_r, rtol=5e-2, atol=1e-2))
    assert bool(jnp.allclose(ap, ap_r, rtol=5e-2, atol=1e-2))
    assert bool(jnp.allclose(rp, rp_r, rtol=5e-2, atol=1e-2))

    print("KERNEL_OK")
</pallas_src>

<mosaic_0001>
module attributes {stable_mosaic.version = 11 : i64} {
  func.func @_dt_kernel(%arg0: i32, %arg1: memref<16x88xbf16, #tpu.memory_space<vmem>>, %arg2: memref<48x48xf32, #tpu.memory_space<vmem>>, %arg3: memref<8x192xf32, #tpu.memory_space<vmem>>, %arg4: memref<2x8x256xf32, #tpu.memory_space<vmem>>, %arg5: memref<88x192xbf16, #tpu.memory_space<vmem>>, %arg6: memref<2x64x192xbf16, #tpu.memory_space<vmem>>, %arg7: memref<2x64x64xbf16, #tpu.memory_space<vmem>>, %arg8: memref<2x64x256xbf16, #tpu.memory_space<vmem>>, %arg9: memref<2x256x64xbf16, #tpu.memory_space<vmem>>, %arg10: memref<128x128xbf16, #tpu.memory_space<vmem>>, %arg11: memref<16x128xf32, #tpu.memory_space<vmem>>) attributes {dimension_semantics = [#tpu.dimension_semantics<arbitrary>], iteration_bounds = array<i64: 1>, scalar_prefetch = 0 : i64, scratch_operands = 0 : i64, tpu.core_type = #tpu.core_type<tc>, window_params = [{pipeline_mode = #tpu.pipeline_mode<synchronous>, transform_indices = @transform_0, window_bounds = array<i64: 16, 88>}, {pipeline_mode = #tpu.pipeline_mode<synchronous>, transform_indices = @transform_1, window_bounds = array<i64: 48, 48>}, {pipeline_mode = #tpu.pipeline_mode<synchronous>, transform_indices = @transform_2, window_bounds = array<i64: 8, 192>}, {pipeline_mode = #tpu.pipeline_mode<synchronous>, transform_indices = @transform_3, window_bounds = array<i64: 2, 8, 256>}, {pipeline_mode = #tpu.pipeline_mode<synchronous>, transform_indices = @transform_4, window_bounds = array<i64: 88, 192>}, {pipeline_mode = #tpu.pipeline_mode<synchronous>, transform_indices = @transform_5, window_bounds = array<i64: 2, 64, 192>}, {pipeline_mode = #tpu.pipeline_mode<synchronous>, transform_indices = @transform_6, window_bounds = array<i64: 2, 64, 64>}, {pipeline_mode = #tpu.pipeline_mode<synchronous>, transform_indices = @transform_7, window_bounds = array<i64: 2, 64, 256>}, {pipeline_mode = #tpu.pipeline_mode<synchronous>, transform_indices = @transform_8, window_bounds = array<i64: 2, 256, 64>}, {pipeline_mode = #tpu.pipeline_mode<synchronous>, transform_indices = @transform_9, window_bounds = array<i64: 128, 128>}, {pipeline_mode = #tpu.pipeline_mode<synchronous>, transform_indices = @transform_10, window_bounds = array<i64: 16, 128>}]} {
    %c0 = arith.constant 0 : index
    %c0_0 = arith.constant 0 : index
    %0 = vector.load %arg3[%c0, %c0_0] : memref<8x192xf32, #tpu.memory_space<vmem>>, vector<8x192xf32>
    %c0_1 = arith.constant 0 : index
    %c0_2 = arith.constant 0 : index
    %c0_3 = arith.constant 0 : index
    %1 = vector.load %arg4[%c0_1, %c0_2, %c0_3] : memref<2x8x256xf32, #tpu.memory_space<vmem>>, vector<2x8x256xf32>
    %c0_4 = arith.constant 0 : index
    %c0_5 = arith.constant 0 : index
    %2 = vector.load %arg2[%c0_4, %c0_5] : memref<48x48xf32, #tpu.memory_space<vmem>>, vector<48x48xf32>
    %c0_6 = arith.constant 0 : index
    %c0_7 = arith.constant 0 : index
    %3 = vector.load %arg1[%c0_6, %c0_7] : memref<16x88xbf16, #tpu.memory_space<vmem>>, vector<16x88xbf16>
    %c0_8 = arith.constant 0 : index
    %c0_9 = arith.constant 0 : index
    %4 = vector.load %arg5[%c0_8, %c0_9] : memref<88x192xbf16, #tpu.memory_space<vmem>>, vector<88x192xbf16>
    %cst = arith.constant dense<0.000000e+00> : vector<16x192xf32>
    %5 = tpu.matmul %3, %4, %cst {dimension_numbers = #tpu.dot_dimension_numbers<[1], [0], [0], [1], [0, 0, 1, 1], [], []>} : vector<16x88xbf16>, vector<88x192xbf16>, vector<16x192xf32> -> vector<16x192xf32>
    %6 = vector.extract_strided_slice %0 {offsets = [0, 0], sizes = [1, 192], strides = [1, 1]} : vector<8x192xf32> to vector<1x192xf32>
    %7 = vector.broadcast %6 : vector<1x192xf32> to vector<16x192xf32>
    %8 = arith.addf %5, %7 : vector<16x192xf32>
    %9 = vector.extract_strided_slice %8 {offsets = [0, 0], sizes = [16, 64], strides = [1, 1]} : vector<16x192xf32> to vector<16x64xf32>
    %10 = vector.extract_strided_slice %8 {offsets = [0, 64], sizes = [16, 64], strides = [1, 1]} : vector<16x192xf32> to vector<16x64xf32>
    %11 = vector.extract_strided_slice %8 {offsets = [0, 128], sizes = [16, 64], strides = [1, 1]} : vector<16x192xf32> to vector<16x64xf32>
    %12 = tpu.concatenate %9, %10, %11 in 0 : vector<16x64xf32>, vector<16x64xf32>, vector<16x64xf32> -> vector<48x64xf32>
    %13 = vector.extract_strided_slice %0 {offsets = [1, 0], sizes = [1, 64], strides = [1, 1]} : vector<8x192xf32> to vector<1x64xf32>
    %14 = vector.extract_strided_slice %0 {offsets = [2, 0], sizes = [1, 64], strides = [1, 1]} : vector<8x192xf32> to vector<1x64xf32>
    %cst_10 = arith.constant dense<0.000000e+00> : vector<48xf32>
    %15 = vector.multi_reduction <add>, %12, %cst_10 [1] : vector<48x64xf32> to vector<48xf32>
    %16 = vector.shape_cast %15 : vector<48xf32> to vector<48x1xf32>
    %cst_11 = arith.constant 6.400000e+01 : f32
    %17 = vector.broadcast %cst_11 : f32 to vector<48x1xf32>
    %18 = arith.divf %16, %17 : vector<48x1xf32>
    %19 = vector.broadcast %18 : vector<48x1xf32> to vector<48x64xf32>
    %20 = arith.subf %12, %19 : vector<48x64xf32>
    %21 = arith.mulf %20, %20 : vector<48x64xf32>
    %cst_12 = arith.constant dense<0.000000e+00> : vector<48xf32>
    %22 = vector.multi_reduction <add>, %21, %cst_12 [1] : vector<48x64xf32> to vector<48xf32>
    %23 = vector.shape_cast %22 : vector<48xf32> to vector<48x1xf32>
    %cst_13 = arith.constant 6.400000e+01 : f32
    %24 = vector.broadcast %cst_13 : f32 to vector<48x1xf32>
    %25 = arith.divf %23, %24 : vector<48x1xf32>
    %26 = vector.broadcast %18 : vector<48x1xf32> to vector<48x64xf32>
    %27 = arith.subf %12, %26 : vector<48x64xf32>
    %cst_14 = arith.constant 9.99999974E-6 : f32
    %28 = vector.broadcast %cst_14 : f32 to vector<48x1xf32>
    %29 = arith.addf %25, %28 : vector<48x1xf32>
    %30 = math.rsqrt %29 : vector<48x1xf32>
    %31 = vector.broadcast %30 : vector<48x1xf32> to vector<48x64xf32>
    %32 = arith.mulf %27, %31 : vector<48x64xf32>
    %33 = vector.broadcast %13 : vector<1x64xf32> to vector<48x64xf32>
    %34 = arith.mulf %32, %33 : vector<48x64xf32>
    %35 = vector.broadcast %14 : vector<1x64xf32> to vector<48x64xf32>
    %36 = arith.addf %34, %35 : vector<48x64xf32>
    %37 = vector.extract_strided_slice %1 {offsets = [0, 0, 0], sizes = [1, 8, 256], strides = [1, 1, 1]} : vector<2x8x256xf32> to vector<1x8x256xf32>
    %38 = vector.shape_cast %37 : vector<1x8x256xf32> to vector<8x256xf32>
    %39 = vector.extract_strided_slice %38 {offsets = [0, 0], sizes = [1, 64], strides = [1, 1]} : vector<8x256xf32> to vector<1x64xf32>
    %40 = vector.extract_strided_slice %38 {offsets = [1, 0], sizes = [1, 64], strides = [1, 1]} : vector<8x256xf32> to vector<1x64xf32>
    %cst_15 = arith.constant dense<0.000000e+00> : vector<48xf32>
    %41 = vector.multi_reduction <add>, %36, %cst_15 [1] : vector<48x64xf32> to vector<48xf32>
    %42 = vector.shape_cast %41 : vector<48xf32> to vector<48x1xf32>
    %cst_16 = arith.constant 6.400000e+01 : f32
    %43 = vector.broadcast %cst_16 : f32 to vector<48x1xf32>
    %44 = arith.divf %42, %43 : vector<48x1xf32>
    %45 = vector.broadcast %44 : vector<48x1xf32> to vector<48x64xf32>
    %46 = arith.subf %36, %45 : vector<48x64xf32>
    %47 = arith.mulf %46, %46 : vector<48x64xf32>
    %cst_17 = arith.constant dense<0.000000e+00> : vector<48xf32>
    %48 = vector.multi_reduction <add>, %47, %cst_17 [1] : vector<48x64xf32> to vector<48xf32>
    %49 = vector.shape_cast %48 : vector<48xf32> to vector<48x1xf32>
    %cst_18 = arith.constant 6.400000e+01 : f32
    %50 = vector.broadcast %cst_18 : f32 to vector<48x1xf32>
    %51 = arith.divf %49, %50 : vector<48x1xf32>
    %52 = vector.broadcast %44 : vector<48x1xf32> to vector<48x64xf32>
    %53 = arith.subf %36, %52 : vector<48x64xf32>
    %cst_19 = arith.constant 9.99999974E-6 : f32
    %54 = vector.broadcast %cst_19 : f32 to vector<48x1xf32>
    %55 = arith.addf %51, %54 : vector<48x1xf32>
    %56 = math.rsqrt %55 : vector<48x1xf32>
    %57 = vector.broadcast %56 : vector<48x1xf32> to vector<48x64xf32>
    %58 = arith.mulf %53, %57 : vector<48x64xf32>
    %59 = vector.broadcast %39 : vector<1x64xf32> to vector<48x64xf32>
    %60 = arith.mulf %58, %59 : vector<48x64xf32>
    %61 = vector.broadcast %40 : vector<1x64xf32> to vector<48x64xf32>
    %62 = arith.addf %60, %61 : vector<48x64xf32>
    %63 = arith.truncf %62 : vector<48x64xf32> to vector<48x64xbf16>
    %c0_20 = arith.constant 0 : index
    %c0_21 = arith.constant 0 : index
    %c0_22 = arith.constant 0 : index
    %64 = vector.load %arg6[%c0_20, %c0_21, %c0_22] : memref<2x64x192xbf16, #tpu.memory_space<vmem>>, vector<1x64x192xbf16>
    %65 = vector.shape_cast %64 : vector<1x64x192xbf16> to vector<64x192xbf16>
    %cst_23 = arith.constant dense<0.000000e+00> : vector<48x192xf32>
    %66 = tpu.matmul %63, %65, %cst_23 {dimension_numbers = #tpu.dot_dimension_numbers<[1], [0], [0], [1], [0, 0, 1, 1], [], []>} : vector<48x64xbf16>, vector<64x192xbf16>, vector<48x192xf32> -> vector<48x192xf32>
    %67 = vector.extract_strided_slice %38 {offsets = [2, 0], sizes = [1, 192], strides = [1, 1]} : vector<8x256xf32> to vector<1x192xf32>
    %68 = vector.broadcast %67 : vector<1x192xf32> to vector<48x192xf32>
    %69 = arith.addf %66, %68 : vector<48x192xf32>
    %70 = arith.truncf %69 : vector<48x192xf32> to vector<48x192xbf16>
    %71 = vector.extract_strided_slice %70 {offsets = [0, 0], sizes = [48, 16], strides = [1, 1]} : vector<48x192xbf16> to vector<48x16xbf16>
    %72 = vector.extract_strided_slice %70 {offsets = [0, 64], sizes = [48, 16], strides = [1, 1]} : vector<48x192xbf16> to vector<48x16xbf16>
    %73 = vector.extract_strided_slice %70 {offsets = [0, 128], sizes = [48, 16], strides = [1, 1]} : vector<48x192xbf16> to vector<48x16xbf16>
    %cst_24 = arith.constant dense<0.000000e+00> : vector<48x48xf32>
    %74 = tpu.matmul %71, %72, %cst_24 {dimension_numbers = #tpu.dot_dimension_numbers<[1], [1], [0], [0], [0, 0, 1, 0], [], []>} : vector<48x16xbf16>, vector<48x16xbf16>, vector<48x48xf32> -> vector<48x48xf32>
    %cst_25 = arith.constant 2.500000e-01 : f32
    %75 = vector.broadcast %cst_25 : f32 to vector<48x48xf32>
    %76 = arith.mulf %74, %75 : vector<48x48xf32>
    %77 = arith.addf %76, %2 : vector<48x48xf32>
    %cst_26 = arith.constant dense<0xFF800000> : vector<48xf32>
    %78 = vector.multi_reduction <maximumf>, %77, %cst_26 [1] : vector<48x48xf32> to vector<48xf32>
    %79 = vector.shape_cast %78 : vector<48xf32> to vector<48x1xf32>
    %80 = vector.broadcast %79 : vector<48x1xf32> to vector<48x48xf32>
    %81 = arith.subf %77, %80 : vector<48x48xf32>
    %82 = math.exp %81 : vector<48x48xf32>
    %cst_27 = arith.constant dense<0.000000e+00> : vector<48xf32>
    %83 = vector.multi_reduction <add>, %82, %cst_27 [1] : vector<48x48xf32> to vector<48xf32>
    %84 = vector.shape_cast %83 : vector<48xf32> to vector<48x1xf32>
    %85 = tpu.reciprocal %84 {approx = true} : vector<48x1xf32> -> vector<48x1xf32>
    %86 = vector.broadcast %85 : vector<48x1xf32> to vector<48x48xf32>
    %87 = arith.mulf %82, %86 : vector<48x48xf32>
    %88 = arith.truncf %87 : vector<48x48xf32> to vector<48x48xbf16>
    %cst_28 = arith.constant dense<0.000000e+00> : vector<48x16xf32>
    %89 = tpu.matmul %88, %73, %cst_28 {dimension_numbers = #tpu.dot_dimension_numbers<[1], [0], [0], [1], [0, 0, 1, 1], [], []>} : vector<48x48xbf16>, vector<48x16xbf16>, vector<48x16xf32> -> vector<48x16xf32>
    %90 = vector.extract_strided_slice %70 {offsets = [0, 16], sizes = [48, 16], strides = [1, 1]} : vector<48x192xbf16> to vector<48x16xbf16>
    %91 = vector.extract_strided_slice %70 {offsets = [0, 80], sizes = [48, 16], strides = [1, 1]} : vector<48x192xbf16> to vector<48x16xbf16>
    %92 = vector.extract_strided_slice %70 {offsets = [0, 144], sizes = [48, 16], strides = [1, 1]} : vector<48x192xbf16> to vector<48x16xbf16>
    %cst_29 = arith.constant dense<0.000000e+00> : vector<48x48xf32>
    %93 = tpu.matmul %90, %91, %cst_29 {dimension_numbers = #tpu.dot_dimension_numbers<[1], [1], [0], [0], [0, 0, 1, 0], [], []>} : vector<48x16xbf16>, vector<48x16xbf16>, vector<48x48xf32> -> vector<48x48xf32>
    %cst_30 = arith.constant 2.500000e-01 : f32
    %94 = vector.broadcast %cst_30 : f32 to vector<48x48xf32>
    %95 = arith.mulf %93, %94 : vector<48x48xf32>
    %96 = arith.addf %95, %2 : vector<48x48xf32>
    %cst_31 = arith.constant dense<0xFF800000> : vector<48xf32>
    %97 = vector.multi_reduction <maximumf>, %96, %cst_31 [1] : vector<48x48xf32> to vector<48xf32>
    %98 = vector.shape_cast %97 : vector<48xf32> to vector<48x1xf32>
    %99 = vector.broadcast %98 : vector<48x1xf32> to vector<48x48xf32>
    %100 = arith.subf %96, %99 : vector<48x48xf32>
    %101 = math.exp %100 : vector<48x48xf32>
    %cst_32 = arith.constant dense<0.000000e+00> : vector<48xf32>
    %102 = vector.multi_reduction <add>, %101, %cst_32 [1] : vector<48x48xf32> to vector<48xf32>
    %103 = vector.shape_cast %102 : vector<48xf32> to vector<48x1xf32>
    %104 = tpu.reciprocal %103 {approx = true} : vector<48x1xf32> -> vector<48x1xf32>
    %105 = vector.broadcast %104 : vector<48x1xf32> to vector<48x48xf32>
    %106 = arith.mulf %101, %105 : vector<48x48xf32>
    %107 = arith.truncf %106 : vector<48x48xf32> to vector<48x48xbf16>
    %cst_33 = arith.constant dense<0.000000e+00> : vector<48x16xf32>
    %108 = tpu.matmul %107, %92, %cst_33 {dimension_numbers = #tpu.dot_dimension_numbers<[1], [0], [0], [1], [0, 0, 1, 1], [], []>} : vector<48x48xbf16>, vector<48x16xbf16>, vector<48x16xf32> -> vector<48x16xf32>
    %109 = vector.extract_strided_slice %70 {offsets = [0, 32], sizes = [48, 16], strides = [1, 1]} : vector<48x192xbf16> to vector<48x16xbf16>
    %110 = vector.extract_strided_slice %70 {offsets = [0, 96], sizes = [48, 16], strides = [1, 1]} : vector<48x192xbf16> to vector<48x16xbf16>
    %111 = vector.extract_strided_slice %70 {offsets = [0, 160], sizes = [48, 16], strides = [1, 1]} : vector<48x192xbf16> to vector<48x16xbf16>
    %cst_34 = arith.constant dense<0.000000e+00> : vector<48x48xf32>
    %112 = tpu.matmul %109, %110, %cst_34 {dimension_numbers = #tpu.dot_dimension_numbers<[1], [1], [0], [0], [0, 0, 1, 0], [], []>} : vector<48x16xbf16>, vector<48x16xbf16>, vector<48x48xf32> -> vector<48x48xf32>
    %cst_35 = arith.constant 2.500000e-01 : f32
    %113 = vector.broadcast %cst_35 : f32 to vector<48x48xf32>
    %114 = arith.mulf %112, %113 : vector<48x48xf32>
    %115 = arith.addf %114, %2 : vector<48x48xf32>
    %cst_36 = arith.constant dense<0xFF800000> : vector<48xf32>
    %116 = vector.multi_reduction <maximumf>, %115, %cst_36 [1] : vector<48x48xf32> to vector<48xf32>
    %117 = vector.shape_cast %116 : vector<48xf32> to vector<48x1xf32>
    %118 = vector.broadcast %117 : vector<48x1xf32> to vector<48x48xf32>
    %119 = arith.subf %115, %118 : vector<48x48xf32>
    %120 = math.exp %119 : vector<48x48xf32>
    %cst_37 = arith.constant dense<0.000000e+00> : vector<48xf32>
    %121 = vector.multi_reduction <add>, %120, %cst_37 [1] : vector<48x48xf32> to vector<48xf32>
    %122 = vector.shape_cast %121 : vector<48xf32> to vector<48x1xf32>
    %123 = tpu.reciprocal %122 {approx = true} : vector<48x1xf32> -> vector<48x1xf32>
    %124 = vector.broadcast %123 : vector<48x1xf32> to vector<48x48xf32>
    %125 = arith.mulf %120, %124 : vector<48x48xf32>
    %126 = arith.truncf %125 : vector<48x48xf32> to vector<48x48xbf16>
    %cst_38 = arith.constant dense<0.000000e+00> : vector<48x16xf32>
    %127 = tpu.matmul %126, %111, %cst_38 {dimension_numbers = #tpu.dot_dimension_numbers<[1], [0], [0], [1], [0, 0, 1, 1], [], []>} : vector<48x48xbf16>, vector<48x16xbf16>, vector<48x16xf32> -> vector<48x16xf32>
    %128 = vector.extract_strided_slice %70 {offsets = [0, 48], sizes = [48, 16], strides = [1, 1]} : vector<48x192xbf16> to vector<48x16xbf16>
    %129 = vector.extract_strided_slice %70 {offsets = [0, 112], sizes = [48, 16], strides = [1, 1]} : vector<48x192xbf16> to vector<48x16xbf16>
    %130 = vector.extract_strided_slice %70 {offsets = [0, 176], sizes = [48, 16], strides = [1, 1]} : vector<48x192xbf16> to vector<48x16xbf16>
    %cst_39 = arith.constant dense<0.000000e+00> : vector<48x48xf32>
    %131 = tpu.matmul %128, %129, %cst_39 {dimension_numbers = #tpu.dot_dimension_numbers<[1], [1], [0], [0], [0, 0, 1, 0], [], []>} : vector<48x16xbf16>, vector<48x16xbf16>, vector<48x48xf32> -> vector<48x48xf32>
    %cst_40 = arith.constant 2.500000e-01 : f32
    %132 = vector.broadcast %cst_40 : f32 to vector<48x48xf32>
    %133 = arith.mulf %131, %132 : vector<48x48xf32>
    %134 = arith.addf %133, %2 : vector<48x48xf32>
    %cst_41 = arith.constant dense<0xFF800000> : vector<48xf32>
    %135 = vector.multi_reduction <maximumf>, %134, %cst_41 [1] : vector<48x48xf32> to vector<48xf32>
    %136 = vector.shape_cast %135 : vector<48xf32> to vector<48x1xf32>
    %137 = vector.broadcast %136 : vector<48x1xf32> to vector<48x48xf32>
    %138 = arith.subf %134, %137 : vector<48x48xf32>
    %139 = math.exp %138 : vector<48x48xf32>
    %cst_42 = arith.constant dense<0.000000e+00> : vector<48xf32>
    %140 = vector.multi_reduction <add>, %139, %cst_42 [1] : vector<48x48xf32> to vector<48xf32>
    %141 = vector.shape_cast %140 : vector<48xf32> to vector<48x1xf32>
    %142 = tpu.reciprocal %141 {approx = true} : vector<48x1xf32> -> vector<48x1xf32>
    %143 = vector.broadcast %142 : vector<48x1xf32> to vector<48x48xf32>
    %144 = arith.mulf %139, %143 : vector<48x48xf32>
    %145 = arith.truncf %144 : vector<48x48xf32> to vector<48x48xbf16>
    %cst_43 = arith.constant dense<0.000000e+00> : vector<48x16xf32>
    %146 = tpu.matmul %145, %130, %cst_43 {dimension_numbers = #tpu.dot_dimension_numbers<[1], [0], [0], [1], [0, 0, 1, 1], [], []>} : vector<48x48xbf16>, vector<48x16xbf16>, vector<48x16xf32> -> vector<48x16xf32>
    %147 = tpu.concatenate %89, %108, %127, %146 in 1 : vector<48x16xf32>, vector<48x16xf32>, vector<48x16xf32>, vector<48x16xf32> -> vector<48x64xf32>
    %148 = arith.truncf %147 : vector<48x64xf32> to vector<48x64xbf16>
    %c0_44 = arith.constant 0 : index
    %c0_45 = arith.constant 0 : index
    %c0_46 = arith.constant 0 : index
    %149 = vector.load %arg7[%c0_44, %c0_45, %c0_46] : memref<2x64x64xbf16, #tpu.memory_space<vmem>>, vector<1x64x64xbf16>
    %150 = vector.shape_cast %149 : vector<1x64x64xbf16> to vector<64x64xbf16>
    %cst_47 = arith.constant dense<0.000000e+00> : vector<48x64xf32>
    %151 = tpu.matmul %148, %150, %cst_47 {dimension_numbers = #tpu.dot_dimension_numbers<[1], [0], [0], [1], [0, 0, 1, 1], [], []>} : vector<48x64xbf16>, vector<64x64xbf16>, vector<48x64xf32> -> vector<48x64xf32>
    %152 = vector.extract_strided_slice %38 {offsets = [3, 0], sizes = [1, 64], strides = [1, 1]} : vector<8x256xf32> to vector<1x64xf32>
    %153 = vector.broadcast %152 : vector<1x64xf32> to vector<48x64xf32>
    %154 = arith.addf %151, %153 : vector<48x64xf32>
    %155 = arith.addf %36, %154 : vector<48x64xf32>
    %156 = vector.extract_strided_slice %38 {offsets = [4, 0], sizes = [1, 64], strides = [1, 1]} : vector<8x256xf32> to vector<1x64xf32>
    %157 = vector.extract_strided_slice %38 {offsets = [5, 0], sizes = [1, 64], strides = [1, 1]} : vector<8x256xf32> to vector<1x64xf32>
    %cst_48 = arith.constant dense<0.000000e+00> : vector<48xf32>
    %158 = vector.multi_reduction <add>, %155, %cst_48 [1] : vector<48x64xf32> to vector<48xf32>
    %159 = vector.shape_cast %158 : vector<48xf32> to vector<48x1xf32>
    %cst_49 = arith.constant 6.400000e+01 : f32
    %160 = vector.broadcast %cst_49 : f32 to vector<48x1xf32>
    %161 = arith.divf %159, %160 : vector<48x1xf32>
    %162 = vector.broadcast %161 : vector<48x1xf32> to vector<48x64xf32>
    %163 = arith.subf %155, %162 : vector<48x64xf32>
    %164 = arith.mulf %163, %163 : vector<48x64xf32>
    %cst_50 = arith.constant dense<0.000000e+00> : vector<48xf32>
    %165 = vector.multi_reduction <add>, %164, %cst_50 [1] : vector<48x64xf32> to vector<48xf32>
    %166 = vector.shape_cast %165 : vector<48xf32> to vector<48x1xf32>
    %cst_51 = arith.constant 6.400000e+01 : f32
    %167 = vector.broadcast %cst_51 : f32 to vector<48x1xf32>
    %168 = arith.divf %166, %167 : vector<48x1xf32>
    %169 = vector.broadcast %161 : vector<48x1xf32> to vector<48x64xf32>
    %170 = arith.subf %155, %169 : vector<48x64xf32>
    %cst_52 = arith.constant 9.99999974E-6 : f32
    %171 = vector.broadcast %cst_52 : f32 to vector<48x1xf32>
    %172 = arith.addf %168, %171 : vector<48x1xf32>
    %173 = math.rsqrt %172 : vector<48x1xf32>
    %174 = vector.broadcast %173 : vector<48x1xf32> to vector<48x64xf32>
    %175 = arith.mulf %170, %174 : vector<48x64xf32>
    %176 = vector.broadcast %156 : vector<1x64xf32> to vector<48x64xf32>
    %177 = arith.mulf %175, %176 : vector<48x64xf32>
    %178 = vector.broadcast %157 : vector<1x64xf32> to vector<48x64xf32>
    %179 = arith.addf %177, %178 : vector<48x64xf32>
    %180 = arith.truncf %179 : vector<48x64xf32> to vector<48x64xbf16>
    %c0_53 = arith.constant 0 : index
    %c0_54 = arith.constant 0 : index
    %c0_55 = arith.constant 0 : index
    %181 = vector.load %arg8[%c0_53, %c0_54, %c0_55] : memref<2x64x256xbf16, #tpu.memory_space<vmem>>, vector<1x64x256xbf16>
    %182 = vector.shape_cast %181 : vector<1x64x256xbf16> to vector<64x256xbf16>
    %cst_56 = arith.constant dense<0.000000e+00> : vector<48x256xf32>
    %183 = tpu.matmul %180, %182, %cst_56 {dimension_numbers = #tpu.dot_dimension_numbers<[1], [0], [0], [1], [0, 0, 1, 1], [], []>} : vector<48x64xbf16>, vector<64x256xbf16>, vector<48x256xf32> -> vector<48x256xf32>
    %184 = vector.extract_strided_slice %38 {offsets = [6, 0], sizes = [1, 256], strides = [1, 1]} : vector<8x256xf32> to vector<1x256xf32>
    %185 = vector.broadcast %184 : vector<1x256xf32> to vector<48x256xf32>
    %186 = arith.addf %183, %185 : vector<48x256xf32>
    %cst_57 = arith.constant 5.000000e-01 : f32
    %187 = vector.broadcast %cst_57 : f32 to vector<48x256xf32>
    %188 = arith.mulf %187, %186 : vector<48x256xf32>
    %cst_58 = arith.constant 4.471500e-02 : f32
    %189 = vector.broadcast %cst_58 : f32 to vector<48x256xf32>
    %190 = arith.mulf %189, %186 : vector<48x256xf32>
    %191 = arith.mulf %190, %186 : vector<48x256xf32>
    %192 = arith.mulf %191, %186 : vector<48x256xf32>
    %193 = arith.addf %186, %192 : vector<48x256xf32>
    %cst_59 = arith.constant 0.797884583 : f32
    %194 = vector.broadcast %cst_59 : f32 to vector<48x256xf32>
    %195 = arith.mulf %194, %193 : vector<48x256xf32>
    %196 = math.tanh %195 : vector<48x256xf32>
    %cst_60 = arith.constant 1.000000e+00 : f32
    %197 = vector.broadcast %cst_60 : f32 to vector<48x256xf32>
    %198 = arith.addf %197, %196 : vector<48x256xf32>
    %199 = arith.mulf %188, %198 : vector<48x256xf32>
    %200 = arith.truncf %199 : vector<48x256xf32> to vector<48x256xbf16>
    %c0_61 = arith.constant 0 : index
    %c0_62 = arith.constant 0 : index
    %c0_63 = arith.constant 0 : index
    %201 = vector.load %arg9[%c0_61, %c0_62, %c0_63] : memref<2x256x64xbf16, #tpu.memory_space<vmem>>, vector<1x256x64xbf16>
    %202 = vector.shape_cast %201 : vector<1x256x64xbf16> to vector<256x64xbf16>
    %cst_64 = arith.constant dense<0.000000e+00> : vector<48x64xf32>
    %203 = tpu.matmul %200, %202, %cst_64 {dimension_numbers = #tpu.dot_dimension_numbers<[1], [0], [0], [1], [0, 0, 1, 1], [], []>} : vector<48x256xbf16>, vector<256x64xbf16>, vector<48x64xf32> -> vector<48x64xf32>
    %204 = vector.extract_strided_slice %38 {offsets = [7, 0], sizes = [1, 64], strides = [1, 1]} : vector<8x256xf32> to vector<1x64xf32>
    %205 = vector.broadcast %204 : vector<1x64xf32> to vector<48x64xf32>
    %206 = arith.addf %203, %205 : vector<48x64xf32>
    %207 = arith.addf %155, %206 : vector<48x64xf32>
    %208 = vector.extract_strided_slice %1 {offsets = [1, 0, 0], sizes = [1, 8, 256], strides = [1, 1, 1]} : vector<2x8x256xf32> to vector<1x8x256xf32>
    %209 = vector.shape_cast %208 : vector<1x8x256xf32> to vector<8x256xf32>
    %210 = vector.extract_strided_slice %209 {offsets = [0, 0], sizes = [1, 64], strides = [1, 1]} : vector<8x256xf32> to vector<1x64xf32>
    %211 = vector.extract_strided_slice %209 {offsets = [1, 0], sizes = [1, 64], strides = [1, 1]} : vector<8x256xf32> to vector<1x64xf32>
    %cst_65 = arith.constant dense<0.000000e+00> : vector<48xf32>
    %212 = vector.multi_reduction <add>, %207, %cst_65 [1] : vector<48x64xf32> to vector<48xf32>
    %213 = vector.shape_cast %212 : vector<48xf32> to vector<48x1xf32>
    %cst_66 = arith.constant 6.400000e+01 : f32
    %214 = vector.broadcast %cst_66 : f32 to vector<48x1xf32>
    %215 = arith.divf %213, %214 : vector<48x1xf32>
    %216 = vector.broadcast %215 : vector<48x1xf32> to vector<48x64xf32>
    %217 = arith.subf %207, %216 : vector<48x64xf32>
    %218 = arith.mulf %217, %217 : vector<48x64xf32>
    %cst_67 = arith.constant dense<0.000000e+00> : vector<48xf32>
    %219 = vector.multi_reduction <add>, %218, %cst_67 [1] : vector<48x64xf32> to vector<48xf32>
    %220 = vector.shape_cast %219 : vector<48xf32> to vector<48x1xf32>
    %cst_68 = arith.constant 6.400000e+01 : f32
    %221 = vector.broadcast %cst_68 : f32 to vector<48x1xf32>
    %222 = arith.divf %220, %221 : vector<48x1xf32>
    %223 = vector.broadcast %215 : vector<48x1xf32> to vector<48x64xf32>
    %224 = arith.subf %207, %223 : vector<48x64xf32>
    %cst_69 = arith.constant 9.99999974E-6 : f32
    %225 = vector.broadcast %cst_69 : f32 to vector<48x1xf32>
    %226 = arith.addf %222, %225 : vector<48x1xf32>
    %227 = math.rsqrt %226 : vector<48x1xf32>
    %228 = vector.broadcast %227 : vector<48x1xf32> to vector<48x64xf32>
    %229 = arith.mulf %224, %228 : vector<48x64xf32>
    %230 = vector.broadcast %210 : vector<1x64xf32> to vector<48x64xf32>
    %231 = arith.mulf %229, %230 : vector<48x64xf32>
    %232 = vector.broadcast %211 : vector<1x64xf32> to vector<48x64xf32>
    %233 = arith.addf %231, %232 : vector<48x64xf32>
    %234 = arith.truncf %233 : vector<48x64xf32> to vector<48x64xbf16>
    %c1 = arith.constant 1 : index
    %c0_70 = arith.constant 0 : index
    %c0_71 = arith.constant 0 : index
    %235 = vector.load %arg6[%c1, %c0_70, %c0_71] : memref<2x64x192xbf16, #tpu.memory_space<vmem>>, vector<1x64x192xbf16>
    %236 = vector.shape_cast %235 : vector<1x64x192xbf16> to vector<64x192xbf16>
    %cst_72 = arith.constant dense<0.000000e+00> : vector<48x192xf32>
    %237 = tpu.matmul %234, %236, %cst_72 {dimension_numbers = #tpu.dot_dimension_numbers<[1], [0], [0], [1], [0, 0, 1, 1], [], []>} : vector<48x64xbf16>, vector<64x192xbf16>, vector<48x192xf32> -> vector<48x192xf32>
    %238 = vector.extract_strided_slice %209 {offsets = [2, 0], sizes = [1, 192], strides = [1, 1]} : vector<8x256xf32> to vector<1x192xf32>
    %239 = vector.broadcast %238 : vector<1x192xf32> to vector<48x192xf32>
    %240 = arith.addf %237, %239 : vector<48x192xf32>
    %241 = arith.truncf %240 : vector<48x192xf32> to vector<48x192xbf16>
    %242 = vector.extract_strided_slice %241 {offsets = [0, 0], sizes = [48, 16], strides = [1, 1]} : vector<48x192xbf16> to vector<48x16xbf16>
    %243 = vector.extract_strided_slice %241 {offsets = [0, 64], sizes = [48, 16], strides = [1, 1]} : vector<48x192xbf16> to vector<48x16xbf16>
    %244 = vector.extract_strided_slice %241 {offsets = [0, 128], sizes = [48, 16], strides = [1, 1]} : vector<48x192xbf16> to vector<48x16xbf16>
    %cst_73 = arith.constant dense<0.000000e+00> : vector<48x48xf32>
    %245 = tpu.matmul %242, %243, %cst_73 {dimension_numbers = #tpu.dot_dimension_numbers<[1], [1], [0], [0], [0, 0, 1, 0], [], []>} : vector<48x16xbf16>, vector<48x16xbf16>, vector<48x48xf32> -> vector<48x48xf32>
    %cst_74 = arith.constant 2.500000e-01 : f32
    %246 = vector.broadcast %cst_74 : f32 to vector<48x48xf32>
    %247 = arith.mulf %245, %246 : vector<48x48xf32>
    %248 = arith.addf %247, %2 : vector<48x48xf32>
    %cst_75 = arith.constant dense<0xFF800000> : vector<48xf32>
    %249 = vector.multi_reduction <maximumf>, %248, %cst_75 [1] : vector<48x48xf32> to vector<48xf32>
    %250 = vector.shape_cast %249 : vector<48xf32> to vector<48x1xf32>
    %251 = vector.broadcast %250 : vector<48x1xf32> to vector<48x48xf32>
    %252 = arith.subf %248, %251 : vector<48x48xf32>
    %253 = math.exp %252 : vector<48x48xf32>
    %cst_76 = arith.constant dense<0.000000e+00> : vector<48xf32>
    %254 = vector.multi_reduction <add>, %253, %cst_76 [1] : vector<48x48xf32> to vector<48xf32>
    %255 = vector.shape_cast %254 : vector<48xf32> to vector<48x1xf32>
    %256 = tpu.reciprocal %255 {approx = true} : vector<48x1xf32> -> vector<48x1xf32>
    %257 = vector.broadcast %256 : vector<48x1xf32> to vector<48x48xf32>
    %258 = arith.mulf %253, %257 : vector<48x48xf32>
    %259 = arith.truncf %258 : vector<48x48xf32> to vector<48x48xbf16>
    %cst_77 = arith.constant dense<0.000000e+00> : vector<48x16xf32>
    %260 = tpu.matmul %259, %244, %cst_77 {dimension_numbers = #tpu.dot_dimension_numbers<[1], [0], [0], [1], [0, 0, 1, 1], [], []>} : vector<48x48xbf16>, vector<48x16xbf16>, vector<48x16xf32> -> vector<48x16xf32>
    %261 = vector.extract_strided_slice %241 {offsets = [0, 16], sizes = [48, 16], strides = [1, 1]} : vector<48x192xbf16> to vector<48x16xbf16>
    %262 = vector.extract_strided_slice %241 {offsets = [0, 80], sizes = [48, 16], strides = [1, 1]} : vector<48x192xbf16> to vector<48x16xbf16>
    %263 = vector.extract_strided_slice %241 {offsets = [0, 144], sizes = [48, 16], strides = [1, 1]} : vector<48x192xbf16> to vector<48x16xbf16>
    %cst_78 = arith.constant dense<0.000000e+00> : vector<48x48xf32>
    %264 = tpu.matmul %261, %262, %cst_78 {dimension_numbers = #tpu.dot_dimension_numbers<[1], [1], [0], [0], [0, 0, 1, 0], [], []>} : vector<48x16xbf16>, vector<48x16xbf16>, vector<48x48xf32> -> vector<48x48xf32>
    %cst_79 = arith.constant 2.500000e-01 : f32
    %265 = vector.broadcast %cst_79 : f32 to vector<48x48xf32>
    %266 = arith.mulf %264, %265 : vector<48x48xf32>
    %267 = arith.addf %266, %2 : vector<48x48xf32>
    %cst_80 = arith.constant dense<0xFF800000> : vector<48xf32>
    %268 = vector.multi_reduction <maximumf>, %267, %cst_80 [1] : vector<48x48xf32> to vector<48xf32>
    %269 = vector.shape_cast %268 : vector<48xf32> to vector<48x1xf32>
    %270 = vector.broadcast %269 : vector<48x1xf32> to vector<48x48xf32>
    %271 = arith.subf %267, %270 : vector<48x48xf32>
    %272 = math.exp %271 : vector<48x48xf32>
    %cst_81 = arith.constant dense<0.000000e+00> : vector<48xf32>
    %273 = vector.multi_reduction <add>, %272, %cst_81 [1] : vector<48x48xf32> to vector<48xf32>
    %274 = vector.shape_cast %273 : vector<48xf32> to vector<48x1xf32>
    %275 = tpu.reciprocal %274 {approx = true} : vector<48x1xf32> -> vector<48x1xf32>
    %276 = vector.broadcast %275 : vector<48x1xf32> to vector<48x48xf32>
    %277 = arith.mulf %272, %276 : vector<48x48xf32>
    %278 = arith.truncf %277 : vector<48x48xf32> to vector<48x48xbf16>
    %cst_82 = arith.constant dense<0.000000e+00> : vector<48x16xf32>
    %279 = tpu.matmul %278, %263, %cst_82 {dimension_numbers = #tpu.dot_dimension_numbers<[1], [0], [0], [1], [0, 0, 1, 1], [], []>} : vector<48x48xbf16>, vector<48x16xbf16>, vector<48x16xf32> -> vector<48x16xf32>
    %280 = vector.extract_strided_slice %241 {offsets = [0, 32], sizes = [48, 16], strides = [1, 1]} : vector<48x192xbf16> to vector<48x16xbf16>
    %281 = vector.extract_strided_slice %241 {offsets = [0, 96], sizes = [48, 16], strides = [1, 1]} : vector<48x192xbf16> to vector<48x16xbf16>
    %282 = vector.extract_strided_slice %241 {offsets = [0, 160], sizes = [48, 16], strides = [1, 1]} : vector<48x192xbf16> to vector<48x16xbf16>
    %cst_83 = arith.constant dense<0.000000e+00> : vector<48x48xf32>
    %283 = tpu.matmul %280, %281, %cst_83 {dimension_numbers = #tpu.dot_dimension_numbers<[1], [1], [0], [0], [0, 0, 1, 0], [], []>} : vector<48x16xbf16>, vector<48x16xbf16>, vector<48x48xf32> -> vector<48x48xf32>
    %cst_84 = arith.constant 2.500000e-01 : f32
    %284 = vector.broadcast %cst_84 : f32 to vector<48x48xf32>
    %285 = arith.mulf %283, %284 : vector<48x48xf32>
    %286 = arith.addf %285, %2 : vector<48x48xf32>
    %cst_85 = arith.constant dense<0xFF800000> : vector<48xf32>
    %287 = vector.multi_reduction <maximumf>, %286, %cst_85 [1] : vector<48x48xf32> to vector<48xf32>
    %288 = vector.shape_cast %287 : vector<48xf32> to vector<48x1xf32>
    %289 = vector.broadcast %288 : vector<48x1xf32> to vector<48x48xf32>
    %290 = arith.subf %286, %289 : vector<48x48xf32>
    %291 = math.exp %290 : vector<48x48xf32>
    %cst_86 = arith.constant dense<0.000000e+00> : vector<48xf32>
    %292 = vector.multi_reduction <add>, %291, %cst_86 [1] : vector<48x48xf32> to vector<48xf32>
    %293 = vector.shape_cast %292 : vector<48xf32> to vector<48x1xf32>
    %294 = tpu.reciprocal %293 {approx = true} : vector<48x1xf32> -> vector<48x1xf32>
    %295 = vector.broadcast %294 : vector<48x1xf32> to vector<48x48xf32>
    %296 = arith.mulf %291, %295 : vector<48x48xf32>
    %297 = arith.truncf %296 : vector<48x48xf32> to vector<48x48xbf16>
    %cst_87 = arith.constant dense<0.000000e+00> : vector<48x16xf32>
    %298 = tpu.matmul %297, %282, %cst_87 {dimension_numbers = #tpu.dot_dimension_numbers<[1], [0], [0], [1], [0, 0, 1, 1], [], []>} : vector<48x48xbf16>, vector<48x16xbf16>, vector<48x16xf32> -> vector<48x16xf32>
    %299 = vector.extract_strided_slice %241 {offsets = [0, 48], sizes = [48, 16], strides = [1, 1]} : vector<48x192xbf16> to vector<48x16xbf16>
    %300 = vector.extract_strided_slice %241 {offsets = [0, 112], sizes = [48, 16], strides = [1, 1]} : vector<48x192xbf16> to vector<48x16xbf16>
    %301 = vector.extract_strided_slice %241 {offsets = [0, 176], sizes = [48, 16], strides = [1, 1]} : vector<48x192xbf16> to vector<48x16xbf16>
    %cst_88 = arith.constant dense<0.000000e+00> : vector<48x48xf32>
    %302 = tpu.matmul %299, %300, %cst_88 {dimension_numbers = #tpu.dot_dimension_numbers<[1], [1], [0], [0], [0, 0, 1, 0], [], []>} : vector<48x16xbf16>, vector<48x16xbf16>, vector<48x48xf32> -> vector<48x48xf32>
    %cst_89 = arith.constant 2.500000e-01 : f32
    %303 = vector.broadcast %cst_89 : f32 to vector<48x48xf32>
    %304 = arith.mulf %302, %303 : vector<48x48xf32>
    %305 = arith.addf %304, %2 : vector<48x48xf32>
    %cst_90 = arith.constant dense<0xFF800000> : vector<48xf32>
    %306 = vector.multi_reduction <maximumf>, %305, %cst_90 [1] : vector<48x48xf32> to vector<48xf32>
    %307 = vector.shape_cast %306 : vector<48xf32> to vector<48x1xf32>
    %308 = vector.broadcast %307 : vector<48x1xf32> to vector<48x48xf32>
    %309 = arith.subf %305, %308 : vector<48x48xf32>
    %310 = math.exp %309 : vector<48x48xf32>
    %cst_91 = arith.constant dense<0.000000e+00> : vector<48xf32>
    %311 = vector.multi_reduction <add>, %310, %cst_91 [1] : vector<48x48xf32> to vector<48xf32>
    %312 = vector.shape_cast %311 : vector<48xf32> to vector<48x1xf32>
    %313 = tpu.reciprocal %312 {approx = true} : vector<48x1xf32> -> vector<48x1xf32>
    %314 = vector.broadcast %313 : vector<48x1xf32> to vector<48x48xf32>
    %315 = arith.mulf %310, %314 : vector<48x48xf32>
    %316 = arith.truncf %315 : vector<48x48xf32> to vector<48x48xbf16>
    %cst_92 = arith.constant dense<0.000000e+00> : vector<48x16xf32>
    %317 = tpu.matmul %316, %301, %cst_92 {dimension_numbers = #tpu.dot_dimension_numbers<[1], [0], [0], [1], [0, 0, 1, 1], [], []>} : vector<48x48xbf16>, vector<48x16xbf16>, vector<48x16xf32> -> vector<48x16xf32>
    %318 = tpu.concatenate %260, %279, %298, %317 in 1 : vector<48x16xf32>, vector<48x16xf32>, vector<48x16xf32>, vector<48x16xf32> -> vector<48x64xf32>
    %319 = arith.truncf %318 : vector<48x64xf32> to vector<48x64xbf16>
    %c1_93 = arith.constant 1 : index
    %c0_94 = arith.constant 0 : index
    %c0_95 = arith.constant 0 : index
    %320 = vector.load %arg7[%c1_93, %c0_94, %c0_95] : memref<2x64x64xbf16, #tpu.memory_space<vmem>>, vector<1x64x64xbf16>
    %321 = vector.shape_cast %320 : vector<1x64x64xbf16> to vector<64x64xbf16>
    %cst_96 = arith.constant dense<0.000000e+00> : vector<48x64xf32>
    %322 = tpu.matmul %319, %321, %cst_96 {dimension_numbers = #tpu.dot_dimension_numbers<[1], [0], [0], [1], [0, 0, 1, 1], [], []>} : vector<48x64xbf16>, vector<64x64xbf16>, vector<48x64xf32> -> vector<48x64xf32>
    %323 = vector.extract_strided_slice %209 {offsets = [3, 0], sizes = [1, 64], strides = [1, 1]} : vector<8x256xf32> to vector<1x64xf32>
    %324 = vector.broadcast %323 : vector<1x64xf32> to vector<48x64xf32>
    %325 = arith.addf %322, %324 : vector<48x64xf32>
    %326 = arith.addf %207, %325 : vector<48x64xf32>
    %327 = vector.extract_strided_slice %209 {offsets = [4, 0], sizes = [1, 64], strides = [1, 1]} : vector<8x256xf32> to vector<1x64xf32>
    %328 = vector.extract_strided_slice %209 {offsets = [5, 0], sizes = [1, 64], strides = [1, 1]} : vector<8x256xf32> to vector<1x64xf32>
    %cst_97 = arith.constant dense<0.000000e+00> : vector<48xf32>
    %329 = vector.multi_reduction <add>, %326, %cst_97 [1] : vector<48x64xf32> to vector<48xf32>
    %330 = vector.shape_cast %329 : vector<48xf32> to vector<48x1xf32>
    %cst_98 = arith.constant 6.400000e+01 : f32
    %331 = vector.broadcast %cst_98 : f32 to vector<48x1xf32>
    %332 = arith.divf %330, %331 : vector<48x1xf32>
    %333 = vector.broadcast %332 : vector<48x1xf32> to vector<48x64xf32>
    %334 = arith.subf %326, %333 : vector<48x64xf32>
    %335 = arith.mulf %334, %334 : vector<48x64xf32>
    %cst_99 = arith.constant dense<0.000000e+00> : vector<48xf32>
    %336 = vector.multi_reduction <add>, %335, %cst_99 [1] : vector<48x64xf32> to vector<48xf32>
    %337 = vector.shape_cast %336 : vector<48xf32> to vector<48x1xf32>
    %cst_100 = arith.constant 6.400000e+01 : f32
    %338 = vector.broadcast %cst_100 : f32 to vector<48x1xf32>
    %339 = arith.divf %337, %338 : vector<48x1xf32>
    %340 = vector.broadcast %332 : vector<48x1xf32> to vector<48x64xf32>
    %341 = arith.subf %326, %340 : vector<48x64xf32>
    %cst_101 = arith.constant 9.99999974E-6 : f32
    %342 = vector.broadcast %cst_101 : f32 to vector<48x1xf32>
    %343 = arith.addf %339, %342 : vector<48x1xf32>
    %344 = math.rsqrt %343 : vector<48x1xf32>
    %345 = vector.broadcast %344 : vector<48x1xf32> to vector<48x64xf32>
    %346 = arith.mulf %341, %345 : vector<48x64xf32>
    %347 = vector.broadcast %327 : vector<1x64xf32> to vector<48x64xf32>
    %348 = arith.mulf %346, %347 : vector<48x64xf32>
    %349 = vector.broadcast %328 : vector<1x64xf32> to vector<48x64xf32>
    %350 = arith.addf %348, %349 : vector<48x64xf32>
    %351 = arith.truncf %350 : vector<48x64xf32> to vector<48x64xbf16>
    %c1_102 = arith.constant 1 : index
    %c0_103 = arith.constant 0 : index
    %c0_104 = arith.constant 0 : index
    %352 = vector.load %arg8[%c1_102, %c0_103, %c0_104] : memref<2x64x256xbf16, #tpu.memory_space<vmem>>, vector<1x64x256xbf16>
    %353 = vector.shape_cast %352 : vector<1x64x256xbf16> to vector<64x256xbf16>
    %cst_105 = arith.constant dense<0.000000e+00> : vector<48x256xf32>
    %354 = tpu.matmul %351, %353, %cst_105 {dimension_numbers = #tpu.dot_dimension_numbers<[1], [0], [0], [1], [0, 0, 1, 1], [], []>} : vector<48x64xbf16>, vector<64x256xbf16>, vector<48x256xf32> -> vector<48x256xf32>
    %355 = vector.extract_strided_slice %209 {offsets = [6, 0], sizes = [1, 256], strides = [1, 1]} : vector<8x256xf32> to vector<1x256xf32>
    %356 = vector.broadcast %355 : vector<1x256xf32> to vector<48x256xf32>
    %357 = arith.addf %354, %356 : vector<48x256xf32>
    %cst_106 = arith.constant 5.000000e-01 : f32
    %358 = vector.broadcast %cst_106 : f32 to vector<48x256xf32>
    %359 = arith.mulf %358, %357 : vector<48x256xf32>
    %cst_107 = arith.constant 4.471500e-02 : f32
    %360 = vector.broadcast %cst_107 : f32 to vector<48x256xf32>
    %361 = arith.mulf %360, %357 : vector<48x256xf32>
    %362 = arith.mulf %361, %357 : vector<48x256xf32>
    %363 = arith.mulf %362, %357 : vector<48x256xf32>
    %364 = arith.addf %357, %363 : vector<48x256xf32>
    %cst_108 = arith.constant 0.797884583 : f32
    %365 = vector.broadcast %cst_108 : f32 to vector<48x256xf32>
    %366 = arith.mulf %365, %364 : vector<48x256xf32>
    %367 = math.tanh %366 : vector<48x256xf32>
    %cst_109 = arith.constant 1.000000e+00 : f32
    %368 = vector.broadcast %cst_109 : f32 to vector<48x256xf32>
    %369 = arith.addf %368, %367 : vector<48x256xf32>
    %370 = arith.mulf %359, %369 : vector<48x256xf32>
    %371 = arith.truncf %370 : vector<48x256xf32> to vector<48x256xbf16>
    %c1_110 = arith.constant 1 : index
    %c0_111 = arith.constant 0 : index
    %c0_112 = arith.constant 0 : index
    %372 = vector.load %arg9[%c1_110, %c0_111, %c0_112] : memref<2x256x64xbf16, #tpu.memory_space<vmem>>, vector<1x256x64xbf16>
    %373 = vector.shape_cast %372 : vector<1x256x64xbf16> to vector<256x64xbf16>
    %cst_113 = arith.constant dense<0.000000e+00> : vector<48x64xf32>
    %374 = tpu.matmul %371, %373, %cst_113 {dimension_numbers = #tpu.dot_dimension_numbers<[1], [0], [0], [1], [0, 0, 1, 1], [], []>} : vector<48x256xbf16>, vector<256x64xbf16>, vector<48x64xf32> -> vector<48x64xf32>
    %375 = vector.extract_strided_slice %209 {offsets = [7, 0], sizes = [1, 64], strides = [1, 1]} : vector<8x256xf32> to vector<1x64xf32>
    %376 = vector.broadcast %375 : vector<1x64xf32> to vector<48x64xf32>
    %377 = arith.addf %374, %376 : vector<48x64xf32>
    %378 = arith.addf %326, %377 : vector<48x64xf32>
    %379 = vector.extract_strided_slice %0 {offsets = [3, 0], sizes = [1, 64], strides = [1, 1]} : vector<8x192xf32> to vector<1x64xf32>
    %380 = vector.extract_strided_slice %0 {offsets = [4, 0], sizes = [1, 64], strides = [1, 1]} : vector<8x192xf32> to vector<1x64xf32>
    %cst_114 = arith.constant dense<0.000000e+00> : vector<48xf32>
    %381 = vector.multi_reduction <add>, %378, %cst_114 [1] : vector<48x64xf32> to vector<48xf32>
    %382 = vector.shape_cast %381 : vector<48xf32> to vector<48x1xf32>
    %cst_115 = arith.constant 6.400000e+01 : f32
    %383 = vector.broadcast %cst_115 : f32 to vector<48x1xf32>
    %384 = arith.divf %382, %383 : vector<48x1xf32>
    %385 = vector.broadcast %384 : vector<48x1xf32> to vector<48x64xf32>
    %386 = arith.subf %378, %385 : vector<48x64xf32>
    %387 = arith.mulf %386, %386 : vector<48x64xf32>
    %cst_116 = arith.constant dense<0.000000e+00> : vector<48xf32>
    %388 = vector.multi_reduction <add>, %387, %cst_116 [1] : vector<48x64xf32> to vector<48xf32>
    %389 = vector.shape_cast %388 : vector<48xf32> to vector<48x1xf32>
    %cst_117 = arith.constant 6.400000e+01 : f32
    %390 = vector.broadcast %cst_117 : f32 to vector<48x1xf32>
    %391 = arith.divf %389, %390 : vector<48x1xf32>
    %392 = vector.broadcast %384 : vector<48x1xf32> to vector<48x64xf32>
    %393 = arith.subf %378, %392 : vector<48x64xf32>
    %cst_118 = arith.constant 9.99999974E-6 : f32
    %394 = vector.broadcast %cst_118 : f32 to vector<48x1xf32>
    %395 = arith.addf %391, %394 : vector<48x1xf32>
    %396 = math.rsqrt %395 : vector<48x1xf32>
    %397 = vector.broadcast %396 : vector<48x1xf32> to vector<48x64xf32>
    %398 = arith.mulf %393, %397 : vector<48x64xf32>
    %399 = vector.broadcast %379 : vector<1x64xf32> to vector<48x64xf32>
    %400 = arith.mulf %398, %399 : vector<48x64xf32>
    %401 = vector.broadcast %380 : vector<1x64xf32> to vector<48x64xf32>
    %402 = arith.addf %400, %401 : vector<48x64xf32>
    %403 = vector.extract_strided_slice %402 {offsets = [16, 0], sizes = [16, 64], strides = [1, 1]} : vector<48x64xf32> to vector<16x64xf32>
    %404 = vector.extract_strided_slice %402 {offsets = [32, 0], sizes = [16, 64], strides = [1, 1]} : vector<48x64xf32> to vector<16x64xf32>
    %405 = tpu.concatenate %404, %403 in 1 : vector<16x64xf32>, vector<16x64xf32> -> vector<16x128xf32>
    %406 = arith.truncf %405 : vector<16x128xf32> to vector<16x128xbf16>
    %c0_119 = arith.constant 0 : index
    %c0_120 = arith.constant 0 : index
    %407 = vector.load %arg10[%c0_119, %c0_120] : memref<128x128xbf16, #tpu.memory_space<vmem>>, vector<128x128xbf16>
    %cst_121 = arith.constant dense<0.000000e+00> : vector<16x128xf32>
    %408 = tpu.matmul %406, %407, %cst_121 {dimension_numbers = #tpu.dot_dimension_numbers<[1], [0], [0], [1], [0, 0, 1, 1], [], []>} : vector<16x128xbf16>, vector<128x128xbf16>, vector<16x128xf32> -> vector<16x128xf32>
    %409 = vector.extract_strided_slice %0 {offsets = [5, 0], sizes = [1, 128], strides = [1, 1]} : vector<8x192xf32> to vector<1x128xf32>
    %410 = vector.broadcast %409 : vector<1x128xf32> to vector<16x128xf32>
    %411 = arith.addf %408, %410 : vector<16x128xf32>
    %412 = tpu.iota {dimensions = array<i32: 1>} : vector<16x128xi32>
    %c18_i32 = arith.constant 18 : i32
    %413 = vector.broadcast %c18_i32 : i32 to vector<16x128xi32>
    %414 = arith.cmpi slt, %412, %413 : vector<16x128xi32>
    %415 = math.tanh %411 : vector<16x128xf32>
    %416 = arith.select %414, %411, %415 : vector<16x128xi1>, vector<16x128xf32>
    %c0_122 = arith.constant 0 : index
    %c0_123 = arith.constant 0 : index
    %417 = vector.load %arg11[%c0_122, %c0_123] : memref<16x128xf32, #tpu.memory_space<vmem>>, vector<16x128xf32>
    tpu.vector_store %arg11[%c0_122, %c0_123], %416 {strides = array<i32>} : memref<16x128xf32, #tpu.memory_space<vmem>>, vector<16x128xf32>,
    return
  }
  func.func @transform_0(%arg0: i32) -> (i32, i32) {
    %c0_i32 = arith.constant 0 : i32
    %c0_i32_0 = arith.constant 0 : i32
    %c0_i32_1 = arith.constant 0 : i32
    return %c0_i32, %c0_i32_0 : i32, i32
  }
  func.func @transform_1(%arg0: i32) -> (i32, i32) {
    %c0_i32 = arith.constant 0 : i32
    %c0_i32_0 = arith.constant 0 : i32
    %c0_i32_1 = arith.constant 0 : i32
    return %c0_i32, %c0_i32_0 : i32, i32
  }
  func.func @transform_2(%arg0: i32) -> (i32, i32) {
    %c0_i32 = arith.constant 0 : i32
    %c0_i32_0 = arith.constant 0 : i32
    %c0_i32_1 = arith.constant 0 : i32
    return %c0_i32, %c0_i32_0 : i32, i32
  }
  func.func @transform_3(%arg0: i32) -> (i32, i32, i32) {
    %c0_i32 = arith.constant 0 : i32
    %c0_i32_0 = arith.constant 0 : i32
    %c0_i32_1 = arith.constant 0 : i32
    %c0_i32_2 = arith.constant 0 : i32
    return %c0_i32, %c0_i32_0, %c0_i32_1 : i32, i32, i32
  }
  func.func @transform_4(%arg0: i32) -> (i32, i32) {
    %c0_i32 = arith.constant 0 : i32
    %c0_i32_0 = arith.constant 0 : i32
    %c0_i32_1 = arith.constant 0 : i32
    return %c0_i32, %c0_i32_0 : i32, i32
  }
  func.func @transform_5(%arg0: i32) -> (i32, i32, i32) {
    %c0_i32 = arith.constant 0 : i32
    %c0_i32_0 = arith.constant 0 : i32
    %c0_i32_1 = arith.constant 0 : i32
    %c0_i32_2 = arith.constant 0 : i32
    return %c0_i32, %c0_i32_0, %c0_i32_1 : i32, i32, i32
  }
  func.func @transform_6(%arg0: i32) -> (i32, i32, i32) {
    %c0_i32 = arith.constant 0 : i32
    %c0_i32_0 = arith.constant 0 : i32
    %c0_i32_1 = arith.constant 0 : i32
    %c0_i32_2 = arith.constant 0 : i32
    return %c0_i32, %c0_i32_0, %c0_i32_1 : i32, i32, i32
  }
  func.func @transform_7(%arg0: i32) -> (i32, i32, i32) {
    %c0_i32 = arith.constant 0 : i32
    %c0_i32_0 = arith.constant 0 : i32
    %c0_i32_1 = arith.constant 0 : i32
    %c0_i32_2 = arith.constant 0 : i32
    return %c0_i32, %c0_i32_0, %c0_i32_1 : i32, i32, i32
  }
  func.func @transform_8(%arg0: i32) -> (i32, i32, i32) {
    %c0_i32 = arith.constant 0 : i32
    %c0_i32_0 = arith.constant 0 : i32
    %c0_i32_1 = arith.constant 0 : i32
    %c0_i32_2 = arith.constant 0 : i32
    return %c0_i32, %c0_i32_0, %c0_i32_1 : i32, i32, i32
  }
  func.func @transform_9(%arg0: i32) -> (i32, i32) {
    %c0_i32 = arith.constant 0 : i32
    %c0_i32_0 = arith.constant 0 : i32
    %c0_i32_1 = arith.constant 0 : i32
    return %c0_i32, %c0_i32_0 : i32, i32
  }
  func.func @transform_10(%arg0: i32) -> (i32, i32) {
    %c0_i32 = arith.constant 0 : i32
    %c0_i32_0 = arith.constant 0 : i32
    %c0_i32_1 = arith.constant 0 : i32
    return %c0_i32, %c0_i32_0 : i32, i32
  }
}

</mosaic_0001>

<bundles_post_ra>
// kernel: decision_transformer_forward.1
= control target key start
LH: loop header
LB: loop body
LE: loop exit
PB: predicated region body
PF: predicated region fallthrough
CT: control target
= control target key end

     0   :  { %vm133_vm0 = vcmask 1043456   ;;  %v5663_v1 = vmov 0   ;;  %vm129_vm1 = vcmask 719872   ;;  %v61_v16 = vlaneseq  ;;  %s5667_s11 = smov 48   ;;  %s5668_s12 = smov 112   ;;  %s7584_s4 = inlined_call_operand.vmem [shape: bf16[88,192], index: 4, kind: input, shape index: {}]   ;;  %s7585_s0 = inlined_call_operand.vmem [shape: bf16[16,88], index: 0, kind: input, shape index: {}]   ;;  %s7586_s2 = inlined_call_operand.vmem [shape: f32[8,192], index: 2, kind: input, shape index: {}]   ;;  %s7587_s5 = inlined_call_operand.vmem [shape: bf16[2,64,192], index: 5, kind: input, shape index: {}]   ;;  %s7588_s3 = inlined_call_operand.vmem [shape: f32[2,8,256], index: 3, kind: input, shape index: {}]   ;;  %s7589_s1 = inlined_call_operand.vmem [shape: f32[48,48], index: 1, kind: input, shape index: {}]   ;;  %s7590_s6 = inlined_call_operand.vmem [shape: bf16[2,64,64], index: 6, kind: input, shape index: {}]   ;;  %s7591_s7 = inlined_call_operand.vmem [shape: bf16[2,64,256], index: 7, kind: input, shape index: {}]   ;;  %s7592_s8 = inlined_call_operand.vmem [shape: bf16[2,256,64], index: 8, kind: input, shape index: {}]   ;;  %s7593_s9 = inlined_call_operand.vmem [shape: bf16[128,128], index: 9, kind: input, shape index: {}]   ;;  %s7594_s10 = inlined_call_operand.vmem [shape: f32[16,128], index: 10, kind: output, shape index: {}]  }
   0x1   :  { %v60_v0 = vld [vmem:[%s7584_s4 + $0x50] sm:$0xff]  ;;  %172 = vmatprep.mubr.bf16.mxu0 %v5663_v1  ;;  %489 = vmatprep.mubr.bf16.mxu1 %v5663_v1  ;;  %v5228_v4 = vld [vmem:[%s7584_s4 + $0x44] ss:$8 sps:$4 sm:$0xff]   ;;  %v5230_v6 = vld [vmem:[%s7584_s4 + $0x40] ss:$8 sps:$4 sm:$0xff]   ;;  %vm191_vm2 = vcmask 523264  }
   0x2   :  { %v4381_v2 = vcombine.high %v60_v0, %v60_v0  ;;  %v4380_v3 = vcombine.low %v60_v0, %v60_v0  ;;  %v5231_v7 = vld [vmem:[%s7584_s4 + $0x34] ss:$8 sps:$4 sm:$0xff]   ;;  %v5233_v8 = vld [vmem:[%s7584_s4 + $0x30] ss:$8 sps:$4 sm:$0xff]   ;;  %v5234_v9 = vld [vmem:[%s7584_s4 + $0x24] ss:$8 sps:$4 sm:$0xff]  }
   0x3   :  { %v5236_v10 = vld [vmem:[%s7584_s4 + $0x20] ss:$8 sps:$4 sm:$0xff]   ;;  %v5237_v11 = vld [vmem:[%s7584_s4 + $0x14] ss:$8 sps:$4 sm:$0xff]   ;;  %v5239_v12 = vld [vmem:[%s7584_s4 + $0x10] ss:$8 sps:$4 sm:$0xff]  }
   0x4   :  { %4382 = vmatprep.subr.msk.bf16.mxu0 %vm133_vm0, %v4381_v2  ;;  %v135_v5 = vsel %vm133_vm0, %v4380_v3, 0  ;;  %v5240_v13 = vld [vmem:[%s7584_s4 + $0x4] ss:$8 sps:$4 sm:$0xff]   ;;  %v5242_v14 = vld [vmem:[%s7584_s4] ss:$8 sps:$4 sm:$0xff]   ;;  %v5767_v17 = vshrl.u32 %v61_v16, 7 }
   0x5   :  { %145 = vmatpush1.bf16.msra.mxu0 %v135_v5  ;;  %v5243_v15 = vld [vmem:[%s7585_s0] sm:$0xff]   ;;  %s5664_s0 = smov 64   ;;  %v37_v28 = vld [vmem:[%s7586_s2 + $0x8] sm:$0xff]  ;;  %vm5666_vm3 = vmmov 0   ;;  %vm535_vm4 = vcmask 130048   ;;  %vm623_vm5 = vcmask 392192  }
   0x6   :  { %146 = vmatprep.subr.bf16.mxu0 %v5228_v4  ;;  %v5770_v18 = vsub.s32 0, %v5767_v17  ;;  %v5775_v19 = vld [vmem:[%s7586_s2] sm:$0xff]  ;;  %s5669_s13 = smov 96   ;;  %s5670_s14 = smov 80   ;;  %vm1569_vm6 = vcmask 261120  }
   0x7   :  { %s5671_s15 = smov 32   ;;  %s5672_s16 = smov 16  }
   0x8   :  { %v64_v20 = vrot.slane %v5775_v19, %v5770_v18  ;;  %v68_v30 = vrot.slane %v37_v28, %v5770_v18 }
   0x9   :  { %147 = vmatpush1.bf16.msra.mxu0 %v5230_v6 }
   0xa   :  { %148 = vmatprep.subr.bf16.mxu0 %v5231_v7 }
   0xd   :  { %149 = vmatpush1.bf16.msra.mxu0 %v5233_v8 }
   0xe   :  { %150 = vmatprep.subr.bf16.mxu0 %v5234_v9 }
  0x11   :  { %151 = vmatpush1.bf16.msra.mxu0 %v5236_v10 }
  0x12   :  { %152 = vmatprep.subr.bf16.mxu0 %v5237_v11 }
  0x15   :  { %153 = vmatpush1.bf16.msra.mxu0 %v5239_v12  ;;  %v5814_v12 = vsub.s32 1, %v5767_v17 }
  0x16   :  { %154 = vmatprep.subr.bf16.mxu0 %v5240_v13  ;;  %v5817_v13 = vsub.s32 2, %v5767_v17 }
  0x19   :  { %155 = vmatpush1.bf16.msra.mxu0 %v5242_v14  ;;  %v274_v14 = vrot.slane %v5775_v19, %v5814_v12 }
  0x1c   :  { %4383 = vmatmul.mubr.msk.bf16.vlgmr.msra.gmra.mxu0 %vm129_vm1, %v5243_v15 }
  0xdc   :  { %v174_v21 = vpop.f32.mrf.mxu0 }
  0xdd   :  { %v175_v22 = vadd.f32 %v174_v21, %v64_v20 }
  0xde   :  { %v176_v23 = vpop.f32.mrf.mxu0 }
  0xdf   :  { %185 = vrot.lane.b32.xlu0 %v175_v22, %s5664_s0  ;;  %v192_v24 = vsel %vm191_vm2, %v175_v22, 0.0  ;;  %v177_v33 = vadd.f32 %v176_v23, %v68_v30 }
  0xe0   :  { %v178_v25 = vpop.f32.mrf.mxu0  ;;  %193 = vadd.xlane.f32.xlu1 %v192_v24 }
  0xe1   :  { %v179_v26 = vadd.f32 %v178_v25, %v64_v20  ;;  %v204_v37 = vsel %vm191_vm2, %v177_v33, 0.0  ;;  %v284_v20 = vrot.slane %v5775_v19, %v5817_v13 }
  0xe2   :  { %v180_v35 = vpop.f32.mrf.mxu0 }
  0xe3   :  { %187 = vrot.lane.b32.xlu0 %v179_v26, %s5664_s0  ;;  %v195_v27 = vsel %vm191_vm2, %v179_v26, 0.0  ;;  %v181_v36 = vadd.f32 %v180_v35, %v68_v30 }
  0xe4   :  { %196 = vadd.xlane.f32.xlu1 %v195_v27 }
  0xe5   :  { %v207_v38 = vsel %vm191_vm2, %v181_v36, 0.0 }
 0x151   :  { %v186_v29 = vpop.permute.xlu0 %185 }
 0x152   :  { %v198_v31 = vsel %vm191_vm2, %v186_v29, 0.0 }
 0x153   :  { %199 = vadd.xlane.f32.xlu0 %v198_v31 }
 0x155   :  { %v188_v32 = vpop.permute.xlu0 %187 }
 0x156   :  { %v201_v34 = vsel %vm191_vm2, %v188_v32, 0.0 }
 0x157   :  { %202 = vadd.xlane.f32.xlu1 %v201_v34 }
 0x15b   :  { %205 = vadd.xlane.f32.xlu1 %v204_v37 }
 0x15f   :  { %208 = vadd.xlane.f32.xlu1 %v207_v38 }
 0x169   :  { %v194_v39 = vpop.xlane.xlu1 %193 }
 0x16a   :  { %v211_v40 = vmul.f32 0.015625, %v194_v39 }
 0x16c   :  { %v217_v41 = vsub.f32 %v175_v22, %v211_v40 }
 0x16d   :  { %v197_v42 = vpop.xlane.xlu1 %196 }
 0x16e   :  { %v212_v43 = vmul.f32 0.015625, %v197_v42  ;;  %v223_v44 = vmul.f32 %v217_v41, %v217_v41 }
 0x170   :  { %v218_v45 = vsub.f32 %v179_v26, %v212_v43  ;;  %v229_v46 = vsel %vm191_vm2, %v223_v44, 0.0 }
 0x171   :  { %230 = vadd.xlane.f32.xlu1 %v229_v46 }
 0x172   :  { %v224_v47 = vmul.f32 %v218_v45, %v218_v45 }
 0x174   :  { %v232_v48 = vsel %vm191_vm2, %v224_v47, 0.0 }
 0x175   :  { %233 = vadd.xlane.f32.xlu1 %v232_v48 }
 0x1dc   :  { %v200_v49 = vpop.xlane.xlu0 %199 }
 0x1dd   :  { %v213_v50 = vmul.f32 0.015625, %v200_v49 }
 0x1df   :  { %v5793_v51 = vsub.f32 %v186_v29, %v213_v50 }
 0x1e0   :  { %v203_v52 = vpop.xlane.xlu1 %202 }
 0x1e1   :  { %v214_v53 = vmul.f32 0.015625, %v203_v52  ;;  %v225_v54 = vmul.f32 %v5793_v51, %v5793_v51 }
 0x1e3   :  { %v5797_v55 = vsub.f32 %v188_v32, %v214_v53  ;;  %v235_v56 = vsel %vm191_vm2, %v225_v54, 0.0 }
 0x1e4   :  { %236 = vadd.xlane.f32.xlu1 %v235_v56  ;;  %v206_v57 = vpop.xlane.xlu1 %205 }
 0x1e5   :  { %v215_v58 = vmul.f32 0.015625, %v206_v57  ;;  %v226_v59 = vmul.f32 %v5797_v55, %v5797_v55 }
 0x1e7   :  { %v5802_v60 = vsub.f32 %v177_v33, %v215_v58  ;;  %v238_v61 = vsel %vm191_vm2, %v226_v59, 0.0 }
 0x1e8   :  { %239 = vadd.xlane.f32.xlu1 %v238_v61  ;;  %v209_v62 = vpop.xlane.xlu1 %208 }
 0x1e9   :  { %v216_v63 = vmul.f32 0.015625, %v209_v62  ;;  %v227_v0 = vmul.f32 %v5802_v60, %v5802_v60 }
 0x1eb   :  { %v5807_v2 = vsub.f32 %v181_v36, %v216_v63  ;;  %v241_v3 = vsel %vm191_vm2, %v227_v0, 0.0 }
 0x1ec   :  { %242 = vadd.xlane.f32.xlu1 %v241_v3 }
 0x1ed   :  { %v228_v4 = vmul.f32 %v5807_v2, %v5807_v2 }
 0x1ef   :  { %v244_v5 = vsel %vm191_vm2, %v228_v4, 0.0 }
 0x1f0   :  { %245 = vadd.xlane.f32.xlu0 %v244_v5 }
 0x1fa   :  { %v231_v6 = vpop.xlane.xlu1 %230 }
 0x1fb   :  { %v247_v7 = vmul.f32 0.015625, %v231_v6 }
 0x1fd   :  { %v253_v8 = vadd.f32 1e-05, %v247_v7 }
 0x1fe   :  { %v234_v9 = vpop.xlane.xlu1 %233 }
 0x1ff   :  { %5340 = vrsqrt.f32 %v253_v8  ;;  %v248_v10 = vmul.f32 0.015625, %v234_v9  ;;  %v5244_v8 = vld [vmem:[%s7587_s5 + $0x34] ss:$8 sps:$4 sm:$0xff]   ;;  %v5246_v9 = vld [vmem:[%s7587_s5 + $0x30] ss:$8 sps:$4 sm:$0xff]  }
 0x200   :  { %465 = vmatprep.subr.bf16.mxu1 %v5244_v8 }
 0x201   :  { %v254_v11 = vadd.f32 1e-05, %v248_v10  ;;  %v5247_v10 = vld [vmem:[%s7587_s5 + $0x24] ss:$8 sps:$4 sm:$0xff]   ;;  %466 = vmatpush1.bf16.msra.mxu1 %v5246_v9 }
 0x202   :  { %467 = vmatprep.subr.bf16.mxu1 %v5247_v10 }
 0x203   :  { %5342 = vrsqrt.f32 %v254_v11  ;;  %v5249_v11 = vld [vmem:[%s7587_s5 + $0x20] ss:$8 sps:$4 sm:$0xff]  }
 0x205   :  { %468 = vmatpush1.bf16.msra.mxu1 %v5249_v11 }
 0x20c   :  { %v5341_v15 = vpop.eup %5340 }
 0x20d   :  { %v265_v21 = vmul.f32 %v5341_v15, %v217_v41  ;;  %v5252_v15 = vld [vmem:[%s7587_s5 + $0x10] ss:$8 sps:$4 sm:$0xff]  }
 0x20f   :  { %v275_v22 = vmul.f32 %v274_v14, %v265_v21  ;;  %v5255_v21 = vld [vmem:[%s7587_s5] ss:$8 sps:$4 sm:$0xff]  }
 0x210   :  { %v5343_v23 = vpop.eup %5342 }
 0x211   :  { %v5823_v24 = vadd.f32 %v284_v20, %v275_v22  ;;  %v266_v25 = vmul.f32 %v5343_v23, %v218_v45 }
 0x213   :  { %v291_v26 = vsel %vm191_vm2, %v5823_v24, 0.0  ;;  %v276_v27 = vmul.f32 %v274_v14, %v266_v25 }
 0x214   :  { %292 = vadd.xlane.f32.xlu1 %v291_v26 }
 0x215   :  { %v5827_v28 = vadd.f32 %v284_v20, %v276_v27 }
 0x217   :  { %v294_v29 = vsel %vm191_vm2, %v5827_v28, 0.0 }
 0x218   :  { %295 = vadd.xlane.f32.xlu0 %v294_v29 }
 0x26d   :  { %v237_v30 = vpop.xlane.xlu1 %236 }
 0x26e   :  { %v249_v31 = vmul.f32 0.015625, %v237_v30 }
 0x270   :  { %v255_v19 = vadd.f32 1e-05, %v249_v31 }
 0x271   :  { %v240_v32 = vpop.xlane.xlu1 %239 }
 0x272   :  { %5344 = vrsqrt.f32 %v255_v19  ;;  %v250_v33 = vmul.f32 0.015625, %v240_v32 }
 0x274   :  { %v256_v34 = vadd.f32 1e-05, %v250_v33 }
 0x275   :  { %v243_v35 = vpop.xlane.xlu1 %242 }
 0x276   :  { %5346 = vrsqrt.f32 %v256_v34  ;;  %v251_v36 = vmul.f32 0.015625, %v243_v35 }
 0x278   :  { %v257_v37 = vadd.f32 1e-05, %v251_v36 }
 0x279   :  { %v246_v38 = vpop.xlane.xlu0 %245 }
 0x27a   :  { %5348 = vrsqrt.f32 %v257_v37  ;;  %v252_v39 = vmul.f32 0.015625, %v246_v38 }
 0x27c   :  { %v258_v40 = vadd.f32 1e-05, %v252_v39 }
 0x27e   :  { %5350 = vrsqrt.f32 %v258_v40 }
 0x27f   :  { %v5345_v41 = vpop.eup %5344 }
 0x280   :  { %v267_v42 = vmul.f32 %v5345_v41, %v5793_v51 }
 0x282   :  { %v277_v43 = vmul.f32 %v274_v14, %v267_v42 }
 0x283   :  { %v5347_v44 = vpop.eup %5346 }
 0x284   :  { %v5832_v45 = vadd.f32 %v284_v20, %v277_v43  ;;  %v268_v46 = vmul.f32 %v5347_v44, %v5797_v55 }
 0x286   :  { %v297_v47 = vsel %vm191_vm2, %v5832_v45, 0.0  ;;  %v278_v48 = vmul.f32 %v274_v14, %v268_v46 }
 0x287   :  { %v5349_v49 = vpop.eup %5348  ;;  %298 = vadd.xlane.f32.xlu1 %v297_v47 }
 0x288   :  { %v5837_v50 = vadd.f32 %v284_v20, %v278_v48  ;;  %v269_v52 = vmul.f32 %v5349_v49, %v5802_v60 }
 0x28a   :  { %v300_v53 = vsel %vm191_vm2, %v5837_v50, 0.0  ;;  %v279_v51 = vmul.f32 %v274_v14, %v269_v52  ;;  %v38_v52 = vld [vmem:[%s7588_s3] sm:$0xff] }
 0x28b   :  { %v5351_v54 = vpop.eup %5350  ;;  %301 = vadd.xlane.f32.xlu0 %v300_v53 }
 0x28c   :  { %v5842_v56 = vadd.f32 %v284_v20, %v279_v51  ;;  %v270_v55 = vmul.f32 %v5351_v54, %v5807_v2  ;;  %v372_v51 = vrot.slane %v38_v52, %v5770_v18 }
 0x28e   :  { %v303_v57 = vsel %vm191_vm2, %v5842_v56, 0.0  ;;  %v280_v58 = vmul.f32 %v274_v14, %v270_v55  ;;  %v5250_v14 = vld [vmem:[%s7587_s5 + $0x14] ss:$8 sps:$4 sm:$0xff]  }
 0x28f   :  { %304 = vadd.xlane.f32.xlu1 %v303_v57  ;;  %469 = vmatprep.subr.bf16.mxu1 %v5250_v14 }
 0x290   :  { %v5847_v59 = vadd.f32 %v284_v20, %v280_v58  ;;  %v5253_v20 = vld [vmem:[%s7587_s5 + $0x4] ss:$8 sps:$4 sm:$0xff]   ;;  %470 = vmatpush1.bf16.msra.mxu1 %v5252_v15 }
 0x291   :  { %471 = vmatprep.subr.bf16.mxu1 %v5253_v20 }
 0x292   :  { %v306_v60 = vsel %vm191_vm2, %v5847_v59, 0.0 }
 0x293   :  { %307 = vadd.xlane.f32.xlu0 %v306_v60  ;;  %v382_v60 = vrot.slane %v38_v52, %v5814_v12 }
 0x294   :  { %472 = vmatpush1.bf16.msra.mxu1 %v5255_v21 }
 0x29d   :  { %v293_v61 = vpop.xlane.xlu1 %292 }
 0x29e   :  { %v309_v62 = vmul.f32 0.015625, %v293_v61 }
 0x2a0   :  { %v5852_v63 = vsub.f32 %v5823_v24, %v309_v62 }
 0x2a1   :  { %v296_v0 = vpop.xlane.xlu0 %295 }
 0x2a2   :  { %v310_v3 = vmul.f32 0.015625, %v296_v0  ;;  %v321_v2 = vmul.f32 %v5852_v63, %v5852_v63 }
 0x2a4   :  { %v316_v4 = vsub.f32 %v5827_v28, %v310_v3  ;;  %v327_v5 = vsel %vm191_vm2, %v321_v2, 0.0 }
 0x2a5   :  { %328 = vadd.xlane.f32.xlu1 %v327_v5 }
 0x2a6   :  { %v322_v6 = vmul.f32 %v316_v4, %v316_v4 }
 0x2a8   :  { %v330_v7 = vsel %vm191_vm2, %v322_v6, 0.0 }
 0x2a9   :  { %331 = vadd.xlane.f32.xlu0 %v330_v7 }
 0x310   :  { %v299_v22 = vpop.xlane.xlu1 %298 }
 0x311   :  { %v311_v23 = vmul.f32 0.015625, %v299_v22 }
 0x313   :  { %v317_v25 = vsub.f32 %v5832_v45, %v311_v23 }
 0x314   :  { %v302_v26 = vpop.xlane.xlu0 %301 }
 0x315   :  { %v312_v27 = vmul.f32 0.015625, %v302_v26  ;;  %v323_v29 = vmul.f32 %v317_v25, %v317_v25 }
 0x317   :  { %v318_v30 = vsub.f32 %v5837_v50, %v312_v27  ;;  %v333_v31 = vsel %vm191_vm2, %v323_v29, 0.0 }
 0x318   :  { %334 = vadd.xlane.f32.xlu1 %v333_v31  ;;  %v305_v19 = vpop.xlane.xlu1 %304 }
 0x319   :  { %v313_v32 = vmul.f32 0.015625, %v305_v19  ;;  %v324_v33 = vmul.f32 %v318_v30, %v318_v30 }
 0x31b   :  { %v319_v34 = vsub.f32 %v5842_v56, %v313_v32  ;;  %v336_v35 = vsel %vm191_vm2, %v324_v33, 0.0 }
 0x31c   :  { %337 = vadd.xlane.f32.xlu0 %v336_v35  ;;  %v308_v36 = vpop.xlane.xlu0 %307 }
 0x31d   :  { %v314_v37 = vmul.f32 0.015625, %v308_v36  ;;  %v325_v38 = vmul.f32 %v319_v34, %v319_v34 }
 0x31f   :  { %v320_v39 = vsub.f32 %v5847_v59, %v314_v37  ;;  %v339_v40 = vsel %vm191_vm2, %v325_v38, 0.0 }
 0x320   :  { %340 = vadd.xlane.f32.xlu1 %v339_v40 }
 0x321   :  { %v326_v41 = vmul.f32 %v320_v39, %v320_v39 }
 0x323   :  { %v342_v42 = vsel %vm191_vm2, %v326_v41, 0.0 }
 0x324   :  { %343 = vadd.xlane.f32.xlu0 %v342_v42 }
 0x32e   :  { %v329_v43 = vpop.xlane.xlu1 %328 }
 0x32f   :  { %v345_v44 = vmul.f32 0.015625, %v329_v43 }
 0x331   :  { %v351_v46 = vadd.f32 1e-05, %v345_v44 }
 0x332   :  { %v332_v47 = vpop.xlane.xlu0 %331 }
 0x333   :  { %5352 = vrsqrt.f32 %v351_v46  ;;  %v346_v48 = vmul.f32 0.015625, %v332_v47  ;;  %v403_v47 = vrot.slane %v38_v52, %v5817_v13 }
 0x335   :  { %v352_v49 = vadd.f32 1e-05, %v346_v48 }
 0x337   :  { %5354 = vrsqrt.f32 %v352_v49 }
 0x340   :  { %v5353_v53 = vpop.eup %5352 }
 0x341   :  { %v363_v54 = vmul.f32 %v5353_v53, %v5852_v63 }
 0x343   :  { %v373_v58 = vmul.f32 %v372_v51, %v363_v54 }
 0x344   :  { %v5355_v55 = vpop.eup %5354 }
 0x345   :  { %v364_v57 = vmul.f32 %v5355_v55, %v316_v4  ;;  %v383_v62 = vadd.f32 %v382_v60, %v373_v58 }
 0x347   :  { %v374_v61 = vmul.f32 %v372_v51, %v364_v57  ;;  %v39_v57 = vld [vmem:[%s7588_s3 + $0x8] sm:$0xff] }
 0x349   :  { %v384_v0 = vadd.f32 %v382_v60, %v374_v61  ;;  %v407_v61 = vrot.slane %v39_v57, %v5817_v13  ;;  %v5985_v57 = vld [vmem:[%s7589_s1 + $0x20] sm:$0xff] }
 0x34b   :  { %v389_v3 = vpack.c.bf16 %v384_v0, %v383_v62 }
 0x34d   :  { %4392 = vmatmul.mubr.msk.bf16.vlgmr.msra.gmra.mxu1 %vm191_vm2, %v389_v3 }
 0x34e   :  { %499 = vmatprep.mubr.bf16.mxu1 %v5663_v1 }
 0x3a1   :  { %v335_v2 = vpop.xlane.xlu1 %334 }
 0x3a2   :  { %v347_v5 = vmul.f32 0.015625, %v335_v2 }
 0x3a4   :  { %v353_v6 = vadd.f32 1e-05, %v347_v5 }
 0x3a5   :  { %v338_v7 = vpop.xlane.xlu0 %337 }
 0x3a6   :  { %5356 = vrsqrt.f32 %v353_v6  ;;  %v348_v8 = vmul.f32 0.015625, %v338_v7 }
 0x3a8   :  { %v354_v63 = vadd.f32 1e-05, %v348_v8 }
 0x3a9   :  { %v341_v9 = vpop.xlane.xlu1 %340 }
 0x3aa   :  { %5358 = vrsqrt.f32 %v354_v63  ;;  %v349_v4 = vmul.f32 0.015625, %v341_v9 }
 0x3ac   :  { %v355_v10 = vadd.f32 1e-05, %v349_v4 }
 0x3ad   :  { %v344_v11 = vpop.xlane.xlu0 %343 }
 0x3ae   :  { %5360 = vrsqrt.f32 %v355_v10  ;;  %v350_v14 = vmul.f32 0.015625, %v344_v11 }
 0x3b0   :  { %v356_v15 = vadd.f32 1e-05, %v350_v14 }
 0x3b2   :  { %5362 = vrsqrt.f32 %v356_v15 }
 0x3b3   :  { %v5357_v20 = vpop.eup %5356 }
 0x3b4   :  { %v365_v21 = vmul.f32 %v5357_v20, %v317_v25 }
 0x3b6   :  { %v375_v26 = vmul.f32 %v372_v51, %v365_v21 }
 0x3b7   :  { %v5359_v22 = vpop.eup %5358 }
 0x3b8   :  { %v366_v23 = vmul.f32 %v5359_v22, %v318_v30  ;;  %v385_v31 = vadd.f32 %v382_v60, %v375_v26  ;;  %v5665_v30 = vmov 0.0  }
 0x3b9   :  { %4791 = vmatprep.subr.bf16.mxu0 %v5665_v30  ;;  %4773 = vmatprep.subr.bf16.mxu1 %v5665_v30 }
 0x3ba   :  { %v376_v27 = vmul.f32 %v372_v51, %v366_v23  ;;  %4797 = vmatprep.mubr.msk.bf16.mxu0 %vm5666_vm3, %v5665_v30 }
 0x3bb   :  { %v5361_v29 = vpop.eup %5360 }
 0x3bc   :  { %v386_v19 = vadd.f32 %v382_v60, %v376_v27  ;;  %v367_v32 = vmul.f32 %v5361_v29, %v319_v34 }
 0x3be   :  { %v390_v33 = vpack.c.bf16 %v386_v19, %v385_v31  ;;  %v377_v37 = vmul.f32 %v372_v51, %v367_v32  ;;  %v5958_v31 = vld [vmem:[%s7589_s1] sm:$0xff] }
 0x3bf   :  { %v5363_v35 = vpop.eup %5362 }
 0x3c0   :  { %4393 = vmatmul.mubr.msk.bf16.gmra.mxu1 %vm191_vm2, %v390_v33  ;;  %v368_v36 = vmul.f32 %v5363_v35, %v320_v39  ;;  %v387_v40 = vadd.f32 %v382_v60, %v377_v37 }
 0x3c1   :  { %509 = vmatprep.mubr.bf16.mxu1 %v5663_v1 }
 0x3c2   :  { %v378_v38 = vmul.f32 %v372_v51, %v368_v36  ;;  %v5964_v36 = vld [vmem:[%s7589_s1 + $0x8] sm:$0xff] }
 0x3c4   :  { %v388_v41 = vadd.f32 %v382_v60, %v378_v38 }
 0x3c6   :  { %v391_v25 = vpack.c.bf16 %v388_v41, %v387_v40 }
 0x3c8   :  { %4394 = vmatmul.mubr.msk.bf16.gmra.mxu1 %vm191_vm2, %v391_v25 }
 0x3c9   :  { %4779 = vmatprep.mubr.msk.bf16.mxu1 %vm5666_vm3, %v5665_v30 }
 0x40d   :  { %v491_v34 = vpop.f32.mrf.mxu1 }
 0x40e   :  { %v492_v7 = vadd.f32 %v491_v34, %v403_v47  ;;  %v5971_v34 = vld [vmem:[%s7589_s1 + $0x10] sm:$0xff] }
 0x40f   :  { %v493_v42 = vpop.f32.mrf.mxu1 }
 0x410   :  { %v494_v14 = vadd.f32 %v493_v42, %v407_v61 }
 0x411   :  { %v495_v43 = vpop.f32.mrf.mxu1 }
 0x412   :  { %v496_v3 = vadd.f32 %v495_v43, %v403_v47 }
 0x413   :  { %v497_v44 = vpop.f32.mrf.mxu1 }
 0x414   :  { %v5919_v9 = vpack.c.bf16 %v496_v3, %v492_v7  ;;  %v498_v10 = vadd.f32 %v497_v44, %v407_v61 }
 0x416   :  { %v5933_v15 = vpack.c.bf16 %v498_v10, %v494_v14 }
 0x480   :  { %v501_v46 = vpop.f32.mrf.mxu1 }
 0x481   :  { %v502_v49 = vadd.f32 %v501_v46, %v403_v47 }
 0x482   :  { %v503_v39 = vpop.f32.mrf.mxu1 }
 0x483   :  { %v504_v4 = vadd.f32 %v503_v39, %v407_v61 }
 0x484   :  { %v505_v48 = vpop.f32.mrf.mxu1 }
 0x485   :  { %v506_v53 = vadd.f32 %v505_v48, %v403_v47 }
 0x486   :  { %v507_v51 = vpop.f32.mrf.mxu1 }
 0x487   :  { %v5905_v54 = vpack.c.bf16 %v506_v53, %v502_v49  ;;  %v508_v8 = vadd.f32 %v507_v51, %v407_v61 }
 0x488   :  { %v511_v55 = vpop.f32.mrf.mxu1 }
 0x489   :  { %531 = vrot.lane.b32.xlu0 %v5905_v54, %s5664_s0  ;;  %v512_v62 = vadd.f32 %v511_v55, %v403_v47  ;;  %v5923_v11 = vpack.c.bf16 %v508_v8, %v504_v4 }
 0x48a   :  { %v513_v58 = vpop.f32.mrf.mxu1 }
 0x48b   :  { %v514_v2 = vadd.f32 %v513_v58, %v407_v61 }
 0x48c   :  { %v515_v60 = vpop.f32.mrf.mxu1 }
 0x48d   :  { %v516_v52 = vadd.f32 %v515_v60, %v403_v47  ;;  %v5978_v47 = vld [vmem:[%s7589_s1 + $0x18] sm:$0xff] }
 0x48e   :  { %v517_v0 = vpop.f32.mrf.mxu1 }
 0x48f   :  { %v5913_v5 = vpack.c.bf16 %v516_v52, %v512_v62  ;;  %v518_v6 = vadd.f32 %v517_v0, %v407_v61  ;;  %v5992_v0 = vld [vmem:[%s7589_s1 + $0x28] sm:$0xff] }
 0x491   :  { %v5915_v63 = vpack.c.bf16 %v518_v6, %v514_v2  ;;  %533 = vrot.lane.b32.xlu1 %v5913_v5, %s5664_s0 }
 0x493   :  { %4792 = vmatpush3.bf16.msra.mxu0 %v5915_v63 }
 0x494   :  { %4793 = vmatprep.subr.bf16.mxu0 %v5665_v30 }
 0x495   :  { %529 = vrot.lane.b32.xlu1 %v5919_v9, %s5664_s0 }
 0x497   :  { %4794 = vmatpush3.bf16.msra.mxu0 %v5923_v11 }
 0x498   :  { %4795 = vmatprep.subr.bf16.mxu0 %v5665_v30 }
 0x49b   :  { %4796 = vmatpush3.bf16.msra.mxu0 %v5933_v15 }
 0x49c   :  { %4809 = vmatprep.subr.bf16.mxu0 %v5665_v30 }
 0x4fb   :  { %v532_v22 = vpop.permute.xlu0 %531 }
 0x4fc   :  { %v549_v23 = vsel %vm535_vm4, %v532_v22, 0 }
 0x503   :  { %v534_v20 = vpop.permute.xlu1 %533 }
 0x504   :  { %v552_v21 = vsel %vm535_vm4, %v534_v20, 0 }
 0x505   :  { %4774 = vmatpush3.bf16.xpose.msra.mxu1 %v552_v21 }
 0x506   :  { %4775 = vmatprep.subr.bf16.mxu1 %v5665_v30 }
 0x507   :  { %v530_v26 = vpop.permute.xlu1 %529 }
 0x508   :  { %v546_v27 = vsel %vm535_vm4, %v530_v26, 0 }
 0x50d   :  { %4776 = vmatpush3.bf16.xpose.msra.mxu1 %v549_v23 }
 0x50e   :  { %4777 = vmatprep.subr.bf16.mxu1 %v5665_v30 }
 0x515   :  { %4778 = vmatpush3.bf16.xpose.msra.mxu1 %v546_v27 }
 0x516   :  { %4827 = vmatprep.subr.bf16.mxu1 %v5665_v30 }
 0x51c   :  { %4780 = vmatmul.mubr.msk.bf16.vlgmr.msra.gmra.mxu1 %vm535_vm4, %v5919_v9 }
 0x51d   :  { %4783 = vmatprep.mubr.msk.bf16.mxu1 %vm5666_vm3, %v5665_v30 }
 0x524   :  { %4784 = vmatmul.mubr.msk.bf16.gmra.mxu1 %vm535_vm4, %v5905_v54 }
 0x525   :  { %4787 = vmatprep.mubr.msk.bf16.mxu1 %vm5666_vm3, %v5665_v30 }
 0x52c   :  { %4788 = vmatmul.mubr.msk.bf16.gmra.mxu1 %vm535_vm4, %v5913_v5 }
 0x52d   :  { %4833 = vmatprep.mubr.msk.bf16.mxu1 %vm5666_vm3, %v5665_v30 }
 0x5dc   :  { %v588_v29 = vpop.f32.mrf.mxu1 }
 0x5dd   :  { %v611_v19 = vmul.f32 0.25, %v588_v29 }
 0x5de   :  { %v4781_v32 = vpop.f32.mrf.mxu1 }
 0x5df   :  { %v617_v33 = vadd.f32 %v611_v19, %v5958_v31 }
 0x5e0   :  { %v591_v35 = vpop.f32.mrf.mxu1 }
 0x5e1   :  { %v612_v37 = vmul.f32 0.25, %v591_v35  ;;  %v624_v38 = vsel %vm623_vm5, %v617_v33, -inf }
 0x5e2   :  { %625 = vmax.xlane.f32.xlu1 %v624_v38  ;;  %v4782_v40 = vpop.f32.mrf.mxu1 }
 0x5e3   :  { %v618_v41 = vadd.f32 %v612_v37, %v5964_v36 }
 0x5e4   :  { %v596_v25 = vpop.f32.mrf.mxu1 }
 0x5e5   :  { %v613_v42 = vmul.f32 0.25, %v596_v25  ;;  %v627_v43 = vsel %vm623_vm5, %v618_v41, -inf }
 0x5e6   :  { %628 = vmax.xlane.f32.xlu0 %v627_v43  ;;  %v4785_v44 = vpop.f32.mrf.mxu1 }
 0x5e7   :  { %v619_v46 = vadd.f32 %v613_v42, %v5971_v34 }
 0x5e8   :  { %v599_v39 = vpop.f32.mrf.mxu1 }
 0x5e9   :  { %v614_v48 = vmul.f32 0.25, %v599_v39  ;;  %v630_v49 = vsel %vm623_vm5, %v619_v46, -inf }
 0x5ea   :  { %631 = vmax.xlane.f32.xlu0 %v630_v49  ;;  %v4786_v53 = vpop.f32.mrf.mxu1 }
 0x5eb   :  { %v620_v51 = vadd.f32 %v614_v48, %v5978_v47 }
 0x5ec   :  { %v604_v55 = vpop.f32.mrf.mxu1 }
 0x5ed   :  { %v615_v58 = vmul.f32 0.25, %v604_v55  ;;  %v633_v60 = vsel %vm623_vm5, %v620_v51, -inf }
 0x5ee   :  { %634 = vmax.xlane.f32.xlu1 %v633_v60  ;;  %v4789_v61 = vpop.f32.mrf.mxu1 }
 0x5ef   :  { %v621_v62 = vadd.f32 %v615_v58, %v5985_v57 }
 0x5f0   :  { %v607_v52 = vpop.f32.mrf.mxu1 }
 0x5f1   :  { %v616_v3 = vmul.f32 0.25, %v607_v52  ;;  %v636_v2 = vsel %vm623_vm5, %v621_v62, -inf }
 0x5f2   :  { %637 = vmax.xlane.f32.xlu0 %v636_v2  ;;  %v4790_v6 = vpop.f32.mrf.mxu1 }
 0x5f3   :  { %v622_v7 = vadd.f32 %v616_v3, %v5992_v0 }
 0x5f5   :  { %v639_v8 = vsel %vm623_vm5, %v622_v7, -inf }
 0x5f6   :  { %640 = vmax.xlane.f32.xlu1 %v639_v8 }
 0x66b   :  { %v626_v4 = vpop.xlane.xlu1 %625 }
 0x66c   :  { %v642_v10 = vsub.f32 %v617_v33, %v626_v4 }
 0x66e   :  { %v648_v14 = vmul.f32 1.442695, %v642_v10 }
 0x66f   :  { %v629_v20 = vpop.xlane.xlu0 %628 }
 0x670   :  { %5364 = vpow2.f32 %v648_v14  ;;  %v643_v21 = vsub.f32 %v618_v41, %v629_v20 }
 0x672   :  { %v650_v22 = vmul.f32 1.442695, %v643_v21 }
 0x673   :  { %v632_v23 = vpop.xlane.xlu0 %631 }
 0x674   :  { %5366 = vpow2.f32 %v650_v22  ;;  %v644_v26 = vsub.f32 %v619_v46, %v632_v23 }
 0x676   :  { %v652_v27 = vmul.f32 1.442695, %v644_v26 }
 0x677   :  { %v635_v29 = vpop.xlane.xlu1 %634 }
 0x678   :  { %5368 = vpow2.f32 %v652_v27  ;;  %v645_v19 = vsub.f32 %v620_v51, %v635_v29 }
 0x67a   :  { %v654_v32 = vmul.f32 1.442695, %v645_v19 }
 0x67b   :  { %v638_v35 = vpop.xlane.xlu0 %637 }
 0x67c   :  { %5370 = vpow2.f32 %v654_v32  ;;  %v646_v37 = vsub.f32 %v621_v62, %v638_v35 }
 0x67d   :  { %v5365_v38 = vpop.eup %5364 }
 0x67e   :  { %v656_v40 = vmul.f32 1.442695, %v646_v37  ;;  %v660_v33 = vsel %vm623_vm5, %v5365_v38, 0.0 }
 0x67f   :  { %661 = vadd.xlane.f32.xlu0 %v660_v33  ;;  %v641_v49 = vpop.xlane.xlu1 %640 }
 0x680   :  { %5372 = vpow2.f32 %v656_v40  ;;  %v647_v53 = vsub.f32 %v622_v7, %v641_v49 }
 0x681   :  { %v5367_v25 = vpop.eup %5366 }
 0x682   :  { %v663_v41 = vsel %vm623_vm5, %v5367_v25, 0.0  ;;  %v658_v51 = vmul.f32 1.442695, %v647_v53 }
 0x683   :  { %664 = vadd.xlane.f32.xlu1 %v663_v41 }
 0x684   :  { %5374 = vpow2.f32 %v658_v51 }
 0x685   :  { %v5999_v42 = vpop.eup %5368 }
 0x686   :  { %v666_v43 = vsel %vm623_vm5, %v5999_v42, 0.0 }
 0x687   :  { %667 = vadd.xlane.f32.xlu0 %v666_v43 }
 0x689   :  { %v6003_v44 = vpop.eup %5370 }
 0x68a   :  { %v669_v46 = vsel %vm623_vm5, %v6003_v44, 0.0 }
 0x68b   :  { %670 = vadd.xlane.f32.xlu1 %v669_v46 }
 0x68d   :  { %v6007_v39 = vpop.eup %5372 }
 0x68e   :  { %v672_v48 = vsel %vm623_vm5, %v6007_v39, 0.0 }
 0x68f   :  { %673 = vadd.xlane.f32.xlu0 %v672_v48 }
 0x691   :  { %v6025_v55 = vpop.eup %5374 }
 0x692   :  { %v675_v58 = vsel %vm623_vm5, %v6025_v55, 0.0 }
 0x69c   :  { %767 = vrot.lane.b32.xlu1 %v5905_v54, %s5667_s11 }
 0x6a5   :  { %769 = vrot.lane.b32.xlu0 %v5913_v5, %s5667_s11 }
 0x6a9   :  { %759 = vrot.lane.b32.xlu0 %v5919_v9, %s5668_s12 }
 0x6ad   :  { %761 = vrot.lane.b32.xlu0 %v5905_v54, %s5668_s12 }
 0x6b1   :  { %763 = vrot.lane.b32.xlu0 %v5913_v5, %s5668_s12 }
 0x6b5   :  { %1005 = vrot.lane.b32.xlu0 %v5919_v9, %s5669_s13 }
 0x6b9   :  { %1007 = vrot.lane.b32.xlu0 %v5905_v54, %s5669_s13 }
 0x6bd   :  { %1009 = vrot.lane.b32.xlu0 %v5913_v5, %s5669_s13 }
 0x6c0   :  { %676 = vadd.xlane.f32.xlu1 %v675_v58 }
 0x6c1   :  { %1248 = vrot.lane.b32.xlu0 %v5919_v9, %s5670_s14 }
 0x6c5   :  { %1252 = vrot.lane.b32.xlu0 %v5913_v5, %s5670_s14 }
 0x6c9   :  { %934 = vrot.lane.b32.xlu0 %v5915_v63, %s5668_s12 }
 0x6cd   :  { %930 = vrot.lane.b32.xlu0 %v5933_v15, %s5668_s12 }
 0x6d1   :  { %765 = vrot.lane.b32.xlu1 %v5919_v9, %s5667_s11 }
 0x6d5   :  { %1015 = vrot.lane.b32.xlu1 %v5913_v5, %s5671_s15 }
 0x6d9   :  { %1013 = vrot.lane.b32.xlu1 %v5905_v54, %s5671_s15 }
 0x6dd   :  { %1011 = vrot.lane.b32.xlu1 %v5919_v9, %s5671_s15 }
 0x6e1   :  { %1258 = vrot.lane.b32.xlu1 %v5913_v5, %s5672_s16 }
 0x6e5   :  { %1256 = vrot.lane.b32.xlu1 %v5905_v54, %s5672_s16 }
 0x6e9   :  { %1254 = vrot.lane.b32.xlu1 %v5919_v9, %s5672_s16 }
 0x6ed   :  { %1250 = vrot.lane.b32.xlu1 %v5905_v54, %s5670_s14 }
 0x6f1   :  { %932 = vrot.lane.b32.xlu1 %v5923_v11, %s5668_s12 }
 0x708   :  { %v662_v60 = vpop.xlane.xlu0 %661 }
 0x709   :  { %5376 = vrcp.f32 %v662_v60 }
 0x70c   :  { %v665_v61 = vpop.xlane.xlu1 %664 }
 0x70d   :  { %5378 = vrcp.f32 %v665_v61 }
 0x710   :  { %v668_v62 = vpop.xlane.xlu0 %667 }
 0x711   :  { %5380 = vrcp.f32 %v668_v62 }
 0x714   :  { %v671_v52 = vpop.xlane.xlu1 %670 }
 0x715   :  { %5382 = vrcp.f32 %v671_v52 }
 0x716   :  { %v5377_v5 = vpop.eup %5376 }
 0x717   :  { %v684_v6 = vmul.f32 %v5377_v5, %v5365_v38 }
 0x718   :  { %v674_v3 = vpop.xlane.xlu0 %673  ;;  %v768_v22 = vpop.permute.xlu1 %767 }
 0x719   :  { %v784_v27 = vsel %vm535_vm4, %v768_v22, 0  ;;  %5384 = vrcp.f32 %v674_v3 }
 0x71a   :  { %v5379_v2 = vpop.eup %5378 }
 0x71b   :  { %v685_v7 = vmul.f32 %v5379_v2, %v5367_v25 }
 0x71c   :  { %v770_v9 = vpop.permute.xlu0 %769 }
 0x71d   :  { %v787_v8 = vsel %vm535_vm4, %v770_v9, 0  ;;  %v690_v54 = vpack.c.bf16 %v685_v7, %v684_v6 }
 0x71e   :  { %v5381_v4 = vpop.eup %5380 }
 0x71f   :  { %4798 = vmatmul.mubr.msk.bf16.vlgmr.msra.gmra.mxu0 %vm623_vm5, %v690_v54  ;;  %v686_v20 = vmul.f32 %v5381_v4, %v5999_v42 }
 0x720   :  { %4810 = vmatpush3.bf16.xpose.msra.mxu0 %v787_v8  ;;  %v760_v10 = vpop.permute.xlu0 %759  ;;  %4801 = vmatprep.mubr.msk.bf16.mxu0 %vm5666_vm3, %v5665_v30 }
 0x721   :  { %4811 = vmatprep.subr.bf16.mxu0 %v5665_v30 }
 0x722   :  { %v5383_v14 = vpop.eup %5382 }
 0x723   :  { %v687_v21 = vmul.f32 %v5383_v14, %v6003_v44 }
 0x724   :  { %v762_v23 = vpop.permute.xlu0 %761 }
 0x725   :  { %v691_v26 = vpack.c.bf16 %v687_v21, %v686_v20 }
 0x726   :  { %v5385_v43 = vpop.eup %5384 }
 0x727   :  { %4802 = vmatmul.mubr.msk.bf16.gmra.mxu0 %vm623_vm5, %v691_v26  ;;  %v688_v48 = vmul.f32 %v5385_v43, %v6007_v39 }
 0x728   :  { %4812 = vmatpush3.bf16.xpose.msra.mxu0 %v784_v27  ;;  %v764_v29 = vpop.permute.xlu0 %763  ;;  %4805 = vmatprep.mubr.msk.bf16.mxu0 %vm5666_vm3, %v5665_v30 }
 0x729   :  { %4813 = vmatprep.subr.bf16.mxu0 %v5665_v30 }
 0x72c   :  { %v1006_v19 = vpop.permute.xlu0 %1005 }
 0x730   :  { %v1008_v32 = vpop.permute.xlu0 %1007 }
 0x734   :  { %v1010_v35 = vpop.permute.xlu0 %1009 }
 0x738   :  { %v1249_v37 = vpop.permute.xlu0 %1248 }
 0x73c   :  { %v6069_v38 = vpop.permute.xlu0 %1252 }
 0x740   :  { %v935_v40 = vpop.permute.xlu0 %934 }
 0x741   :  { %4828 = vmatpush3.bf16.msra.mxu1 %v935_v40 }
 0x742   :  { %4829 = vmatprep.subr.bf16.mxu1 %v5665_v30 }
 0x744   :  { %v931_v5 = vpop.permute.xlu0 %930 }
 0x749   :  { %v677_v33 = vpop.xlane.xlu1 %676 }
 0x74a   :  { %5386 = vrcp.f32 %v677_v33 }
 0x74d   :  { %v766_v25 = vpop.permute.xlu1 %765 }
 0x74e   :  { %v781_v41 = vsel %vm535_vm4, %v766_v25, 0 }
 0x74f   :  { %4814 = vmatpush3.bf16.xpose.msra.mxu0 %v781_v41 }
 0x750   :  { %4845 = vmatprep.subr.bf16.mxu0 %v5665_v30 }
 0x751   :  { %v1016_v42 = vpop.permute.xlu1 %1015 }
 0x752   :  { %v1033_v61 = vsel %vm535_vm4, %v1016_v42, 0 }
 0x755   :  { %v1014_v44 = vpop.permute.xlu1 %1013 }
 0x757   :  { %v5387_v46 = vpop.eup %5386 }
 0x758   :  { %v689_v49 = vmul.f32 %v5387_v46, %v6025_v55  ;;  %v1030_v55 = vsel %vm535_vm4, %v1014_v44, 0 }
 0x759   :  { %v1012_v53 = vpop.permute.xlu1 %1011 }
 0x75a   :  { %v692_v51 = vpack.c.bf16 %v689_v49, %v688_v48  ;;  %v1027_v3 = vsel %vm535_vm4, %v1012_v53, 0 }
 0x75c   :  { %4806 = vmatmul.mubr.msk.bf16.gmra.mxu0 %vm623_vm5, %v692_v51 }
 0x75d   :  { %v1259_v58 = vpop.permute.xlu1 %1258  ;;  %4815 = vmatprep.mubr.msk.bf16.mxu0 %vm5666_vm3, %v5665_v30 }
 0x75e   :  { %v1276_v2 = vsel %vm535_vm4, %v1259_v58, 0 }
 0x761   :  { %v1257_v60 = vpop.permute.xlu1 %1256 }
 0x762   :  { %v1273_v6 = vsel %vm535_vm4, %v1257_v60, 0 }
 0x764   :  { %4816 = vmatmul.mubr.msk.bf16.vlgmr.msra.gmra.mxu0 %vm535_vm4, %v760_v10 }
 0x765   :  { %4846 = vmatpush3.bf16.xpose.msra.mxu0 %v1033_v61  ;;  %v1255_v62 = vpop.permute.xlu1 %1254  ;;  %4819 = vmatprep.mubr.msk.bf16.mxu0 %vm5666_vm3, %v5665_v30 }
 0x766   :  { %4847 = vmatprep.subr.bf16.mxu0 %v5665_v30  ;;  %v1270_v7 = vsel %vm535_vm4, %v1255_v62, 0 }
 0x769   :  { %v1251_v39 = vpop.permute.xlu1 %1250 }
 0x76c   :  { %4820 = vmatmul.mubr.msk.bf16.gmra.mxu0 %vm535_vm4, %v762_v23 }
 0x76d   :  { %4848 = vmatpush3.bf16.xpose.msra.mxu0 %v1030_v55  ;;  %v933_v52 = vpop.permute.xlu1 %932  ;;  %4823 = vmatprep.mubr.msk.bf16.mxu0 %vm5666_vm3, %v5665_v30 }
 0x76e   :  { %4830 = vmatpush3.bf16.msra.mxu1 %v933_v52  ;;  %4849 = vmatprep.subr.bf16.mxu0 %v5665_v30 }
 0x76f   :  { %4831 = vmatprep.subr.bf16.mxu1 %v5665_v30 }
 0x772   :  { %4832 = vmatpush3.bf16.msra.mxu1 %v931_v5 }
 0x773   :  { %4863 = vmatprep.subr.bf16.mxu1 %v5665_v30 }
 0x774   :  { %4824 = vmatmul.mubr.msk.bf16.gmra.mxu0 %vm535_vm4, %v764_v29 }
 0x775   :  { %4850 = vmatpush3.bf16.xpose.msra.mxu0 %v1027_v3  ;;  %4851 = vmatprep.mubr.msk.bf16.mxu0 %vm5666_vm3, %v5665_v30 }
 0x776   :  { %4881 = vmatprep.subr.bf16.mxu0 %v5665_v30 }
 0x77c   :  { %4852 = vmatmul.mubr.msk.bf16.vlgmr.msra.gmra.mxu0 %vm535_vm4, %v1006_v19 }
 0x77d   :  { %4882 = vmatpush3.bf16.xpose.msra.mxu0 %v1276_v2  ;;  %4855 = vmatprep.mubr.msk.bf16.mxu0 %vm5666_vm3, %v5665_v30 }
 0x77e   :  { %4883 = vmatprep.subr.bf16.mxu0 %v5665_v30 }
 0x784   :  { %4856 = vmatmul.mubr.msk.bf16.gmra.mxu0 %vm535_vm4, %v1008_v32 }
 0x785   :  { %4884 = vmatpush3.bf16.xpose.msra.mxu0 %v1273_v6  ;;  %4859 = vmatprep.mubr.msk.bf16.mxu0 %vm5666_vm3, %v5665_v30 }
 0x786   :  { %4885 = vmatprep.subr.bf16.mxu0 %v5665_v30 }
 0x78c   :  { %4860 = vmatmul.mubr.msk.bf16.gmra.mxu0 %vm535_vm4, %v1010_v35 }
 0x78d   :  { %4886 = vmatpush3.bf16.xpose.msra.mxu0 %v1270_v7  ;;  %4887 = vmatprep.mubr.msk.bf16.mxu0 %vm5666_vm3, %v5665_v30 }
 0x78e   :  { %4917 = vmatprep.subr.bf16.mxu0 %v5665_v30 }
 0x794   :  { %4888 = vmatmul.mubr.msk.bf16.vlgmr.msra.gmra.mxu0 %vm535_vm4, %v1249_v37 }
 0x795   :  { %4891 = vmatprep.mubr.msk.bf16.mxu0 %vm5666_vm3, %v5665_v30 }
 0x79c   :  { %4892 = vmatmul.mubr.msk.bf16.gmra.mxu0 %vm535_vm4, %v1251_v39 }
 0x79d   :  { %4895 = vmatprep.mubr.msk.bf16.mxu0 %vm5666_vm3, %v5665_v30 }
 0x7a4   :  { %4896 = vmatmul.mubr.msk.bf16.gmra.mxu0 %vm535_vm4, %v6069_v38 }
 0x7a5   :  { %4925 = vmatprep.mubr.msk.bf16.mxu0 %vm5666_vm3, %v5665_v30 }
 0x7df   :  { %v6121_v9 = vpop.f32.mrf.mxu0 }
 0x7e1   :  { %v4799_v8 = vpop.f32.mrf.mxu0 }
 0x7e3   :  { %v6123_v54 = vpop.f32.mrf.mxu0 }
 0x7e5   :  { %v4800_v4 = vpop.f32.mrf.mxu0 }
 0x7e7   :  { %v6125_v10 = vpop.f32.mrf.mxu0 }
 0x7e9   :  { %v4803_v14 = vpop.f32.mrf.mxu0 }
 0x7eb   :  { %v6127_v20 = vpop.f32.mrf.mxu0 }
 0x7ed   :  { %v4804_v21 = vpop.f32.mrf.mxu0 }
 0x81c   :  { %v6129_v22 = vpop.f32.mrf.mxu0 }
 0x81e   :  { %v4807_v23 = vpop.f32.mrf.mxu0 }
 0x820   :  { %v6131_v26 = vpop.f32.mrf.mxu0 }
 0x822   :  { %v4808_v27 = vpop.f32.mrf.mxu0 }
 0x824   :  { %v823_v29 = vpop.f32.mrf.mxu0 }
 0x825   :  { %v846_v19 = vmul.f32 0.25, %v823_v29 }
 0x826   :  { %v4817_v32 = vpop.f32.mrf.mxu0 }
 0x827   :  { %v6134_v35 = vadd.f32 %v846_v19, %v5958_v31 }
 0x828   :  { %v826_v37 = vpop.f32.mrf.mxu0 }
 0x829   :  { %v847_v38 = vmul.f32 0.25, %v826_v37  ;;  %v858_v40 = vsel %vm623_vm5, %v6134_v35, -inf }
 0x82a   :  { %859 = vmax.xlane.f32.xlu1 %v858_v40  ;;  %v4818_v33 = vpop.f32.mrf.mxu0 }
 0x82b   :  { %v6139_v25 = vadd.f32 %v847_v38, %v5964_v36 }
 0x82c   :  { %v831_v41 = vpop.f32.mrf.mxu0 }
 0x82d   :  { %v848_v42 = vmul.f32 0.25, %v831_v41  ;;  %v861_v43 = vsel %vm623_vm5, %v6139_v25, -inf }
 0x82e   :  { %862 = vmax.xlane.f32.xlu0 %v861_v43  ;;  %v4821_v44 = vpop.f32.mrf.mxu0 }
 0x82f   :  { %v6144_v46 = vadd.f32 %v848_v42, %v5971_v34 }
 0x830   :  { %v834_v48 = vpop.f32.mrf.mxu0 }
 0x831   :  { %v849_v49 = vmul.f32 0.25, %v834_v48  ;;  %v864_v53 = vsel %vm623_vm5, %v6144_v46, -inf }
 0x832   :  { %865 = vmax.xlane.f32.xlu0 %v864_v53  ;;  %v4822_v51 = vpop.f32.mrf.mxu0 }
 0x833   :  { %v6149_v58 = vadd.f32 %v849_v49, %v5978_v47 }
 0x834   :  { %v839_v60 = vpop.f32.mrf.mxu0 }
 0x835   :  { %v850_v61 = vmul.f32 0.25, %v839_v60  ;;  %v867_v62 = vsel %vm623_vm5, %v6149_v58, -inf }
 0x836   :  { %868 = vmax.xlane.f32.xlu1 %v867_v62  ;;  %v4825_v39 = vpop.f32.mrf.mxu0 }
 0x837   :  { %v6154_v55 = vadd.f32 %v850_v61, %v5985_v57 }
 0x838   :  { %v842_v52 = vpop.f32.mrf.mxu0 }
 0x839   :  { %v851_v5 = vmul.f32 0.25, %v842_v52  ;;  %v870_v3 = vsel %vm623_vm5, %v6154_v55, -inf }
 0x83a   :  { %871 = vmax.xlane.f32.xlu0 %v870_v3  ;;  %v4826_v2 = vpop.f32.mrf.mxu0 }
 0x83b   :  { %v6159_v6 = vadd.f32 %v851_v5, %v5992_v0 }
 0x83c   :  { %v1069_v7 = vpop.f32.mrf.mxu0 }
 0x83d   :  { %v1092_v8 = vmul.f32 0.25, %v1069_v7  ;;  %v873_v4 = vsel %vm623_vm5, %v6159_v6, -inf }
 0x83e   :  { %874 = vmax.xlane.f32.xlu1 %v873_v4  ;;  %v4853_v14 = vpop.f32.mrf.mxu0 }
 0x83f   :  { %v6164_v21 = vadd.f32 %v1092_v8, %v5958_v31 }
 0x840   :  { %v1072_v23 = vpop.f32.mrf.mxu0 }
 0x841   :  { %v1093_v27 = vmul.f32 0.25, %v1072_v23  ;;  %v1104_v29 = vsel %vm623_vm5, %v6164_v21, -inf }
 0x842   :  { %1105 = vmax.xlane.f32.xlu0 %v1104_v29  ;;  %v4854_v19 = vpop.f32.mrf.mxu0 }
 0x843   :  { %v6169_v32 = vadd.f32 %v1093_v27, %v5964_v36 }
 0x844   :  { %v1077_v37 = vpop.f32.mrf.mxu0 }
 0x845   :  { %v1094_v38 = vmul.f32 0.25, %v1077_v37  ;;  %v1107_v40 = vsel %vm623_vm5, %v6169_v32, -inf }
 0x846   :  { %1108 = vmax.xlane.f32.xlu1 %v1107_v40  ;;  %v4857_v33 = vpop.f32.mrf.mxu0 }
 0x847   :  { %v6174_v41 = vadd.f32 %v1094_v38, %v5971_v34 }
 0x848   :  { %v1080_v42 = vpop.f32.mrf.mxu0 }
 0x849   :  { %v1095_v43 = vmul.f32 0.25, %v1080_v42  ;;  %v1110_v44 = vsel %vm623_vm5, %v6174_v41, -inf }
 0x84a   :  { %1111 = vmax.xlane.f32.xlu0 %v1110_v44  ;;  %v4858_v48 = vpop.f32.mrf.mxu0 }
 0x84b   :  { %v6179_v49 = vadd.f32 %v1095_v43, %v5978_v47 }
 0x84c   :  { %v1085_v53 = vpop.f32.mrf.mxu0 }
 0x84d   :  { %v1096_v51 = vmul.f32 0.25, %v1085_v53  ;;  %v1113_v60 = vsel %vm623_vm5, %v6179_v49, -inf }
 0x84e   :  { %1114 = vmax.xlane.f32.xlu1 %v1113_v60  ;;  %v4861_v61 = vpop.f32.mrf.mxu0 }
 0x84f   :  { %v6184_v62 = vadd.f32 %v1096_v51, %v5985_v57 }
 0x850   :  { %v1088_v39 = vpop.f32.mrf.mxu0 }
 0x851   :  { %v1097_v52 = vmul.f32 0.25, %v1088_v39  ;;  %v1116_v5 = vsel %vm623_vm5, %v6184_v62, -inf }
 0x852   :  { %1117 = vmax.xlane.f32.xlu0 %v1116_v5  ;;  %v4862_v3 = vpop.f32.mrf.mxu0 }
 0x853   :  { %v6189_v2 = vadd.f32 %v1097_v52, %v5992_v0 }
 0x854   :  { %v1312_v7 = vpop.f32.mrf.mxu0 }
 0x855   :  { %v1335_v8 = vmul.f32 0.25, %v1312_v7  ;;  %v1119_v4 = vsel %vm623_vm5, %v6189_v2, -inf }
 0x856   :  { %1120 = vmax.xlane.f32.xlu1 %v1119_v4  ;;  %v4889_v14 = vpop.f32.mrf.mxu0 }
 0x857   :  { %v6194_v23 = vadd.f32 %v1335_v8, %v5958_v31 }
 0x858   :  { %v1315_v27 = vpop.f32.mrf.mxu0 }
 0x859   :  { %v1336_v29 = vmul.f32 0.25, %v1315_v27  ;;  %v1347_v19 = vsel %vm623_vm5, %v6194_v23, -inf }
 0x85a   :  { %1348 = vmax.xlane.f32.xlu0 %v1347_v19  ;;  %v4890_v37 = vpop.f32.mrf.mxu0 }
 0x85b   :  { %v6199_v38 = vadd.f32 %v1336_v29, %v5964_v36 }
 0x85c   :  { %v1320_v40 = vpop.f32.mrf.mxu0 }
 0x85d   :  { %v1337_v33 = vmul.f32 0.25, %v1320_v40  ;;  %v1350_v42 = vsel %vm623_vm5, %v6199_v38, -inf }
 0x85e   :  { %1351 = vmax.xlane.f32.xlu1 %v1350_v42  ;;  %v4893_v43 = vpop.f32.mrf.mxu0 }
 0x85f   :  { %v6204_v31 = vadd.f32 %v1337_v33, %v5971_v34 }
 0x860   :  { %v1323_v44 = vpop.f32.mrf.mxu0 }
 0x861   :  { %v1338_v48 = vmul.f32 0.25, %v1323_v44  ;;  %v1353_v53 = vsel %vm623_vm5, %v6204_v31, -inf }
 0x862   :  { %1354 = vmax.xlane.f32.xlu0 %v1353_v53  ;;  %v4894_v51 = vpop.f32.mrf.mxu0 }
 0x863   :  { %v6209_v36 = vadd.f32 %v1338_v48, %v5978_v47 }
 0x864   :  { %v1328_v60 = vpop.f32.mrf.mxu0 }
 0x865   :  { %v1339_v61 = vmul.f32 0.25, %v1328_v60  ;;  %v1356_v39 = vsel %vm623_vm5, %v6209_v36, -inf }
 0x866   :  { %1357 = vmax.xlane.f32.xlu1 %v1356_v39  ;;  %v4897_v52 = vpop.f32.mrf.mxu0 }
 0x867   :  { %v6214_v34 = vadd.f32 %v1339_v61, %v5985_v57 }
 0x868   :  { %v1331_v5 = vpop.f32.mrf.mxu0 }
 0x869   :  { %v1340_v3 = vmul.f32 0.25, %v1331_v5  ;;  %v1359_v7 = vsel %vm623_vm5, %v6214_v34, -inf }
 0x86a   :  { %1360 = vmax.xlane.f32.xlu0 %v1359_v7  ;;  %v4898_v8 = vpop.f32.mrf.mxu0 }
 0x86b   :  { %v6219_v47 = vadd.f32 %v1340_v3, %v5992_v0 }
 0x86d   :  { %v1362_v4 = vsel %vm623_vm5, %v6219_v47, -inf }
 0x86e   :  { %1363 = vmax.xlane.f32.xlu1 %v1362_v4 }
 0x87f   :  { %1177 = vrot.lane.b32.xlu1 %v5915_v63, %s5669_s13 }
 0x880   :  { %1175 = vrot.lane.b32.xlu0 %v5923_v11, %s5669_s13 }
 0x8b3   :  { %v860_v57 = vpop.xlane.xlu1 %859 }
 0x8b4   :  { %v876_v14 = vsub.f32 %v6134_v35, %v860_v57 }
 0x8b6   :  { %v882_v27 = vmul.f32 1.442695, %v876_v14 }
 0x8b7   :  { %v863_v29 = vpop.xlane.xlu0 %862 }
 0x8b8   :  { %5388 = vpow2.f32 %v882_v27  ;;  %v877_v19 = vsub.f32 %v6139_v25, %v863_v29 }
 0x8ba   :  { %v884_v0 = vmul.f32 1.442695, %v877_v19 }
 0x8bb   :  { %v866_v37 = vpop.xlane.xlu0 %865 }
 0x8bc   :  { %5390 = vpow2.f32 %v884_v0  ;;  %v878_v40 = vsub.f32 %v6144_v46, %v866_v37 }
 0x8be   :  { %v886_v33 = vmul.f32 1.442695, %v878_v40 }
 0x8bf   :  { %v869_v42 = vpop.xlane.xlu1 %868 }
 0x8c0   :  { %5392 = vpow2.f32 %v886_v33  ;;  %v879_v43 = vsub.f32 %v6149_v58, %v869_v42 }
 0x8c2   :  { %v888_v44 = vmul.f32 1.442695, %v879_v43 }
 0x8c3   :  { %v872_v48 = vpop.xlane.xlu0 %871 }
 0x8c4   :  { %5394 = vpow2.f32 %v888_v44  ;;  %v880_v35 = vsub.f32 %v6154_v55, %v872_v48 }
 0x8c5   :  { %v6232_v53 = vpop.eup %5388 }
 0x8c6   :  { %v890_v51 = vmul.f32 1.442695, %v880_v35  ;;  %v894_v25 = vsel %vm623_vm5, %v6232_v53, 0.0 }
 0x8c7   :  { %895 = vadd.xlane.f32.xlu0 %v894_v25  ;;  %v875_v60 = vpop.xlane.xlu1 %874 }
 0x8c8   :  { %5396 = vpow2.f32 %v890_v51  ;;  %v881_v46 = vsub.f32 %v6159_v6, %v875_v60 }
 0x8c9   :  { %v6237_v61 = vpop.eup %5390 }
 0x8ca   :  { %v892_v39 = vmul.f32 1.442695, %v881_v46  ;;  %v897_v58 = vsel %vm623_vm5, %v6237_v61, 0.0 }
 0x8cb   :  { %v1106_v52 = vpop.xlane.xlu0 %1105  ;;  %898 = vadd.xlane.f32.xlu1 %v897_v58 }
 0x8cc   :  { %5398 = vpow2.f32 %v892_v39  ;;  %v1122_v55 = vsub.f32 %v6164_v21, %v1106_v52 }
 0x8cd   :  { %v6242_v5 = vpop.eup %5392 }
 0x8ce   :  { %v1128_v3 = vmul.f32 1.442695, %v1122_v55  ;;  %v900_v7 = vsel %vm623_vm5, %v6242_v5, 0.0 }
 0x8cf   :  { %901 = vadd.xlane.f32.xlu0 %v900_v7  ;;  %v1109_v8 = vpop.xlane.xlu1 %1108 }
 0x8d0   :  { %5400 = vpow2.f32 %v1128_v3  ;;  %v1123_v6 = vsub.f32 %v6169_v32, %v1109_v8 }
 0x8d1   :  { %v6247_v4 = vpop.eup %5394 }
 0x8d2   :  { %v1130_v57 = vmul.f32 1.442695, %v1123_v6  ;;  %v903_v14 = vsel %vm623_vm5, %v6247_v4, 0.0 }
 0x8d3   :  { %v1112_v27 = vpop.xlane.xlu0 %1111  ;;  %904 = vadd.xlane.f32.xlu1 %v903_v14 }
 0x8d4   :  { %5402 = vpow2.f32 %v1130_v57  ;;  %v1124_v21 = vsub.f32 %v6174_v41, %v1112_v27 }
 0x8d5   :  { %v6252_v29 = vpop.eup %5396 }
 0x8d6   :  { %v1132_v19 = vmul.f32 1.442695, %v1124_v21  ;;  %v906_v0 = vsel %vm623_vm5, %v6252_v29, 0.0 }
 0x8d7   :  { %907 = vadd.xlane.f32.xlu0 %v906_v0  ;;  %v1115_v37 = vpop.xlane.xlu1 %1114 }
 0x8d8   :  { %5404 = vpow2.f32 %v1132_v19  ;;  %v1125_v32 = vsub.f32 %v6179_v49, %v1115_v37 }
 0x8d9   :  { %v6257_v40 = vpop.eup %5398 }
 0x8da   :  { %v1134_v33 = vmul.f32 1.442695, %v1125_v32  ;;  %v909_v42 = vsel %vm623_vm5, %v6257_v40, 0.0 }
 0x8db   :  { %v1118_v43 = vpop.xlane.xlu0 %1117  ;;  %910 = vadd.xlane.f32.xlu1 %v909_v42 }
 0x8dc   :  { %5406 = vpow2.f32 %v1134_v33  ;;  %v1126_v41 = vsub.f32 %v6184_v62, %v1118_v43 }
 0x8dd   :  { %v6262_v44 = vpop.eup %5400 }
 0x8de   :  { %v1136_v48 = vmul.f32 1.442695, %v1126_v41  ;;  %v1140_v35 = vsel %vm623_vm5, %v6262_v44, 0.0 }
 0x8df   :  { %1141 = vadd.xlane.f32.xlu1 %v1140_v35  ;;  %v1121_v51 = vpop.xlane.xlu1 %1120 }
 0x8e0   :  { %5408 = vpow2.f32 %v1136_v48  ;;  %v1127_v49 = vsub.f32 %v6189_v2, %v1121_v51 }
 0x8e1   :  { %v6267_v25 = vpop.eup %5402 }
 0x8e2   :  { %v1138_v60 = vmul.f32 1.442695, %v1127_v49  ;;  %v1143_v46 = vsel %vm623_vm5, %v6267_v25, 0.0 }
 0x8e3   :  { %v1349_v39 = vpop.xlane.xlu0 %1348  ;;  %1144 = vadd.xlane.f32.xlu0 %v1143_v46 }
 0x8e4   :  { %5410 = vpow2.f32 %v1138_v60  ;;  %v1365_v62 = vsub.f32 %v6194_v23, %v1349_v39 }
 0x8e5   :  { %v6272_v58 = vpop.eup %5404 }
 0x8e6   :  { %v1371_v52 = vmul.f32 1.442695, %v1365_v62  ;;  %v1146_v55 = vsel %vm623_vm5, %v6272_v58, 0.0 }
 0x8e7   :  { %1147 = vadd.xlane.f32.xlu1 %v1146_v55  ;;  %v1352_v3 = vpop.xlane.xlu1 %1351 }
 0x8e8   :  { %5412 = vpow2.f32 %v1371_v52  ;;  %v1366_v2 = vsub.f32 %v6199_v38, %v1352_v3 }
 0x8e9   :  { %v6277_v7 = vpop.eup %5406 }
 0x8ea   :  { %v1373_v8 = vmul.f32 1.442695, %v1366_v2  ;;  %v1149_v6 = vsel %vm623_vm5, %v6277_v7, 0.0 }
 0x8eb   :  { %v1355_v57 = vpop.xlane.xlu0 %1354  ;;  %1150 = vadd.xlane.f32.xlu1 %v1149_v6 }
 0x8ec   :  { %5414 = vpow2.f32 %v1373_v8  ;;  %v1367_v23 = vsub.f32 %v6204_v31, %v1355_v57 }
 0x8ed   :  { %v6282_v14 = vpop.eup %5408 }
 0x8ee   :  { %v1375_v27 = vmul.f32 1.442695, %v1367_v23  ;;  %v1152_v21 = vsel %vm623_vm5, %v6282_v14, 0.0 }
 0x8ef   :  { %1153 = vadd.xlane.f32.xlu1 %v1152_v21  ;;  %v1358_v19 = vpop.xlane.xlu1 %1357 }
 0x8f0   :  { %5416 = vpow2.f32 %v1375_v27  ;;  %v1368_v38 = vsub.f32 %v6209_v36, %v1358_v19 }
 0x8f1   :  { %v6287_v0 = vpop.eup %5410 }
 0x8f2   :  { %v1377_v37 = vmul.f32 1.442695, %v1368_v38  ;;  %v1155_v32 = vsel %vm623_vm5, %v6287_v0, 0.0 }
 0x8f3   :  { %v1361_v33 = vpop.xlane.xlu0 %1360  ;;  %1156 = vadd.xlane.f32.xlu1 %v1155_v32 }
 0x8f4   :  { %5418 = vpow2.f32 %v1377_v37  ;;  %v1369_v31 = vsub.f32 %v6214_v34, %v1361_v33 }
 0x8f5   :  { %v6292_v42 = vpop.eup %5412 }
 0x8f6   :  { %v1379_v43 = vmul.f32 1.442695, %v1369_v31  ;;  %v1383_v41 = vsel %vm623_vm5, %v6292_v42, 0.0 }
 0x8f7   :  { %1384 = vadd.xlane.f32.xlu0 %v1383_v41  ;;  %v1364_v39 = vpop.xlane.xlu1 %1363  ;;  %v1176_v2 = vpop.permute.xlu0 %1175 }
 0x8f8   :  { %5420 = vpow2.f32 %v1379_v43  ;;  %v1370_v62 = vsub.f32 %v6219_v47, %v1364_v39 }
 0x8f9   :  { %v6296_v36 = vpop.eup %5414 }
 0x8fa   :  { %v1386_v48 = vsel %vm623_vm5, %v6296_v36, 0.0  ;;  %v1381_v52 = vmul.f32 1.442695, %v1370_v62 }
 0x8fb   :  { %1387 = vadd.xlane.f32.xlu1 %v1386_v48  ;;  %v1178_v8 = vpop.permute.xlu1 %1177 }
 0x8fc   :  { %5422 = vpow2.f32 %v1381_v52 }
 0x8fd   :  { %v6300_v35 = vpop.eup %5416 }
 0x8fe   :  { %v1389_v51 = vsel %vm623_vm5, %v6300_v35, 0.0 }
 0x8ff   :  { %1390 = vadd.xlane.f32.xlu1 %v1389_v51 }
 0x901   :  { %v6304_v34 = vpop.eup %5418 }
 0x902   :  { %v1392_v49 = vsel %vm623_vm5, %v6304_v34, 0.0 }
 0x903   :  { %1393 = vadd.xlane.f32.xlu1 %v1392_v49 }
 0x905   :  { %v6308_v60 = vpop.eup %5420 }
 0x906   :  { %v1395_v46 = vsel %vm623_vm5, %v6308_v60, 0.0 }
 0x907   :  { %1396 = vadd.xlane.f32.xlu1 %v1395_v46 }
 0x909   :  { %v6321_v55 = vpop.eup %5422 }
 0x90a   :  { %v1398_v3 = vsel %vm623_vm5, %v6321_v55, 0.0 }
 0x90d   :  { %1173 = vrot.lane.b32.xlu0 %v5933_v15, %s5669_s13 }
 0x918   :  { %1420 = vrot.lane.b32.xlu1 %v5915_v63, %s5670_s14 }
 0x91c   :  { %1418 = vrot.lane.b32.xlu1 %v5923_v11, %s5670_s14 }
 0x920   :  { %1416 = vrot.lane.b32.xlu1 %v5933_v15, %s5670_s14 }
 0x92c   :  { %1399 = vadd.xlane.f32.xlu0 %v1398_v3 }
 0x950   :  { %v896_v47 = vpop.xlane.xlu0 %895 }
 0x951   :  { %5424 = vrcp.f32 %v896_v47 }
 0x954   :  { %v899_v6 = vpop.xlane.xlu1 %898 }
 0x955   :  { %5426 = vrcp.f32 %v899_v6 }
 0x958   :  { %v902_v63 = vpop.xlane.xlu0 %901 }
 0x959   :  { %5428 = vrcp.f32 %v902_v63 }
 0x95c   :  { %v905_v57 = vpop.xlane.xlu1 %904 }
 0x95d   :  { %5430 = vrcp.f32 %v905_v57 }
 0x95e   :  { %v5425_v11 = vpop.eup %5424 }
 0x95f   :  { %v918_v15 = vmul.f32 %v5425_v11, %v6232_v53 }
 0x960   :  { %v908_v23 = vpop.xlane.xlu0 %907 }
 0x961   :  { %5432 = vrcp.f32 %v908_v23 }
 0x962   :  { %v5427_v27 = vpop.eup %5426 }
 0x963   :  { %v919_v21 = vmul.f32 %v5427_v27, %v6237_v61 }
 0x964   :  { %v911_v19 = vpop.xlane.xlu1 %910 }
 0x965   :  { %5434 = vrcp.f32 %v911_v19  ;;  %v924_v38 = vpack.c.bf16 %v919_v21, %v918_v15 }
 0x966   :  { %v5429_v37 = vpop.eup %5428 }
 0x967   :  { %4834 = vmatmul.mubr.msk.bf16.vlgmr.msra.gmra.mxu1 %vm623_vm5, %v924_v38  ;;  %v920_v33 = vmul.f32 %v5429_v37, %v6242_v5 }
 0x968   :  { %4864 = vmatpush3.bf16.msra.mxu1 %v1178_v8  ;;  %4837 = vmatprep.mubr.msk.bf16.mxu1 %vm5666_vm3, %v5665_v30  ;;  %v1142_v31 = vpop.xlane.xlu1 %1141 }
 0x969   :  { %4865 = vmatprep.subr.bf16.mxu1 %v5665_v30 }
 0x96a   :  { %v5431_v32 = vpop.eup %5430 }
 0x96b   :  { %v921_v53 = vmul.f32 %v5431_v32, %v6247_v4 }
 0x96c   :  { %4866 = vmatpush3.bf16.msra.mxu1 %v1176_v2  ;;  %v1145_v43 = vpop.xlane.xlu0 %1144 }
 0x96d   :  { %v925_v61 = vpack.c.bf16 %v921_v53, %v920_v33  ;;  %4867 = vmatprep.subr.bf16.mxu1 %v5665_v30  ;;  %5436 = vrcp.f32 %v1145_v43 }
 0x96e   :  { %v5433_v41 = vpop.eup %5432  ;;  %5438 = vrcp.f32 %v1142_v31 }
 0x96f   :  { %4838 = vmatmul.mubr.msk.bf16.gmra.mxu1 %vm623_vm5, %v925_v61  ;;  %v922_v49 = vmul.f32 %v5433_v41, %v6252_v29 }
 0x970   :  { %v1148_v48 = vpop.xlane.xlu1 %1147  ;;  %4841 = vmatprep.mubr.msk.bf16.mxu1 %vm5666_vm3, %v5665_v30 }
 0x972   :  { %v5435_v51 = vpop.eup %5434 }
 0x973   :  { %v923_v5 = vmul.f32 %v5435_v51, %v6257_v40 }
 0x974   :  { %v1151_v4 = vpop.xlane.xlu1 %1150 }
 0x975   :  { %v926_v46 = vpack.c.bf16 %v923_v5, %v922_v49  ;;  %5440 = vrcp.f32 %v1151_v4 }
 0x976   :  { %5442 = vrcp.f32 %v1148_v48 }
 0x977   :  { %4842 = vmatmul.mubr.msk.bf16.gmra.mxu1 %vm623_vm5, %v926_v46 }
 0x978   :  { %4869 = vmatprep.mubr.msk.bf16.mxu1 %vm5666_vm3, %v5665_v30  ;;  %v1154_v39 = vpop.xlane.xlu1 %1153 }
 0x97a   :  { %v5437_v62 = vpop.eup %5436 }
 0x97b   :  { %v5439_v2 = vpop.eup %5438  ;;  %v1165_v8 = vmul.f32 %v5437_v62, %v6267_v25 }
 0x97c   :  { %v1157_v52 = vpop.xlane.xlu1 %1156  ;;  %v1164_v29 = vmul.f32 %v5439_v2, %v6262_v44 }
 0x97d   :  { %5444 = vrcp.f32 %v1157_v52 }
 0x97e   :  { %5446 = vrcp.f32 %v1154_v39  ;;  %v1170_v6 = vpack.c.bf16 %v1165_v8, %v1164_v29 }
 0x980   :  { %v1385_v3 = vpop.xlane.xlu0 %1384 }
 0x982   :  { %v5441_v63 = vpop.eup %5440 }
 0x983   :  { %v5443_v11 = vpop.eup %5442  ;;  %v1167_v25 = vmul.f32 %v5441_v63, %v6277_v7 }
 0x984   :  { %v1174_v40 = vpop.permute.xlu0 %1173  ;;  %v1388_v47 = vpop.xlane.xlu1 %1387  ;;  %v1166_v23 = vmul.f32 %v5443_v11, %v6272_v58  ;;  %v5257_v11 = vld [vmem:[%s7590_s6 + $0x10] sm:$0xff]  }
 0x985   :  { %4868 = vmatpush3.bf16.msra.mxu1 %v1174_v40  ;;  %5448 = vrcp.f32 %v1388_v47 }
 0x986   :  { %4899 = vmatprep.subr.bf16.mxu1 %v5665_v30  ;;  %5450 = vrcp.f32 %v1385_v3  ;;  %v1171_v27 = vpack.c.bf16 %v1167_v25, %v1166_v23  ;;  %v5258_v23 = vld [vmem:[%s7590_s6 + $0x8] sm:$0xff]  }
 0x988   :  { %4870 = vmatmul.mubr.msk.bf16.vlgmr.msra.gmra.mxu1 %vm623_vm5, %v1170_v6  ;;  %v1391_v57 = vpop.xlane.xlu1 %1390 }
 0x989   :  { %4873 = vmatprep.mubr.msk.bf16.mxu1 %vm5666_vm3, %v5665_v30 }
 0x98a   :  { %v5445_v15 = vpop.eup %5444 }
 0x98b   :  { %v5447_v19 = vpop.eup %5446  ;;  %v1169_v38 = vmul.f32 %v5445_v15, %v6287_v0 }
 0x98c   :  { %v1394_v44 = vpop.xlane.xlu1 %1393  ;;  %v1168_v7 = vmul.f32 %v5447_v19, %v6282_v14 }
 0x98d   :  { %5452 = vrcp.f32 %v1394_v44 }
 0x98e   :  { %5454 = vrcp.f32 %v1391_v57  ;;  %v1172_v32 = vpack.c.bf16 %v1169_v38, %v1168_v7  ;;  %v5256_v57 = vld [vmem:[%s7590_s6 + $0x18] sm:$0xff]  }
 0x98f   :  { %4918 = vmatpush3.bf16.msra.mxu0 %v5256_v57 }
 0x990   :  { %4874 = vmatmul.mubr.msk.bf16.gmra.mxu1 %vm623_vm5, %v1171_v27  ;;  %v1397_v21 = vpop.xlane.xlu1 %1396  ;;  %4919 = vmatprep.subr.bf16.mxu0 %v5665_v30 }
 0x991   :  { %4877 = vmatprep.mubr.msk.bf16.mxu1 %vm5666_vm3, %v5665_v30  ;;  %5456 = vrcp.f32 %v1397_v21 }
 0x992   :  { %v5449_v58 = vpop.eup %5448 }
 0x993   :  { %v5451_v53 = vpop.eup %5450  ;;  %v1408_v31 = vmul.f32 %v5449_v58, %v6296_v36  ;;  %4920 = vmatpush3.bf16.msra.mxu0 %v5257_v11 }
 0x994   :  { %v1421_v37 = vpop.permute.xlu1 %1420  ;;  %v1407_v0 = vmul.f32 %v5451_v53, %v6292_v42  ;;  %4921 = vmatprep.subr.bf16.mxu0 %v5665_v30 }
 0x995   :  { %4900 = vmatpush3.bf16.msra.mxu1 %v1421_v37 }
 0x996   :  { %4901 = vmatprep.subr.bf16.mxu1 %v5665_v30  ;;  %v1413_v61 = vpack.c.bf16 %v1408_v31, %v1407_v0 }
 0x997   :  { %4922 = vmatpush3.bf16.msra.mxu0 %v5258_v23 }
 0x998   :  { %4878 = vmatmul.mubr.msk.bf16.gmra.mxu1 %vm623_vm5, %v1172_v32  ;;  %v1419_v33 = vpop.permute.xlu1 %1418  ;;  %4923 = vmatprep.subr.bf16.mxu0 %v5665_v30 }
 0x999   :  { %4902 = vmatpush3.bf16.msra.mxu1 %v1419_v33  ;;  %4905 = vmatprep.mubr.msk.bf16.mxu1 %vm5666_vm3, %v5665_v30  ;;  %v5259_v33 = vld [vmem:[%s7590_s6] sm:$0xff]  }
 0x99a   :  { %4903 = vmatprep.subr.bf16.mxu1 %v5665_v30  ;;  %v5453_v43 = vpop.eup %5452 }
 0x99b   :  { %v5455_v41 = vpop.eup %5454  ;;  %v1410_v48 = vmul.f32 %v5453_v43, %v6304_v34  ;;  %4924 = vmatpush3.bf16.msra.mxu0 %v5259_v33 }
 0x99c   :  { %v1417_v14 = vpop.permute.xlu1 %1416  ;;  %v1409_v51 = vmul.f32 %v5455_v41, %v6300_v35 }
 0x99d   :  { %4904 = vmatpush3.bf16.msra.mxu1 %v1417_v14 }
 0x99e   :  { %v1414_v49 = vpack.c.bf16 %v1410_v48, %v1409_v51  ;;  %v5457_v36 = vpop.eup %5456 }
 0x99f   :  { %v1411_v4 = vmul.f32 %v5457_v36, %v6308_v60 }
 0x9a0   :  { %4906 = vmatmul.mubr.msk.bf16.vlgmr.msra.gmra.mxu1 %vm623_vm5, %v1413_v61 }
 0x9a1   :  { %4909 = vmatprep.mubr.msk.bf16.mxu1 %vm5666_vm3, %v5665_v30 }
 0x9a8   :  { %4910 = vmatmul.mubr.msk.bf16.gmra.mxu1 %vm623_vm5, %v1414_v49 }
 0x9a9   :  { %4913 = vmatprep.mubr.msk.bf16.mxu1 %vm5666_vm3, %v5665_v30 }
 0x9b5   :  { %v1400_v42 = vpop.xlane.xlu0 %1399 }
 0x9b6   :  { %5458 = vrcp.f32 %v1400_v42 }
 0x9c3   :  { %v5459_v5 = vpop.eup %5458 }
 0x9c4   :  { %v1412_v46 = vmul.f32 %v5459_v5, %v6321_v55 }
 0x9c6   :  { %v1415_v39 = vpack.c.bf16 %v1412_v46, %v1411_v4 }
 0x9c8   :  { %4914 = vmatmul.mubr.msk.bf16.gmra.mxu1 %vm623_vm5, %v1415_v39 }
 0x9c9   :  { %1891 = vmatprep.mubr.bf16.mxu1 %v5663_v1 }
 0xa27   :  { %v982_v35 = vpop.f32.mrf.mxu1 }
 0xa29   :  { %v4835_v34 = vpop.f32.mrf.mxu1 }
 0xa2b   :  { %v985_v62 = vpop.f32.mrf.mxu1 }
 0xa2c   :  { %v5131_v52 = vpack.i.bf16 %v985_v62, %v982_v35 }
 0xa2d   :  { %v4836_v3 = vpop.f32.mrf.mxu1 }
 0xa2e   :  { %5132 = vrot.lane.b32.xlu1 %v5131_v52, %s5672_s16 }
 0xa2f   :  { %v990_v2 = vpop.f32.mrf.mxu1 }
 0xa31   :  { %v4839_v8 = vpop.f32.mrf.mxu1 }
 0xa33   :  { %v993_v29 = vpop.f32.mrf.mxu1 }
 0xa34   :  { %v5141_v40 = vpack.i.bf16 %v993_v29, %v990_v2 }
 0xa35   :  { %v4840_v47 = vpop.f32.mrf.mxu1 }
 0xa36   :  { %5142 = vrot.lane.b32.xlu1 %v5141_v40, %s5672_s16 }
 0xa37   :  { %v998_v60 = vpop.f32.mrf.mxu1 }
 0xa39   :  { %v4843_v55 = vpop.f32.mrf.mxu1 }
 0xa3b   :  { %v1001_v6 = vpop.f32.mrf.mxu1 }
 0xa3c   :  { %v5161_v4 = vpack.i.bf16 %v1001_v6, %v998_v60 }
 0xa3d   :  { %v4844_v63 = vpop.f32.mrf.mxu1 }
 0xa48   :  { %v1225_v25 = vpop.f32.mrf.mxu1 }
 0xa4a   :  { %v4871_v44 = vpop.f32.mrf.mxu1 }
 0xa4c   :  { %v1228_v27 = vpop.f32.mrf.mxu1 }
 0xa4d   :  { %v5136_v15 = vpack.i.bf16 %v1228_v27, %v1225_v25 }
 0xa4e   :  { %v4872_v21 = vpop.f32.mrf.mxu1 }
 0xa4f   :  { %5137 = vrot.lane.b32.xlu0 %v5136_v15, %s5671_s15 }
 0xa50   :  { %v1233_v19 = vpop.f32.mrf.mxu1 }
 0xa52   :  { %v4875_v38 = vpop.f32.mrf.mxu1 }
 0xa54   :  { %v1236_v37 = vpop.f32.mrf.mxu1 }
 0xa55   :  { %v5151_v51 = vpack.i.bf16 %v1236_v37, %v1233_v19 }
 0xa56   :  { %v4876_v7 = vpop.f32.mrf.mxu1 }
 0xa58   :  { %v1241_v32 = vpop.f32.mrf.mxu1 }
 0xa5a   :  { %v4879_v58 = vpop.f32.mrf.mxu1 }
 0xa5c   :  { %v1244_v53 = vpop.f32.mrf.mxu1 }
 0xa5d   :  { %v5166_v46 = vpack.i.bf16 %v1244_v53, %v1241_v32 }
 0xa5e   :  { %v4880_v31 = vpop.f32.mrf.mxu1 }
 0xa60   :  { %v1468_v0 = vpop.f32.mrf.mxu1 }
 0xa62   :  { %v4907_v14 = vpop.f32.mrf.mxu1 }
 0xa64   :  { %v1471_v61 = vpop.f32.mrf.mxu1 }
 0xa65   :  { %v5146_v43 = vpack.i.bf16 %v1471_v61, %v1468_v0 }
 0xa66   :  { %v4908_v41 = vpop.f32.mrf.mxu1 }
 0xa67   :  { %5147 = vrot.lane.b32.xlu1 %v5146_v43, %s5667_s11 }
 0xa68   :  { %v1476_v48 = vpop.f32.mrf.mxu1 }
 0xa6a   :  { %v4911_v49 = vpop.f32.mrf.mxu1 }
 0xa6b   :  { %5152 = vrot.lane.b32.xlu1 %v5151_v51, %s5671_s15 }
 0xa6c   :  { %v1479_v42 = vpop.f32.mrf.mxu1 }
 0xa6d   :  { %v5156_v36 = vpack.i.bf16 %v1479_v42, %v1476_v48 }
 0xa6e   :  { %v4912_v5 = vpop.f32.mrf.mxu1 }
 0xa6f   :  { %5157 = vrot.lane.b32.xlu1 %v5156_v36, %s5667_s11 }
 0xa73   :  { %5162 = vrot.lane.b32.xlu1 %v5161_v4, %s5672_s16 }
 0xa77   :  { %5167 = vrot.lane.b32.xlu1 %v5166_v46, %s5671_s15 }
 0xa88   :  { %v1484_v39 = vpop.f32.mrf.mxu1 }
 0xa8a   :  { %v4915_v35 = vpop.f32.mrf.mxu1 }
 0xa8c   :  { %v1487_v34 = vpop.f32.mrf.mxu1 }
 0xa8d   :  { %v5171_v62 = vpack.i.bf16 %v1487_v34, %v1484_v39 }
 0xa8e   :  { %v4916_v52 = vpop.f32.mrf.mxu1 }
 0xa8f   :  { %5172 = vrot.lane.b32.xlu0 %v5171_v62, %s5667_s11  ;;  %v6430_v52 = vsub.s32 3, %v5767_v17 }
 0xaa0   :  { %v5133_v3 = vpop.permute.xlu1 %5132 }
 0xaa1   :  { %v5135_v29 = vunpack.i.h.bf16 %v5133_v3  ;;  %v5134_v40 = vunpack.i.l.bf16 %v5133_v3 }
 0xaa3   :  { %v1564_v6 = vsel %vm535_vm4, %v6123_v54, %v5135_v29  ;;  %v1563_v63 = vsel %vm535_vm4, %v6121_v9, %v5134_v40 }
 0xaa8   :  { %v5143_v8 = vpop.permute.xlu1 %5142 }
 0xaa9   :  { %v5145_v19 = vunpack.i.h.bf16 %v5143_v8  ;;  %v5144_v38 = vunpack.i.l.bf16 %v5143_v8 }
 0xaab   :  { %v1566_v54 = vsel %vm535_vm4, %v6127_v20, %v5145_v19  ;;  %v1565_v32 = vsel %vm535_vm4, %v6125_v10, %v5144_v38 }
 0xac1   :  { %v5138_v2 = vpop.permute.xlu0 %5137 }
 0xac2   :  { %v5140_v47 = vunpack.i.h.bf16 %v5138_v2  ;;  %v5139_v55 = vunpack.i.l.bf16 %v5138_v2 }
 0xac4   :  { %v1571_v25 = vsel %vm1569_vm6, %v1564_v6, %v5140_v47  ;;  %v1570_v44 = vsel %vm1569_vm6, %v1563_v63, %v5139_v55 }
 0xad9   :  { %v5148_v60 = vpop.permute.xlu1 %5147 }
 0xada   :  { %v5150_v57 = vunpack.i.h.bf16 %v5148_v60  ;;  %v5149_v11 = vunpack.i.l.bf16 %v5148_v60 }
 0xadc   :  { %v1577_v23 = vsel %vm623_vm5, %v1571_v25, %v5150_v57  ;;  %v1576_v27 = vsel %vm623_vm5, %v1570_v44, %v5149_v11 }
 0xadd   :  { %v1582_v15 = vpack.c.bf16 %v1577_v23, %v1576_v27  ;;  %v5153_v21 = vpop.permute.xlu1 %5152 }
 0xade   :  { %v5155_v37 = vunpack.i.h.bf16 %v5153_v21  ;;  %v5154_v7 = vunpack.i.l.bf16 %v5153_v21 }
 0xadf   :  { %4926 = vmatmul.mubr.msk.bf16.vlgmr.msra.gmra.mxu0 %vm191_vm2, %v1582_v15 }
 0xae0   :  { %4929 = vmatprep.mubr.msk.bf16.mxu0 %vm5666_vm3, %v5665_v30  ;;  %v1573_v53 = vsel %vm1569_vm6, %v1566_v54, %v5155_v37  ;;  %v1572_v31 = vsel %vm1569_vm6, %v1565_v32, %v5154_v7 }
 0xae1   :  { %v5158_v9 = vpop.permute.xlu1 %5157 }
 0xae2   :  { %v5160_v58 = vunpack.i.h.bf16 %v5158_v9  ;;  %v5159_v33 = vunpack.i.l.bf16 %v5158_v9 }
 0xae4   :  { %v1579_v0 = vsel %vm623_vm5, %v1573_v53, %v5160_v58  ;;  %v1578_v14 = vsel %vm623_vm5, %v1572_v31, %v5159_v33 }
 0xae5   :  { %v1583_v61 = vpack.c.bf16 %v1579_v0, %v1578_v14  ;;  %v5163_v20 = vpop.permute.xlu1 %5162 }
 0xae6   :  { %v5165_v41 = vunpack.i.h.bf16 %v5163_v20  ;;  %v5164_v10 = vunpack.i.l.bf16 %v5163_v20 }
 0xae7   :  { %4930 = vmatmul.mubr.msk.bf16.gmra.mxu0 %vm191_vm2, %v1583_v61 }
 0xae8   :  { %4933 = vmatprep.mubr.msk.bf16.mxu0 %vm5666_vm3, %v5665_v30  ;;  %v1568_v42 = vsel %vm535_vm4, %v6131_v26, %v5165_v41  ;;  %v1567_v36 = vsel %vm535_vm4, %v6129_v22, %v5164_v10  ;;  %v6435_v22 = vld [vmem:[%s7588_s3] sm:$0xff] }
 0xae9   :  { %v5168_v43 = vpop.permute.xlu1 %5167  ;;  %v1596_v26 = vrot.slane %v6435_v22, %v6430_v52 }
 0xaea   :  { %v5170_v48 = vunpack.i.h.bf16 %v5168_v43  ;;  %v5169_v51 = vunpack.i.l.bf16 %v5168_v43 }
 0xaec   :  { %v1574_v46 = vsel %vm1569_vm6, %v1567_v36, %v5169_v51  ;;  %v1575_v39 = vsel %vm1569_vm6, %v1568_v42, %v5170_v48 }
 0xb01   :  { %v5173_v49 = vpop.permute.xlu0 %5172 }
 0xb02   :  { %v5175_v5 = vunpack.i.h.bf16 %v5173_v49  ;;  %v5174_v4 = vunpack.i.l.bf16 %v5173_v49 }
 0xb04   :  { %v1581_v35 = vsel %vm623_vm5, %v1575_v39, %v5175_v5  ;;  %v1580_v34 = vsel %vm623_vm5, %v1574_v46, %v5174_v4  ;;  %v5262_v39 = vld [vmem:[%s7591_s7 + $0x34] ss:$8 sps:$4 sm:$0xff]  }
 0xb05   :  { %v1584_v62 = vpack.c.bf16 %v1581_v35, %v1580_v34  ;;  %v5260_v35 = vld [vmem:[%s7591_s7 + $0x30] ss:$8 sps:$4 sm:$0xff]   ;;  %1867 = vmatprep.subr.bf16.mxu1 %v5262_v39  ;;  %v5265_v34 = vld [vmem:[%s7591_s7 + $0x24] ss:$8 sps:$4 sm:$0xff]  }
 0xb06   :  { %1868 = vmatpush1.bf16.msra.mxu1 %v5260_v35 }
 0xb07   :  { %4934 = vmatmul.mubr.msk.bf16.gmra.mxu0 %vm191_vm2, %v1584_v62  ;;  %v5263_v62 = vld [vmem:[%s7591_s7 + $0x20] ss:$8 sps:$4 sm:$0xff]   ;;  %1869 = vmatprep.subr.bf16.mxu1 %v5265_v34 }
 0xb0a   :  { %1870 = vmatpush1.bf16.msra.mxu1 %v5263_v62 }
 0xb9f   :  { %v1664_v3 = vpop.f32.mrf.mxu0 }
 0xba0   :  { %v1665_v2 = vadd.f32 %v1664_v3, %v1596_v26 }
 0xba1   :  { %v4927_v8 = vpop.f32.mrf.mxu0 }
 0xba2   :  { %v6440_v29 = vadd.f32 %v1665_v2, %v5823_v24  ;;  %v5266_v2 = vld [vmem:[%s7591_s7 + $0x10] ss:$8 sps:$4 sm:$0xff]  }
 0xba3   :  { %v1667_v40 = vpop.f32.mrf.mxu0 }
 0xba4   :  { %v1668_v47 = vadd.f32 %v1667_v40, %v1596_v26  ;;  %v1693_v55 = vsel %vm191_vm2, %v6440_v29, 0.0  ;;  %v5269_v40 = vld [vmem:[%s7591_s7] ss:$8 sps:$4 sm:$0xff]  }
 0xba5   :  { %v4928_v60 = vpop.f32.mrf.mxu0  ;;  %1694 = vadd.xlane.f32.xlu1 %v1693_v55 }
 0xba6   :  { %v6445_v6 = vadd.f32 %v1668_v47, %v5827_v28  ;;  %v5271_v47 = vld [vmem:[%s7591_s7 + $0x4] ss:$8 sps:$4 sm:$0xff]  }
 0xba7   :  { %v1672_v63 = vpop.f32.mrf.mxu0 }
 0xba8   :  { %v1673_v57 = vadd.f32 %v1672_v63, %v1596_v26  ;;  %v1696_v11 = vsel %vm191_vm2, %v6445_v6, 0.0 }
 0xba9   :  { %v4931_v25 = vpop.f32.mrf.mxu0  ;;  %1697 = vadd.xlane.f32.xlu0 %v1696_v11 }
 0xbaa   :  { %v6450_v24 = vadd.f32 %v1673_v57, %v5832_v45 }
 0xbab   :  { %v1675_v44 = vpop.f32.mrf.mxu0 }
 0xbac   :  { %v1676_v23 = vadd.f32 %v1675_v44, %v1596_v26  ;;  %v1699_v27 = vsel %vm191_vm2, %v6450_v24, 0.0 }
 0xbad   :  { %v4932_v15 = vpop.f32.mrf.mxu0  ;;  %1700 = vadd.xlane.f32.xlu0 %v1699_v27 }
 0xbae   :  { %v6455_v28 = vadd.f32 %v1676_v23, %v5837_v50 }
 0xbb0   :  { %v1702_v21 = vsel %vm191_vm2, %v6455_v28, 0.0 }
 0xbb1   :  { %1703 = vadd.xlane.f32.xlu0 %v1702_v21 }
 0xbc7   :  { %v1680_v19 = vpop.f32.mrf.mxu0 }
 0xbc8   :  { %v1681_v38 = vadd.f32 %v1680_v19, %v1596_v26 }
 0xbc9   :  { %v4935_v37 = vpop.f32.mrf.mxu0 }
 0xbca   :  { %v6460_v45 = vadd.f32 %v1681_v38, %v5842_v56 }
 0xbcb   :  { %v1683_v7 = vpop.f32.mrf.mxu0 }
 0xbcc   :  { %v1684_v9 = vadd.f32 %v1683_v7, %v1596_v26  ;;  %v1705_v54 = vsel %vm191_vm2, %v6460_v45, 0.0  ;;  %v5268_v26 = vld [vmem:[%s7591_s7 + $0x14] ss:$8 sps:$4 sm:$0xff]  }
 0xbcd   :  { %1706 = vadd.xlane.f32.xlu1 %v1705_v54  ;;  %v4936_v32 = vpop.f32.mrf.mxu0  ;;  %1871 = vmatprep.subr.bf16.mxu1 %v5268_v26 }
 0xbce   :  { %v6465_v50 = vadd.f32 %v1684_v9, %v5847_v59  ;;  %1872 = vmatpush1.bf16.msra.mxu1 %v5266_v2 }
 0xbcf   :  { %1873 = vmatprep.subr.bf16.mxu1 %v5271_v47 }
 0xbd0   :  { %v1708_v58 = vsel %vm191_vm2, %v6465_v50, 0.0 }
 0xbd1   :  { %1709 = vadd.xlane.f32.xlu0 %v1708_v58 }
 0xbd2   :  { %1874 = vmatpush1.bf16.msra.mxu1 %v5269_v40 }
 0xc2e   :  { %v1695_v33 = vpop.xlane.xlu1 %1694 }
 0xc2f   :  { %v1711_v53 = vmul.f32 0.015625, %v1695_v33  ;;  %v6526_v33 = vsub.s32 4, %v5767_v17 }
 0xc31   :  { %v6470_v31 = vsub.f32 %v6440_v29, %v1711_v53 }
 0xc32   :  { %v1698_v56 = vpop.xlane.xlu0 %1697 }
 0xc33   :  { %v1712_v0 = vmul.f32 0.015625, %v1698_v56  ;;  %v1723_v14 = vmul.f32 %v6470_v31, %v6470_v31 }
 0xc35   :  { %v6475_v61 = vsub.f32 %v6445_v6, %v1712_v0  ;;  %v1729_v59 = vsel %vm191_vm2, %v1723_v14, 0.0  ;;  %v1774_v0 = vrot.slane %v6435_v22, %v6526_v33 }
 0xc36   :  { %v1701_v20 = vpop.xlane.xlu0 %1700  ;;  %1730 = vadd.xlane.f32.xlu1 %v1729_v59  ;;  %v6532_v59 = vsub.s32 5, %v5767_v17 }
 0xc37   :  { %v1713_v43 = vmul.f32 0.015625, %v1701_v20  ;;  %v1724_v41 = vmul.f32 %v6475_v61, %v6475_v61 }
 0xc39   :  { %v6481_v10 = vsub.f32 %v6450_v24, %v1713_v43  ;;  %v1732_v48 = vsel %vm191_vm2, %v1724_v41, 0.0 }
 0xc3a   :  { %v1704_v51 = vpop.xlane.xlu0 %1703  ;;  %1733 = vadd.xlane.f32.xlu0 %v1732_v48  ;;  %v1784_v48 = vrot.slane %v6435_v22, %v6532_v59 }
 0xc3b   :  { %v1714_v49 = vmul.f32 0.015625, %v1704_v51  ;;  %v1725_v42 = vmul.f32 %v6481_v10, %v6481_v10 }
 0xc3d   :  { %v6487_v36 = vsub.f32 %v6455_v28, %v1714_v49  ;;  %v1735_v5 = vsel %vm191_vm2, %v1725_v42, 0.0 }
 0xc3e   :  { %1736 = vadd.xlane.f32.xlu1 %v1735_v5 }
 0xc3f   :  { %v1726_v4 = vmul.f32 %v6487_v36, %v6487_v36 }
 0xc41   :  { %v1738_v46 = vsel %vm191_vm2, %v1726_v4, 0.0 }
 0xc42   :  { %1739 = vadd.xlane.f32.xlu0 %v1738_v46 }
 0xc56   :  { %v1707_v3 = vpop.xlane.xlu1 %1706 }
 0xc57   :  { %v1715_v8 = vmul.f32 0.015625, %v1707_v3 }
 0xc59   :  { %v6518_v55 = vsub.f32 %v6460_v45, %v1715_v8 }
 0xc5a   :  { %v1710_v60 = vpop.xlane.xlu0 %1709 }
 0xc5b   :  { %v1716_v63 = vmul.f32 0.015625, %v1710_v60  ;;  %v1727_v57 = vmul.f32 %v6518_v55, %v6518_v55 }
 0xc5d   :  { %v1722_v11 = vsub.f32 %v6465_v50, %v1716_v63  ;;  %v1741_v25 = vsel %vm191_vm2, %v1727_v57, 0.0 }
 0xc5e   :  { %1742 = vadd.xlane.f32.xlu1 %v1741_v25 }
 0xc5f   :  { %v1728_v44 = vmul.f32 %v1722_v11, %v1722_v11 }
 0xc61   :  { %v1744_v23 = vsel %vm191_vm2, %v1728_v44, 0.0 }
 0xc62   :  { %1745 = vadd.xlane.f32.xlu0 %v1744_v23 }
 0xcbf   :  { %v1731_v27 = vpop.xlane.xlu1 %1730 }
 0xcc0   :  { %v1747_v15 = vmul.f32 0.015625, %v1731_v27 }
 0xcc2   :  { %v1753_v21 = vadd.f32 1e-05, %v1747_v15 }
 0xcc3   :  { %v1734_v19 = vpop.xlane.xlu0 %1733 }
 0xcc4   :  { %5460 = vrsqrt.f32 %v1753_v21  ;;  %v1748_v38 = vmul.f32 0.015625, %v1734_v19  ;;  %v5272_v21 = vld [vmem:[%s7592_s8 + $0x78] sm:$0xff]  }
 0xcc5   :  { %v5273_v19 = vld [vmem:[%s7592_s8 + $0x38] sm:$0xff]   ;;  %4641 = vmatprep.subr.bf16.mxu0 %v5272_v21 }
 0xcc6   :  { %v1754_v37 = vadd.f32 1e-05, %v1748_v38  ;;  %4642 = vmatpush3.bf16.msra.mxu0 %v5273_v19  ;;  %v5276_v38 = vld [vmem:[%s7592_s8 + $0x68] sm:$0xff]  }
 0xcc7   :  { %v1737_v7 = vpop.xlane.xlu1 %1736 }
 0xcc8   :  { %5462 = vrsqrt.f32 %v1754_v37  ;;  %v1749_v9 = vmul.f32 0.015625, %v1737_v7  ;;  %v5277_v37 = vld [vmem:[%s7592_s8 + $0x28] sm:$0xff]   ;;  %v5278_v7 = vld [vmem:[%s7592_s8 + $0x60] sm:$0xff]  }
 0xcca   :  { %v1755_v54 = vadd.f32 1e-05, %v1749_v9  ;;  %v5279_v9 = vld [vmem:[%s7592_s8 + $0x20] sm:$0xff]  }
 0xccb   :  { %v1740_v32 = vpop.xlane.xlu0 %1739 }
 0xccc   :  { %5464 = vrsqrt.f32 %v1755_v54  ;;  %v1750_v58 = vmul.f32 0.015625, %v1740_v32  ;;  %v5280_v54 = vld [vmem:[%s7592_s8 + $0x58] sm:$0xff]  }
 0xccd   :  { %v5281_v32 = vld [vmem:[%s7592_s8 + $0x18] sm:$0xff]  }
 0xcce   :  { %v1756_v53 = vadd.f32 1e-05, %v1750_v58  ;;  %v5282_v58 = vld [vmem:[%s7592_s8 + $0x50] sm:$0xff]  }
 0xcd0   :  { %5466 = vrsqrt.f32 %v1756_v53  ;;  %v5283_v53 = vld [vmem:[%s7592_s8 + $0x10] sm:$0xff]  }
 0xcd1   :  { %v5461_v56 = vpop.eup %5460 }
 0xcd2   :  { %v1765_v14 = vmul.f32 %v5461_v56, %v6470_v31  ;;  %v5284_v56 = vld [vmem:[%s7592_s8 + $0x48] sm:$0xff]  }
 0xcd4   :  { %v1775_v43 = vmul.f32 %v1774_v0, %v1765_v14  ;;  %v5286_v14 = vld [vmem:[%s7592_s8 + $0x40] sm:$0xff]  }
 0xcd5   :  { %v5463_v20 = vpop.eup %5462 }
 0xcd6   :  { %v1766_v41 = vmul.f32 %v5463_v20, %v6475_v61  ;;  %v1785_v42 = vadd.f32 %v1784_v48, %v1775_v43  ;;  %v5287_v20 = vld [vmem:[%s7592_s8] sm:$0xff]   ;;  %v6596_v43 = vsub.s32 6, %v5767_v17 }
 0xcd8   :  { %v1776_v51 = vmul.f32 %v1774_v0, %v1766_v41  ;;  %v6600_v41 = vrot.slane %v6435_v22, %v6596_v43 }
 0xcd9   :  { %v5465_v49 = vpop.eup %5464 }
 0xcda   :  { %v1786_v5 = vadd.f32 %v1784_v48, %v1776_v51  ;;  %v1767_v4 = vmul.f32 %v5465_v49, %v6481_v10 }
 0xcdc   :  { %v1791_v46 = vpack.c.bf16 %v1786_v5, %v1785_v42  ;;  %v1777_v35 = vmul.f32 %v1774_v0, %v1767_v4 }
 0xcdd   :  { %v5467_v39 = vpop.eup %5466 }
 0xcde   :  { %4434 = vmatmul.mubr.msk.bf16.vlgmr.msra.gmra.mxu1 %vm191_vm2, %v1791_v46  ;;  %v1768_v31 = vmul.f32 %v5467_v39, %v6487_v36  ;;  %v1787_v61 = vadd.f32 %v1784_v48, %v1777_v35 }
 0xcdf   :  { %1901 = vmatprep.mubr.bf16.mxu1 %v5663_v1 }
 0xce0   :  { %v1778_v34 = vmul.f32 %v1774_v0, %v1768_v31 }
 0xce2   :  { %v1788_v62 = vadd.f32 %v1784_v48, %v1778_v34 }
 0xce4   :  { %v1792_v26 = vpack.c.bf16 %v1788_v62, %v1787_v61 }
 0xce6   :  { %4435 = vmatmul.mubr.msk.bf16.gmra.mxu1 %vm191_vm2, %v1792_v26 }
 0xce7   :  { %v1743_v3 = vpop.xlane.xlu1 %1742  ;;  %1911 = vmatprep.mubr.bf16.mxu1 %v5663_v1 }
 0xce8   :  { %v1751_v2 = vmul.f32 0.015625, %v1743_v3 }
 0xcea   :  { %v1757_v10 = vadd.f32 1e-05, %v1751_v2 }
 0xceb   :  { %v1746_v8 = vpop.xlane.xlu0 %1745 }
 0xcec   :  { %5468 = vrsqrt.f32 %v1757_v10  ;;  %v1752_v40 = vmul.f32 0.015625, %v1746_v8 }
 0xcee   :  { %v1758_v47 = vadd.f32 1e-05, %v1752_v40 }
 0xcf0   :  { %5470 = vrsqrt.f32 %v1758_v47 }
 0xcf9   :  { %v5469_v36 = vpop.eup %5468 }
 0xcfa   :  { %v1769_v60 = vmul.f32 %v5469_v36, %v6518_v55  ;;  %v5274_v55 = vld [vmem:[%s7592_s8 + $0x70] sm:$0xff]  }
 0xcfb   :  { %4643 = vmatprep.subr.bf16.mxu0 %v5274_v55 }
 0xcfc   :  { %v1779_v25 = vmul.f32 %v1774_v0, %v1769_v60 }
 0xcfd   :  { %v5471_v63 = vpop.eup %5470 }
 0xcfe   :  { %v1770_v57 = vmul.f32 %v5471_v63, %v1722_v11  ;;  %v1789_v23 = vadd.f32 %v1784_v48, %v1779_v25  ;;  %v5275_v11 = vld [vmem:[%s7592_s8 + $0x30] sm:$0xff]  }
 0xcff   :  { %4644 = vmatpush3.bf16.msra.mxu0 %v5275_v11 }
 0xd00   :  { %v1780_v44 = vmul.f32 %v1774_v0, %v1770_v57  ;;  %4645 = vmatprep.subr.bf16.mxu0 %v5276_v38  ;;  %v5285_v0 = vld [vmem:[%s7592_s8 + $0x8] sm:$0xff]  }
 0xd02   :  { %v1790_v27 = vadd.f32 %v1784_v48, %v1780_v44  ;;  %v5653_v48 = vld [vmem:[%s7588_s3 + $0x8] sm:$0xff] }
 0xd03   :  { %4646 = vmatpush3.bf16.msra.mxu0 %v5277_v37  ;;  %v6606_v51 = vrot.slane %v5653_v48, %v6596_v43 }
 0xd04   :  { %v1793_v15 = vpack.c.bf16 %v1790_v27, %v1789_v23  ;;  %4647 = vmatprep.subr.bf16.mxu0 %v5278_v7 }
 0xd06   :  { %4436 = vmatmul.mubr.msk.bf16.gmra.mxu1 %vm191_vm2, %v1793_v15 }
 0xd07   :  { %2430 = vmatprep.mubr.bf16.mxu1 %v5663_v1  ;;  %4648 = vmatpush3.bf16.msra.mxu0 %v5279_v9 }
 0xd08   :  { %4649 = vmatprep.subr.bf16.mxu0 %v5280_v54 }
 0xd0b   :  { %4650 = vmatpush3.bf16.msra.mxu0 %v5281_v32 }
 0xd0c   :  { %4651 = vmatprep.subr.bf16.mxu0 %v5282_v58 }
 0xd0f   :  { %4652 = vmatpush3.bf16.msra.mxu0 %v5283_v53 }
 0xd10   :  { %4653 = vmatprep.subr.bf16.mxu0 %v5284_v56 }
 0xd13   :  { %4654 = vmatpush3.bf16.msra.mxu0 %v5285_v0 }
 0xd14   :  { %4655 = vmatprep.subr.bf16.mxu0 %v5286_v14 }
 0xd17   :  { %4656 = vmatpush3.bf16.msra.mxu0 %v5287_v20 }
 0xd18   :  { %4955 = vmatprep.subr.bf16.mxu0 %v5665_v30 }
 0xd9e   :  { %v1893_v49 = vpop.f32.mrf.mxu1 }
 0xd9f   :  { %v6609_v42 = vadd.f32 %v1893_v49, %v6600_v41 }
 0xda0   :  { %v1895_v5 = vpop.f32.mrf.mxu1 }
 0xda1   :  { %v1934_v4 = vmul.f32 0.044715, %v6609_v42  ;;  %v6613_v46 = vadd.f32 %v1895_v5, %v6606_v51 }
 0xda2   :  { %v1897_v39 = vpop.f32.mrf.mxu1 }
 0xda3   :  { %v1946_v31 = vmul.f32 %v1934_v4, %v6609_v42  ;;  %v1935_v35 = vmul.f32 0.044715, %v6613_v46  ;;  %v1898_v34 = vadd.f32 %v1897_v39, %v6600_v41 }
 0xda4   :  { %v1899_v61 = vpop.f32.mrf.mxu1 }
 0xda5   :  { %v1958_v62 = vmul.f32 %v1946_v31, %v6609_v42  ;;  %v1947_v26 = vmul.f32 %v1935_v35, %v6613_v46  ;;  %v1936_v3 = vmul.f32 0.044715, %v1898_v34  ;;  %v1900_v2 = vadd.f32 %v1899_v61, %v6606_v51 }
 0xda6   :  { %v1903_v10 = vpop.f32.mrf.mxu1 }
 0xda7   :  { %v1970_v8 = vadd.f32 %v1958_v62, %v6609_v42  ;;  %v1959_v40 = vmul.f32 %v1947_v26, %v6613_v46  ;;  %v1948_v47 = vmul.f32 %v1936_v3, %v1898_v34  ;;  %v6624_v36 = vadd.f32 %v1903_v10, %v6600_v41 }
 0xda8   :  { %v1937_v60 = vmul.f32 0.044715, %v1900_v2  ;;  %v1905_v63 = vpop.f32.mrf.mxu1 }
 0xda9   :  { %v1982_v57 = vmul.f32 0.7978846, %v1970_v8  ;;  %v1960_v25 = vmul.f32 %v1948_v47, %v1898_v34  ;;  %v1938_v44 = vmul.f32 0.044715, %v6624_v36  ;;  %v6628_v23 = vadd.f32 %v1905_v63, %v6606_v51 }
 0xdaa   :  { %v1949_v27 = vmul.f32 %v1937_v60, %v1900_v2  ;;  %v1907_v15 = vpop.f32.mrf.mxu1  ;;  %v1971_v21 = vadd.f32 %v1959_v40, %v6613_v46 }
 0xdab   :  { %v1972_v19 = vadd.f32 %v1960_v25, %v1898_v34  ;;  %v1950_v55 = vmul.f32 %v1938_v44, %v6624_v36  ;;  %v1939_v11 = vmul.f32 0.044715, %v6628_v23  ;;  %5472 = vtanh.f32 %v1982_v57 }
 0xdac   :  { %v1961_v38 = vmul.f32 %v1949_v27, %v1900_v2  ;;  %v1908_v37 = vadd.f32 %v1907_v15, %v6600_v41  ;;  %v1909_v7 = vpop.f32.mrf.mxu1  ;;  %v1983_v9 = vmul.f32 0.7978846, %v1971_v21  ;;  %v1924_v44 = vmul.f32 0.5, %v1898_v34 }
 0xdad   :  { %v1984_v54 = vmul.f32 0.7978846, %v1972_v19  ;;  %v1962_v32 = vmul.f32 %v1950_v55, %v6624_v36  ;;  %v1951_v58 = vmul.f32 %v1939_v11, %v6628_v23  ;;  %v1910_v53 = vadd.f32 %v1909_v7, %v6606_v51 }
 0xdae   :  { %v1940_v56 = vmul.f32 0.044715, %v1908_v37  ;;  %v1973_v0 = vadd.f32 %v1961_v38, %v1900_v2  ;;  %5474 = vtanh.f32 %v1983_v9  ;;  %v1923_v15 = vmul.f32 0.5, %v6613_v46 }
 0xdaf   :  { %5476 = vtanh.f32 %v1984_v54  ;;  %v1963_v14 = vmul.f32 %v1951_v58, %v6628_v23  ;;  %v1941_v20 = vmul.f32 0.044715, %v1910_v53  ;;  %v1974_v5 = vadd.f32 %v1962_v32, %v6624_v36 }
 0xdb0   :  { %v1952_v48 = vmul.f32 %v1940_v56, %v1908_v37  ;;  %v1985_v49 = vmul.f32 0.7978846, %v1973_v0  ;;  %v1925_v21 = vmul.f32 0.5, %v1900_v2  ;;  %v1922_v55 = vmul.f32 0.5, %v6609_v42 }
 0xdb1   :  { %v1953_v4 = vmul.f32 %v1941_v20, %v1910_v53  ;;  %v1975_v39 = vadd.f32 %v1963_v14, %v6628_v23  ;;  %v1986_v35 = vmul.f32 0.7978846, %v1974_v5  ;;  %v1927_v42 = vmul.f32 0.5, %v6628_v23 }
 0xdb2   :  { %v1964_v31 = vmul.f32 %v1952_v48, %v1908_v37  ;;  %5478 = vtanh.f32 %v1985_v49  ;;  %v1928_v48 = vmul.f32 0.5, %v1908_v37  ;;  %v1929_v5 = vmul.f32 0.5, %v1910_v53 }
 0xdb3   :  { %v1965_v61 = vmul.f32 %v1953_v4, %v1910_v53  ;;  %v1987_v62 = vmul.f32 0.7978846, %v1975_v39 }
 0xdb4   :  { %v1976_v26 = vadd.f32 %v1964_v31, %v1908_v37  ;;  %v1926_v31 = vmul.f32 0.5, %v6624_v36 }
 0xdb5   :  { %v1977_v3 = vadd.f32 %v1965_v61, %v1910_v53  ;;  %5480 = vtanh.f32 %v1987_v62 }
 0xdb6   :  { %v1988_v10 = vmul.f32 0.7978846, %v1976_v26  ;;  %5482 = vtanh.f32 %v1986_v35 }
 0xdb7   :  { %v1989_v8 = vmul.f32 0.7978846, %v1977_v3 }
 0xdb8   :  { %5484 = vtanh.f32 %v1988_v10  ;;  %v5473_v40 = vpop.eup %5472 }
 0xdb9   :  { %5486 = vtanh.f32 %v1989_v8  ;;  %v2006_v27 = vadd.f32 1.0, %v5473_v40 }
 0xdbb   :  { %v5475_v47 = vpop.eup %5474  ;;  %v2018_v32 = vmul.f32 %v2006_v27, %v1922_v55 }
 0xdbc   :  { %v5477_v60 = vpop.eup %5476  ;;  %v2007_v57 = vadd.f32 1.0, %v5475_v47 }
 0xdbd   :  { %v2008_v63 = vadd.f32 1.0, %v5477_v60 }
 0xdbe   :  { %v2019_v7 = vmul.f32 %v2007_v57, %v1923_v15 }
 0xdbf   :  { %v5479_v25 = vpop.eup %5478  ;;  %v2020_v11 = vmul.f32 %v2008_v63, %v1924_v44 }
 0xdc0   :  { %v2009_v19 = vadd.f32 1.0, %v5479_v25 }
 0xdc1   :  { %v2030_v0 = vpack.c.bf16 %v2020_v11, %v2018_v32 }
 0xdc2   :  { %v5481_v38 = vpop.eup %5480  ;;  %v2021_v9 = vmul.f32 %v2009_v19, %v1925_v21 }
 0xdc3   :  { %v5483_v54 = vpop.eup %5482  ;;  %v2011_v14 = vadd.f32 1.0, %v5481_v38 }
 0xdc4   :  { %v2031_v58 = vpack.c.bf16 %v2021_v9, %v2019_v7  ;;  %v2010_v49 = vadd.f32 1.0, %v5483_v54 }
 0xdc5   :  { %v5485_v56 = vpop.eup %5484  ;;  %v2023_v26 = vmul.f32 %v2011_v14, %v1927_v42 }
 0xdc6   :  { %v5487_v20 = vpop.eup %5486  ;;  %2200 = vmatprep.mubr.bf16.mxu0 %v2031_v58  ;;  %v1913_v34 = vpop.f32.mrf.mxu1  ;;  %v2012_v46 = vadd.f32 1.0, %v5485_v56  ;;  %v2022_v37 = vmul.f32 %v2010_v49, %v1926_v31 }
 0xdc7   :  { %v1914_v2 = vadd.f32 %v1913_v34, %v6600_v41  ;;  %2201 = vmatmul.mubr.bf16.vlgmr.msra.gmra.mxu0 %v2030_v0  ;;  %v2013_v4 = vadd.f32 1.0, %v5487_v20 }
 0xdc8   :  { %v1915_v39 = vpop.f32.mrf.mxu1  ;;  %v2024_v35 = vmul.f32 %v2012_v46, %v1928_v48 }
 0xdc9   :  { %v1942_v61 = vmul.f32 0.044715, %v1914_v2  ;;  %v1916_v62 = vadd.f32 %v1915_v39, %v6606_v51  ;;  %v2025_v3 = vmul.f32 %v2013_v4, %v1929_v5  ;;  %v1930_v4 = vmul.f32 0.5, %v1914_v2 }
 0xdca   :  { %v1917_v10 = vpop.f32.mrf.mxu1  ;;  %v2032_v23 = vpack.c.bf16 %v2024_v35, %v2022_v37 }
 0xdcb   :  { %v1954_v8 = vmul.f32 %v1942_v61, %v1914_v2  ;;  %v1943_v40 = vmul.f32 0.044715, %v1916_v62  ;;  %v1918_v47 = vadd.f32 %v1917_v10, %v6600_v41  ;;  %v2033_v60 = vpack.c.bf16 %v2025_v3, %v2023_v26 }
 0xdcc   :  { %v1919_v63 = vpop.f32.mrf.mxu1  ;;  %v1931_v46 = vmul.f32 0.5, %v1916_v62  ;;  %v2070_v10 = vsub.s32 7, %v5767_v17 }
 0xdcd   :  { %v1966_v53 = vmul.f32 %v1954_v8, %v1914_v2  ;;  %v1955_v57 = vmul.f32 %v1943_v40, %v1916_v62  ;;  %v1944_v25 = vmul.f32 0.044715, %v1918_v47  ;;  %v1920_v36 = vadd.f32 %v1919_v63, %v6606_v51  ;;  %2208 = vmatprep.mubr.bf16.mxu0 %v2033_v60 }
 0xdce   :  { %v1932_v48 = vmul.f32 0.5, %v1918_v47 }
 0xdcf   :  { %v1967_v44 = vmul.f32 %v1955_v57, %v1916_v62  ;;  %v1956_v27 = vmul.f32 %v1944_v25, %v1918_v47  ;;  %v1945_v15 = vmul.f32 0.044715, %v1920_v36  ;;  %2209 = vmatmul.mubr.bf16.gmra.mxu0 %v2032_v23  ;;  %v1978_v21 = vadd.f32 %v1966_v53, %v1914_v2 }
 0xdd0   :  { %v1933_v42 = vmul.f32 0.5, %v1920_v36 }
 0xdd1   :  { %v1968_v19 = vmul.f32 %v1956_v27, %v1918_v47  ;;  %v1957_v55 = vmul.f32 %v1945_v15, %v1920_v36  ;;  %v1979_v11 = vadd.f32 %v1967_v44, %v1916_v62  ;;  %v1990_v38 = vmul.f32 0.7978846, %v1978_v21 }
 0xdd2   :  { %v2071_v62 = vrot.slane %v6435_v22, %v2070_v10 }
 0xdd3   :  { %v1969_v7 = vmul.f32 %v1957_v55, %v1920_v36  ;;  %v1991_v41 = vmul.f32 0.7978846, %v1979_v11  ;;  %v1980_v9 = vadd.f32 %v1968_v19, %v1918_v47 }
 0xdd5   :  { %v1981_v54 = vadd.f32 %v1969_v7, %v1920_v36  ;;  %5488 = vtanh.f32 %v1991_v41  ;;  %v1992_v32 = vmul.f32 0.7978846, %v1980_v9 }
 0xdd6   :  { %5490 = vtanh.f32 %v1990_v38 }
 0xdd7   :  { %v1993_v58 = vmul.f32 0.7978846, %v1981_v54  ;;  %5492 = vtanh.f32 %v1992_v32 }
 0xdd9   :  { %5494 = vtanh.f32 %v1993_v58 }
 0xde2   :  { %v5489_v51 = vpop.eup %5488 }
 0xde3   :  { %v5491_v56 = vpop.eup %5490  ;;  %v2015_v14 = vadd.f32 1.0, %v5489_v51 }
 0xde4   :  { %v5493_v0 = vpop.eup %5492  ;;  %v2014_v49 = vadd.f32 1.0, %v5491_v56 }
 0xde5   :  { %v2016_v20 = vadd.f32 1.0, %v5493_v0  ;;  %v2027_v31 = vmul.f32 %v2015_v14, %v1931_v46 }
 0xde6   :  { %v5495_v34 = vpop.eup %5494  ;;  %v2026_v61 = vmul.f32 %v2014_v49, %v1930_v4 }
 0xde7   :  { %v2017_v5 = vadd.f32 1.0, %v5495_v34  ;;  %v2028_v39 = vmul.f32 %v2016_v20, %v1932_v48 }
 0xde9   :  { %v2029_v35 = vmul.f32 %v2017_v5, %v1933_v42  ;;  %v2034_v3 = vpack.c.bf16 %v2028_v39, %v2026_v61 }
 0xdeb   :  { %v2035_v26 = vpack.c.bf16 %v2029_v35, %v2027_v31 }
 0xded   :  { %2216 = vmatprep.mubr.bf16.mxu0 %v2035_v26 }
 0xdee   :  { %2217 = vmatmul.mubr.bf16.gmra.mxu0 %v2034_v3 }
 0xdef   :  { %4961 = vmatprep.mubr.msk.bf16.mxu0 %vm5666_vm3, %v5665_v30 }
 0xe87   :  { %v4657_v37 = vpop.f32.mrf.mxu0 }
 0xe89   :  { %v4658_v8 = vpop.f32.mrf.mxu0 }
 0xe8a   :  { %v4659_v2 = vadd.f32 %v4658_v8, %v4657_v37 }
 0xe8b   :  { %v4660_v40 = vpop.f32.mrf.mxu0 }
 0xe8c   :  { %v2203_v47 = vadd.f32 %v4659_v2, %v2071_v62 }
 0xe8d   :  { %v4661_v60 = vpop.f32.mrf.mxu0 }
 0xe8e   :  { %v6655_v63 = vadd.f32 %v2203_v47, %v6440_v29  ;;  %v4662_v23 = vadd.f32 %v4661_v60, %v4660_v40  ;;  %v5290_v47 = vld [vmem:[%s7587_s5 + $0x74] ss:$8 sps:$4 sm:$0xff]   ;;  %v5288_v60 = vld [vmem:[%s7587_s5 + $0x70] ss:$8 sps:$4 sm:$0xff]  }
 0xe8f   :  { %v4663_v53 = vpop.f32.mrf.mxu0  ;;  %2406 = vmatprep.subr.bf16.mxu1 %v5290_v47 }
 0xe90   :  { %v2206_v57 = vadd.f32 %v4662_v23, %v2071_v62  ;;  %v2231_v25 = vsel %vm191_vm2, %v6655_v63, 0.0  ;;  %2407 = vmatpush1.bf16.msra.mxu1 %v5288_v60  ;;  %v5293_v23 = vld [vmem:[%s7587_s5 + $0x64] ss:$8 sps:$4 sm:$0xff]  }
 0xe91   :  { %v4664_v36 = vpop.f32.mrf.mxu0  ;;  %2232 = vadd.xlane.f32.xlu1 %v2231_v25  ;;  %2408 = vmatprep.subr.bf16.mxu1 %v5293_v23 }
 0xe92   :  { %v6660_v44 = vadd.f32 %v2206_v57, %v6445_v6  ;;  %v4665_v22 = vadd.f32 %v4664_v36, %v4663_v53  ;;  %v5291_v53 = vld [vmem:[%s7587_s5 + $0x60] ss:$8 sps:$4 sm:$0xff]   ;;  %v5296_v57 = vld [vmem:[%s7587_s5 + $0x54] ss:$8 sps:$4 sm:$0xff]   ;;  %v5294_v36 = vld [vmem:[%s7587_s5 + $0x50] ss:$8 sps:$4 sm:$0xff]  }
 0xe93   :  { %v4666_v27 = vpop.f32.mrf.mxu0 }
 0xe94   :  { %v2211_v15 = vadd.f32 %v4665_v22, %v2071_v62  ;;  %v2234_v21 = vsel %vm191_vm2, %v6660_v44, 0.0  ;;  %2409 = vmatpush1.bf16.msra.mxu1 %v5291_v53 }
 0xe95   :  { %v4667_v19 = vpop.f32.mrf.mxu0  ;;  %2235 = vadd.xlane.f32.xlu0 %v2234_v21  ;;  %2410 = vmatprep.subr.bf16.mxu1 %v5296_v57  ;;  %v5299_v21 = vld [vmem:[%s7587_s5 + $0x44] ss:$8 sps:$4 sm:$0xff]  }
 0xe96   :  { %v6665_v29 = vadd.f32 %v2211_v15, %v6450_v24  ;;  %v4668_v55 = vadd.f32 %v4667_v19, %v4666_v27  ;;  %v5297_v15 = vld [vmem:[%s7587_s5 + $0x40] ss:$8 sps:$4 sm:$0xff]  }
 0xe98   :  { %v2214_v11 = vadd.f32 %v4668_v55, %v2071_v62  ;;  %v2237_v38 = vsel %vm191_vm2, %v6665_v29, 0.0  ;;  %2411 = vmatpush1.bf16.msra.mxu1 %v5294_v36 }
 0xe99   :  { %2238 = vadd.xlane.f32.xlu1 %v2237_v38  ;;  %2412 = vmatprep.subr.bf16.mxu1 %v5299_v21 }
 0xe9a   :  { %v6670_v6 = vadd.f32 %v2214_v11, %v6455_v28 }
 0xe9c   :  { %v2240_v7 = vsel %vm191_vm2, %v6670_v6, 0.0  ;;  %2413 = vmatpush1.bf16.msra.mxu1 %v5297_v15 }
 0xe9d   :  { %2241 = vadd.xlane.f32.xlu0 %v2240_v7  ;;  %4937 = vmatprep.subr.bf16.mxu1 %v5665_v30 }
 0xeae   :  { %v4669_v41 = vpop.f32.mrf.mxu0 }
 0xeb0   :  { %v4670_v9 = vpop.f32.mrf.mxu0 }
 0xeb1   :  { %v4671_v54 = vadd.f32 %v4670_v9, %v4669_v41 }
 0xeb2   :  { %v4672_v32 = vpop.f32.mrf.mxu0 }
 0xeb3   :  { %v2219_v58 = vadd.f32 %v4671_v54, %v2071_v62 }
 0xeb4   :  { %v4673_v24 = vpop.f32.mrf.mxu0 }
 0xeb5   :  { %v6675_v51 = vadd.f32 %v2219_v58, %v6460_v45  ;;  %v4674_v56 = vadd.f32 %v4673_v24, %v4672_v32 }
 0xeb7   :  { %v2222_v0 = vadd.f32 %v4674_v56, %v2071_v62  ;;  %v2243_v14 = vsel %vm191_vm2, %v6675_v51, 0.0 }
 0xeb8   :  { %2244 = vadd.xlane.f32.xlu1 %v2243_v14 }
 0xeb9   :  { %v6680_v28 = vadd.f32 %v2222_v0, %v6465_v50 }
 0xebb   :  { %v2246_v20 = vsel %vm191_vm2, %v6680_v28, 0.0 }
 0xebc   :  { %2247 = vadd.xlane.f32.xlu0 %v2246_v20 }
 0xf1a   :  { %v2233_v34 = vpop.xlane.xlu1 %2232 }
 0xf1b   :  { %v2249_v48 = vmul.f32 0.015625, %v2233_v34 }
 0xf1d   :  { %v6685_v49 = vsub.f32 %v6655_v63, %v2249_v48 }
 0xf1e   :  { %v2236_v45 = vpop.xlane.xlu0 %2235 }
 0xf1f   :  { %v2250_v46 = vmul.f32 0.015625, %v2236_v45  ;;  %v2261_v42 = vmul.f32 %v6685_v49, %v6685_v49 }
 0xf21   :  { %v6690_v5 = vsub.f32 %v6660_v44, %v2250_v46  ;;  %v2267_v50 = vsel %vm191_vm2, %v2261_v42, 0.0  ;;  %v40_v42 = vld [vmem:[%s7588_s3 + $0x10] sm:$0xff] }
 0xf22   :  { %2268 = vadd.xlane.f32.xlu1 %v2267_v50  ;;  %v2239_v4 = vpop.xlane.xlu1 %2238 }
 0xf23   :  { %v2251_v39 = vmul.f32 0.015625, %v2239_v4  ;;  %v2262_v31 = vmul.f32 %v6690_v5, %v6690_v5  ;;  %v2312_v4 = vrot.slane %v40_v42, %v5770_v18 }
 0xf25   :  { %v6696_v35 = vsub.f32 %v6665_v29, %v2251_v39  ;;  %v2270_v61 = vsel %vm191_vm2, %v2262_v31, 0.0 }
 0xf26   :  { %2271 = vadd.xlane.f32.xlu0 %v2270_v61  ;;  %v2242_v26 = vpop.xlane.xlu0 %2241  ;;  %v2322_v61 = vrot.slane %v40_v42, %v5814_v12 }
 0xf27   :  { %v2252_v3 = vmul.f32 0.015625, %v2242_v26  ;;  %v2263_v37 = vmul.f32 %v6696_v35, %v6696_v35 }
 0xf29   :  { %v6702_v62 = vsub.f32 %v6670_v6, %v2252_v3  ;;  %v2273_v8 = vsel %vm191_vm2, %v2263_v37, 0.0 }
 0xf2a   :  { %2274 = vadd.xlane.f32.xlu1 %v2273_v8 }
 0xf2b   :  { %v2264_v2 = vmul.f32 %v6702_v62, %v6702_v62 }
 0xf2d   :  { %v2276_v40 = vsel %vm191_vm2, %v2264_v2, 0.0 }
 0xf2e   :  { %2277 = vadd.xlane.f32.xlu0 %v2276_v40 }
 0xf41   :  { %v2245_v25 = vpop.xlane.xlu1 %2244 }
 0xf42   :  { %v2253_v22 = vmul.f32 0.015625, %v2245_v25 }
 0xf44   :  { %v6727_v27 = vsub.f32 %v6675_v51, %v2253_v22 }
 0xf45   :  { %v2248_v19 = vpop.xlane.xlu0 %2247 }
 0xf46   :  { %v2254_v55 = vmul.f32 0.015625, %v2248_v19  ;;  %v2265_v11 = vmul.f32 %v6727_v27, %v6727_v27 }
 0xf48   :  { %v2260_v38 = vsub.f32 %v6680_v28, %v2254_v55  ;;  %v2279_v7 = vsel %vm191_vm2, %v2265_v11, 0.0 }
 0xf49   :  { %2280 = vadd.xlane.f32.xlu1 %v2279_v7 }
 0xf4a   :  { %v2266_v41 = vmul.f32 %v2260_v38, %v2260_v38 }
 0xf4c   :  { %v2282_v9 = vsel %vm191_vm2, %v2266_v41, 0.0 }
 0xf4d   :  { %2283 = vadd.xlane.f32.xlu0 %v2282_v9 }
 0xfab   :  { %v2269_v54 = vpop.xlane.xlu1 %2268 }
 0xfac   :  { %v2285_v32 = vmul.f32 0.015625, %v2269_v54 }
 0xfae   :  { %v2291_v58 = vadd.f32 1e-05, %v2285_v32 }
 0xfaf   :  { %v2272_v24 = vpop.xlane.xlu0 %2271 }
 0xfb0   :  { %5496 = vrsqrt.f32 %v2291_v58  ;;  %v2286_v56 = vmul.f32 0.015625, %v2272_v24 }
 0xfb2   :  { %v2292_v0 = vadd.f32 1e-05, %v2286_v56 }
 0xfb3   :  { %v2275_v14 = vpop.xlane.xlu1 %2274 }
 0xfb4   :  { %5498 = vrsqrt.f32 %v2292_v0  ;;  %v2287_v20 = vmul.f32 0.015625, %v2275_v14 }
 0xfb6   :  { %v2293_v34 = vadd.f32 1e-05, %v2287_v20 }
 0xfb7   :  { %v2278_v48 = vpop.xlane.xlu0 %2277 }
 0xfb8   :  { %5500 = vrsqrt.f32 %v2293_v34  ;;  %v2288_v45 = vmul.f32 0.015625, %v2278_v48 }
 0xfba   :  { %v2294_v46 = vadd.f32 1e-05, %v2288_v45 }
 0xfbc   :  { %5502 = vrsqrt.f32 %v2294_v46 }
 0xfbd   :  { %v5497_v50 = vpop.eup %5496 }
 0xfbe   :  { %v2303_v39 = vmul.f32 %v5497_v50, %v6685_v49 }
 0xfc0   :  { %v2313_v26 = vmul.f32 %v2312_v4, %v2303_v39 }
 0xfc1   :  { %v5499_v31 = vpop.eup %5498 }
 0xfc2   :  { %v2304_v3 = vmul.f32 %v5499_v31, %v6690_v5  ;;  %v2323_v2 = vadd.f32 %v2322_v61, %v2313_v26 }
 0xfc4   :  { %v2314_v37 = vmul.f32 %v2312_v4, %v2304_v3 }
 0xfc5   :  { %v5501_v8 = vpop.eup %5500 }
 0xfc6   :  { %v2324_v40 = vadd.f32 %v2322_v61, %v2314_v37  ;;  %v2305_v47 = vmul.f32 %v5501_v8, %v6696_v35 }
 0xfc8   :  { %v2329_v60 = vpack.c.bf16 %v2324_v40, %v2323_v2  ;;  %v2315_v53 = vmul.f32 %v2312_v4, %v2305_v47 }
 0xfc9   :  { %v5503_v23 = vpop.eup %5502 }
 0xfca   :  { %4469 = vmatmul.mubr.msk.bf16.vlgmr.msra.gmra.mxu1 %vm191_vm2, %v2329_v60  ;;  %v2306_v18 = vmul.f32 %v5503_v23, %v6702_v62  ;;  %v2325_v12 = vadd.f32 %v2322_v61, %v2315_v53 }
 0xfcb   :  { %2440 = vmatprep.mubr.bf16.mxu1 %v5663_v1 }
 0xfcc   :  { %v2316_v49 = vmul.f32 %v2312_v4, %v2306_v18 }
 0xfce   :  { %v2326_v57 = vadd.f32 %v2322_v61, %v2316_v49 }
 0xfd0   :  { %v2330_v25 = vpack.c.bf16 %v2326_v57, %v2325_v12 }
 0xfd2   :  { %4470 = vmatmul.mubr.msk.bf16.gmra.mxu1 %vm191_vm2, %v2330_v25  ;;  %v2281_v5 = vpop.xlane.xlu1 %2280 }
 0xfd3   :  { %v2289_v36 = vmul.f32 0.015625, %v2281_v5  ;;  %2450 = vmatprep.mubr.bf16.mxu1 %v5663_v1 }
 0xfd5   :  { %v2295_v35 = vadd.f32 1e-05, %v2289_v36 }
 0xfd6   :  { %v2284_v22 = vpop.xlane.xlu0 %2283 }
 0xfd7   :  { %5504 = vrsqrt.f32 %v2295_v35  ;;  %v2290_v15 = vmul.f32 0.015625, %v2284_v22 }
 0xfd9   :  { %v2296_v21 = vadd.f32 1e-05, %v2290_v15 }
 0xfdb   :  { %5506 = vrsqrt.f32 %v2296_v21 }
 0xfe4   :  { %v5505_v62 = vpop.eup %5504 }
 0xfe5   :  { %v2307_v19 = vmul.f32 %v5505_v62, %v6727_v27  ;;  %v2344_v27 = vrot.slane %v40_v42, %v5817_v13  ;;  %v41_v42 = vld [vmem:[%s7588_s3 + $0x18] sm:$0xff] }
 0xfe6   :  { %v2348_v3 = vrot.slane %v41_v42, %v5817_v13 }
 0xfe7   :  { %v2317_v7 = vmul.f32 %v2312_v4, %v2307_v19 }
 0xfe8   :  { %v5507_v55 = vpop.eup %5506 }
 0xfe9   :  { %v2308_v11 = vmul.f32 %v5507_v55, %v2260_v38  ;;  %v2327_v9 = vadd.f32 %v2322_v61, %v2317_v7 }
 0xfeb   :  { %v2318_v41 = vmul.f32 %v2312_v4, %v2308_v11 }
 0xfed   :  { %v2328_v54 = vadd.f32 %v2322_v61, %v2318_v41 }
 0xfef   :  { %v2331_v32 = vpack.c.bf16 %v2328_v54, %v2327_v9 }
 0xff1   :  { %4471 = vmatmul.mubr.msk.bf16.gmra.mxu1 %vm191_vm2, %v2331_v32 }
 0xff2   :  { %4943 = vmatprep.mubr.msk.bf16.mxu1 %vm5666_vm3, %v5665_v30 }
0x108a   :  { %v2432_v58 = vpop.f32.mrf.mxu1 }
0x108b   :  { %v2433_v50 = vadd.f32 %v2432_v58, %v2344_v27 }
0x108c   :  { %v2434_v24 = vpop.f32.mrf.mxu1 }
0x108d   :  { %v2435_v12 = vadd.f32 %v2434_v24, %v2348_v3 }
0x108e   :  { %v2436_v56 = vpop.f32.mrf.mxu1 }
0x108f   :  { %v2437_v45 = vadd.f32 %v2436_v56, %v2344_v27 }
0x1090   :  { %v2438_v0 = vpop.f32.mrf.mxu1 }
0x1091   :  { %v6763_v4 = vpack.c.bf16 %v2437_v45, %v2433_v50  ;;  %v2439_v13 = vadd.f32 %v2438_v0, %v2348_v3 }
0x1092   :  { %v2442_v14 = vpop.f32.mrf.mxu1 }
0x1093   :  { %v2443_v38 = vadd.f32 %v2442_v14, %v2344_v27  ;;  %v6789_v57 = vpack.c.bf16 %v2439_v13, %v2435_v12 }
0x1094   :  { %v2444_v20 = vpop.f32.mrf.mxu1 }
0x1095   :  { %v2445_v53 = vadd.f32 %v2444_v20, %v2348_v3 }
0x1096   :  { %v2446_v34 = vpop.f32.mrf.mxu1 }
0x1097   :  { %v2447_v48 = vadd.f32 %v2446_v34, %v2344_v27 }
0x1098   :  { %v2448_v39 = vpop.f32.mrf.mxu1 }
0x1099   :  { %v6759_v46 = vpack.c.bf16 %v2447_v48, %v2443_v38  ;;  %v2449_v23 = vadd.f32 %v2448_v39, %v2348_v3 }
0x109b   :  { %2472 = vrot.lane.b32.xlu0 %v6759_v46, %s5664_s0  ;;  %v6781_v49 = vpack.c.bf16 %v2449_v23, %v2445_v53  ;;  %v6905_v23 = vld [vmem:[%s7589_s1 + $0x8] sm:$0xff] }
0x109f   :  { %2704 = vrot.lane.b32.xlu0 %v6763_v4, %s5667_s11 }
0x10b1   :  { %v2452_v31 = vpop.f32.mrf.mxu1 }
0x10b2   :  { %v2453_v37 = vadd.f32 %v2452_v31, %v2344_v27 }
0x10b3   :  { %v2454_v61 = vpop.f32.mrf.mxu1 }
0x10b4   :  { %v2455_v40 = vadd.f32 %v2454_v61, %v2348_v3 }
0x10b5   :  { %v2456_v26 = vpop.f32.mrf.mxu1 }
0x10b6   :  { %v2457_v8 = vadd.f32 %v2456_v26, %v2344_v27 }
0x10b7   :  { %v2458_v2 = vpop.f32.mrf.mxu1 }
0x10b8   :  { %v6771_v47 = vpack.c.bf16 %v2457_v8, %v2453_v37  ;;  %v2459_v60 = vadd.f32 %v2458_v2, %v2348_v3  ;;  %v6895_v37 = vld [vmem:[%s7589_s1] sm:$0xff] }
0x10ba   :  { %v6773_v18 = vpack.c.bf16 %v2459_v60, %v2455_v40  ;;  %2954 = vrot.lane.b32.xlu0 %v6771_v47, %s5671_s15  ;;  %2474 = vrot.lane.b32.xlu1 %v6771_v47, %s5664_s0 }
0x10bc   :  { %4956 = vmatpush3.bf16.msra.mxu0 %v6773_v18 }
0x10bd   :  { %4957 = vmatprep.subr.bf16.mxu0 %v5665_v30 }
0x10be   :  { %2952 = vrot.lane.b32.xlu0 %v6759_v46, %s5671_s15  ;;  %2470 = vrot.lane.b32.xlu1 %v6763_v4, %s5664_s0 }
0x10c0   :  { %4958 = vmatpush3.bf16.msra.mxu0 %v6781_v49 }
0x10c1   :  { %4959 = vmatprep.subr.bf16.mxu0 %v5665_v30 }
0x10c2   :  { %2950 = vrot.lane.b32.xlu0 %v6763_v4, %s5671_s15  ;;  %2708 = vrot.lane.b32.xlu1 %v6771_v47, %s5667_s11 }
0x10c4   :  { %4960 = vmatpush3.bf16.msra.mxu0 %v6789_v57 }
0x10c5   :  { %4991 = vmatprep.subr.bf16.mxu0 %v5665_v30 }
0x10c6   :  { %3197 = vrot.lane.b32.xlu0 %v6771_v47, %s5672_s16  ;;  %2706 = vrot.lane.b32.xlu1 %v6759_v46, %s5667_s11 }
0x10ca   :  { %3195 = vrot.lane.b32.xlu0 %v6759_v46, %s5672_s16  ;;  %2698 = vrot.lane.b32.xlu1 %v6763_v4, %s5668_s12 }
0x10ce   :  { %3193 = vrot.lane.b32.xlu0 %v6763_v4, %s5672_s16  ;;  %2700 = vrot.lane.b32.xlu1 %v6759_v46, %s5668_s12 }
0x10d2   :  { %3189 = vrot.lane.b32.xlu0 %v6759_v46, %s5670_s14  ;;  %2702 = vrot.lane.b32.xlu1 %v6771_v47, %s5668_s12 }
0x10d6   :  { %2869 = vrot.lane.b32.xlu0 %v6789_v57, %s5668_s12  ;;  %2944 = vrot.lane.b32.xlu1 %v6763_v4, %s5669_s13 }
0x10da   :  { %2873 = vrot.lane.b32.xlu0 %v6773_v18, %s5668_s12  ;;  %2946 = vrot.lane.b32.xlu1 %v6759_v46, %s5669_s13 }
0x10de   :  { %2948 = vrot.lane.b32.xlu1 %v6771_v47, %s5669_s13 }
0x10e2   :  { %3187 = vrot.lane.b32.xlu1 %v6763_v4, %s5670_s14 }
0x10e6   :  { %3191 = vrot.lane.b32.xlu1 %v6771_v47, %s5670_s14 }
0x10ea   :  { %2871 = vrot.lane.b32.xlu1 %v6781_v49, %s5668_s12 }
0x110d   :  { %v2473_v36 = vpop.permute.xlu0 %2472 }
0x110e   :  { %v2489_v35 = vsel %vm535_vm4, %v2473_v36, 0  ;;  %v6915_v36 = vld [vmem:[%s7589_s1 + $0x10] sm:$0xff] }
0x1111   :  { %v2705_v11 = vpop.permute.xlu0 %2704 }
0x1112   :  { %v2720_v7 = vsel %vm535_vm4, %v2705_v11, 0 }
0x112c   :  { %v2475_v25 = vpop.permute.xlu1 %2474  ;;  %v2955_v41 = vpop.permute.xlu0 %2954 }
0x112d   :  { %v2492_v5 = vsel %vm535_vm4, %v2475_v25, 0  ;;  %v2972_v54 = vsel %vm535_vm4, %v2955_v41, 0 }
0x112e   :  { %4938 = vmatpush3.bf16.xpose.msra.mxu1 %v2492_v5 }
0x112f   :  { %4939 = vmatprep.subr.bf16.mxu1 %v5665_v30 }
0x1130   :  { %v2471_v22 = vpop.permute.xlu1 %2470  ;;  %v2953_v32 = vpop.permute.xlu0 %2952 }
0x1131   :  { %v2486_v15 = vsel %vm535_vm4, %v2471_v22, 0  ;;  %v2969_v24 = vsel %vm535_vm4, %v2953_v32, 0 }
0x1134   :  { %v2709_v21 = vpop.permute.xlu1 %2708  ;;  %v2951_v56 = vpop.permute.xlu0 %2950 }
0x1135   :  { %v2726_v62 = vsel %vm535_vm4, %v2709_v21, 0  ;;  %v2966_v14 = vsel %vm535_vm4, %v2951_v56, 0 }
0x1136   :  { %4940 = vmatpush3.bf16.xpose.msra.mxu1 %v2489_v35 }
0x1137   :  { %4941 = vmatprep.subr.bf16.mxu1 %v5665_v30 }
0x1138   :  { %v2707_v19 = vpop.permute.xlu1 %2706  ;;  %v3198_v20 = vpop.permute.xlu0 %3197 }
0x1139   :  { %v2723_v55 = vsel %vm535_vm4, %v2707_v19, 0  ;;  %v3215_v34 = vsel %vm535_vm4, %v3198_v20, 0  ;;  %v6925_v19 = vld [vmem:[%s7589_s1 + $0x18] sm:$0xff] }
0x113c   :  { %v2699_v9 = vpop.permute.xlu1 %2698  ;;  %v3196_v38 = vpop.permute.xlu0 %3195 }
0x113d   :  { %v3212_v45 = vsel %vm535_vm4, %v3196_v38, 0 }
0x113e   :  { %4942 = vmatpush3.bf16.xpose.msra.mxu1 %v2486_v15 }
0x113f   :  { %4973 = vmatprep.subr.bf16.mxu1 %v5665_v30 }
0x1140   :  { %v2701_v58 = vpop.permute.xlu1 %2700 }
0x1144   :  { %v2703_v0 = vpop.permute.xlu1 %2702 }
0x1145   :  { %4944 = vmatmul.mubr.msk.bf16.vlgmr.msra.gmra.mxu1 %vm535_vm4, %v6763_v4 }
0x1146   :  { %4974 = vmatpush3.bf16.xpose.msra.mxu1 %v2726_v62  ;;  %4947 = vmatprep.mubr.msk.bf16.mxu1 %vm5666_vm3, %v5665_v30 }
0x1147   :  { %4975 = vmatprep.subr.bf16.mxu1 %v5665_v30 }
0x1148   :  { %v2945_v27 = vpop.permute.xlu1 %2944 }
0x114c   :  { %v2947_v48 = vpop.permute.xlu1 %2946 }
0x114d   :  { %4948 = vmatmul.mubr.msk.bf16.gmra.mxu1 %vm535_vm4, %v6759_v46  ;;  %v3194_v46 = vpop.permute.xlu0 %3193 }
0x114e   :  { %4976 = vmatpush3.bf16.xpose.msra.mxu1 %v2723_v55  ;;  %4951 = vmatprep.mubr.msk.bf16.mxu1 %vm5666_vm3, %v5665_v30  ;;  %v3209_v4 = vsel %vm535_vm4, %v3194_v46, 0 }
0x114f   :  { %4977 = vmatprep.subr.bf16.mxu1 %v5665_v30 }
0x1150   :  { %v2949_v50 = vpop.permute.xlu1 %2948 }
0x1151   :  { %v3190_v31 = vpop.permute.xlu0 %3189 }
0x1154   :  { %v3188_v39 = vpop.permute.xlu1 %3187 }
0x1155   :  { %4952 = vmatmul.mubr.msk.bf16.gmra.mxu1 %vm535_vm4, %v6771_v47 }
0x1156   :  { %4978 = vmatpush3.bf16.xpose.msra.mxu1 %v2720_v7  ;;  %4979 = vmatprep.mubr.msk.bf16.mxu1 %vm5666_vm3, %v5665_v30 }
0x1157   :  { %5009 = vmatprep.subr.bf16.mxu1 %v5665_v30 }
0x1158   :  { %v3192_v42 = vpop.permute.xlu1 %3191 }
0x115d   :  { %4980 = vmatmul.mubr.msk.bf16.vlgmr.msra.gmra.mxu1 %vm535_vm4, %v2699_v9 }
0x115e   :  { %5010 = vmatpush3.bf16.xpose.msra.mxu1 %v2972_v54  ;;  %4983 = vmatprep.mubr.msk.bf16.mxu1 %vm5666_vm3, %v5665_v30  ;;  %v6935_v54 = vld [vmem:[%s7589_s1 + $0x20] sm:$0xff] }
0x115f   :  { %5011 = vmatprep.subr.bf16.mxu1 %v5665_v30 }
0x1165   :  { %4984 = vmatmul.mubr.msk.bf16.gmra.mxu1 %vm535_vm4, %v2701_v58 }
0x1166   :  { %5012 = vmatpush3.bf16.xpose.msra.mxu1 %v2969_v24  ;;  %4987 = vmatprep.mubr.msk.bf16.mxu1 %vm5666_vm3, %v5665_v30 }
0x1167   :  { %5013 = vmatprep.subr.bf16.mxu1 %v5665_v30 }
0x116d   :  { %4988 = vmatmul.mubr.msk.bf16.gmra.mxu1 %vm535_vm4, %v2703_v0 }
0x116e   :  { %5014 = vmatpush3.bf16.xpose.msra.mxu1 %v2966_v14  ;;  %5015 = vmatprep.mubr.msk.bf16.mxu1 %vm5666_vm3, %v5665_v30  ;;  %v6945_v14 = vld [vmem:[%s7589_s1 + $0x28] sm:$0xff] }
0x116f   :  { %5045 = vmatprep.subr.bf16.mxu1 %v5665_v30 }
0x1175   :  { %5016 = vmatmul.mubr.msk.bf16.vlgmr.msra.gmra.mxu1 %vm535_vm4, %v2945_v27 }
0x1176   :  { %5046 = vmatpush3.bf16.xpose.msra.mxu1 %v3215_v34  ;;  %5019 = vmatprep.mubr.msk.bf16.mxu1 %vm5666_vm3, %v5665_v30 }
0x1177   :  { %5047 = vmatprep.subr.bf16.mxu1 %v5665_v30 }
0x117d   :  { %5020 = vmatmul.mubr.msk.bf16.gmra.mxu1 %vm535_vm4, %v2947_v48 }
0x117e   :  { %5048 = vmatpush3.bf16.xpose.msra.mxu1 %v3212_v45  ;;  %5023 = vmatprep.mubr.msk.bf16.mxu1 %vm5666_vm3, %v5665_v30 }
0x117f   :  { %5049 = vmatprep.subr.bf16.mxu1 %v5665_v30 }
0x1185   :  { %5024 = vmatmul.mubr.msk.bf16.gmra.mxu1 %vm535_vm4, %v2949_v50 }
0x1186   :  { %5050 = vmatpush3.bf16.xpose.msra.mxu1 %v3209_v4  ;;  %5051 = vmatprep.mubr.msk.bf16.mxu1 %vm5666_vm3, %v5665_v30 }
0x1187   :  { %5081 = vmatprep.subr.bf16.mxu1 %v5665_v30 }
0x118d   :  { %5052 = vmatmul.mubr.msk.bf16.vlgmr.msra.gmra.mxu1 %vm535_vm4, %v3188_v39 }
0x118e   :  { %5055 = vmatprep.mubr.msk.bf16.mxu1 %vm5666_vm3, %v5665_v30 }
0x1195   :  { %5056 = vmatmul.mubr.msk.bf16.gmra.mxu1 %vm535_vm4, %v3190_v31 }
0x1196   :  { %5059 = vmatprep.mubr.msk.bf16.mxu1 %vm5666_vm3, %v5665_v30 }
0x119d   :  { %5060 = vmatmul.mubr.msk.bf16.gmra.mxu1 %vm535_vm4, %v3192_v42 }
0x119e   :  { %5089 = vmatprep.mubr.msk.bf16.mxu1 %vm5666_vm3, %v5665_v30 }
0x1205   :  { %v2528_v61 = vpop.f32.mrf.mxu1 }
0x1206   :  { %v2551_v26 = vmul.f32 0.25, %v2528_v61 }
0x1207   :  { %v4945_v3 = vpop.f32.mrf.mxu1 }
0x1208   :  { %v6898_v8 = vadd.f32 %v6895_v37, %v2551_v26 }
0x1209   :  { %v2531_v2 = vpop.f32.mrf.mxu1 }
0x120a   :  { %v2552_v40 = vmul.f32 0.25, %v2531_v2  ;;  %v2563_v47 = vsel %vm623_vm5, %v6898_v8, -inf }
0x120b   :  { %2564 = vmax.xlane.f32.xlu0 %v2563_v47  ;;  %v4946_v60 = vpop.f32.mrf.mxu1 }
0x120c   :  { %v6908_v53 = vadd.f32 %v6905_v23, %v2552_v40 }
0x120d   :  { %v2536_v13 = vpop.f32.mrf.mxu1 }
0x120e   :  { %v2553_v12 = vmul.f32 0.25, %v2536_v13  ;;  %v2566_v25 = vsel %vm623_vm5, %v6908_v53, -inf }
0x120f   :  { %2567 = vmax.xlane.f32.xlu1 %v2566_v25  ;;  %v4949_v5 = vpop.f32.mrf.mxu1 }
0x1210   :  { %v6918_v35 = vadd.f32 %v6915_v36, %v2553_v12 }
0x1211   :  { %v2539_v22 = vpop.f32.mrf.mxu1 }
0x1212   :  { %v2554_v15 = vmul.f32 0.25, %v2539_v22  ;;  %v2569_v21 = vsel %vm623_vm5, %v6918_v35, -inf }
0x1213   :  { %2570 = vmax.xlane.f32.xlu0 %v2569_v21  ;;  %v4950_v62 = vpop.f32.mrf.mxu1 }
0x1214   :  { %v6928_v55 = vadd.f32 %v6925_v19, %v2554_v15 }
0x1215   :  { %v2544_v11 = vpop.f32.mrf.mxu1 }
0x1216   :  { %v2555_v7 = vmul.f32 0.25, %v2544_v11  ;;  %v2572_v41 = vsel %vm623_vm5, %v6928_v55, -inf }
0x1217   :  { %2573 = vmax.xlane.f32.xlu0 %v2572_v41  ;;  %v4953_v9 = vpop.f32.mrf.mxu1 }
0x1218   :  { %v6938_v32 = vadd.f32 %v6935_v54, %v2555_v7 }
0x1219   :  { %v2547_v58 = vpop.f32.mrf.mxu1 }
0x121a   :  { %v2556_v24 = vmul.f32 0.25, %v2547_v58  ;;  %v2575_v56 = vsel %vm623_vm5, %v6938_v32, -inf }
0x121b   :  { %2576 = vmax.xlane.f32.xlu0 %v2575_v56  ;;  %v4954_v0 = vpop.f32.mrf.mxu1 }
0x121c   :  { %v6948_v20 = vadd.f32 %v6945_v14, %v2556_v24 }
0x121d   :  { %v2762_v27 = vpop.f32.mrf.mxu1 }
0x121e   :  { %v2785_v34 = vmul.f32 0.25, %v2762_v27  ;;  %v2578_v38 = vsel %vm623_vm5, %v6948_v20, -inf }
0x121f   :  { %2579 = vmax.xlane.f32.xlu1 %v2578_v38  ;;  %v4981_v48 = vpop.f32.mrf.mxu1 }
0x1220   :  { %v6953_v45 = vadd.f32 %v6895_v37, %v2785_v34 }
0x1221   :  { %v2765_v46 = vpop.f32.mrf.mxu1 }
0x1222   :  { %v2786_v50 = vmul.f32 0.25, %v2765_v46  ;;  %v2797_v4 = vsel %vm623_vm5, %v6953_v45, -inf }
0x1223   :  { %2798 = vmax.xlane.f32.xlu0 %v2797_v4  ;;  %v4982_v39 = vpop.f32.mrf.mxu1 }
0x1224   :  { %v6958_v31 = vadd.f32 %v6905_v23, %v2786_v50 }
0x1225   :  { %v2770_v42 = vpop.f32.mrf.mxu1 }
0x1226   :  { %v2787_v61 = vmul.f32 0.25, %v2770_v42  ;;  %v2800_v26 = vsel %vm623_vm5, %v6958_v31, -inf }
0x1227   :  { %2801 = vmax.xlane.f32.xlu1 %v2800_v26  ;;  %v4985_v3 = vpop.f32.mrf.mxu1 }
0x1228   :  { %v6963_v2 = vadd.f32 %v6915_v36, %v2787_v61 }
0x1229   :  { %v2773_v40 = vpop.f32.mrf.mxu1 }
0x122a   :  { %v2788_v47 = vmul.f32 0.25, %v2773_v40  ;;  %v2803_v60 = vsel %vm623_vm5, %v6963_v2, -inf }
0x122b   :  { %2804 = vmax.xlane.f32.xlu0 %v2803_v60  ;;  %v4986_v13 = vpop.f32.mrf.mxu1 }
0x122c   :  { %v6968_v12 = vadd.f32 %v6925_v19, %v2788_v47 }
0x122d   :  { %v2778_v25 = vpop.f32.mrf.mxu1 }
0x122e   :  { %v2789_v5 = vmul.f32 0.25, %v2778_v25  ;;  %v2806_v22 = vsel %vm623_vm5, %v6968_v12, -inf }
0x122f   :  { %2807 = vmax.xlane.f32.xlu1 %v2806_v22  ;;  %v4989_v15 = vpop.f32.mrf.mxu1 }
0x1230   :  { %v6973_v21 = vadd.f32 %v6935_v54, %v2789_v5 }
0x1231   :  { %v2781_v62 = vpop.f32.mrf.mxu1 }
0x1232   :  { %v2790_v11 = vmul.f32 0.25, %v2781_v62  ;;  %v2809_v7 = vsel %vm623_vm5, %v6973_v21, -inf }
0x1233   :  { %2810 = vmax.xlane.f32.xlu0 %v2809_v7  ;;  %v4990_v41 = vpop.f32.mrf.mxu1 }
0x1234   :  { %v6978_v9 = vadd.f32 %v6945_v14, %v2790_v11 }
0x1235   :  { %v3008_v58 = vpop.f32.mrf.mxu1 }
0x1236   :  { %v3031_v24 = vmul.f32 0.25, %v3008_v58  ;;  %v2812_v56 = vsel %vm623_vm5, %v6978_v9, -inf }
0x1237   :  { %2813 = vmax.xlane.f32.xlu1 %v2812_v56  ;;  %v5017_v0 = vpop.f32.mrf.mxu1 }
0x1238   :  { %v6983_v27 = vadd.f32 %v6895_v37, %v3031_v24 }
0x1239   :  { %v3011_v34 = vpop.f32.mrf.mxu1 }
0x123a   :  { %v3032_v38 = vmul.f32 0.25, %v3011_v34  ;;  %v3043_v48 = vsel %vm623_vm5, %v6983_v27, -inf }
0x123b   :  { %3044 = vmax.xlane.f32.xlu0 %v3043_v48  ;;  %v5018_v46 = vpop.f32.mrf.mxu1 }
0x123c   :  { %v6988_v50 = vadd.f32 %v6905_v23, %v3032_v38 }
0x123d   :  { %v3016_v4 = vpop.f32.mrf.mxu1 }
0x123e   :  { %v3033_v39 = vmul.f32 0.25, %v3016_v4  ;;  %v3046_v42 = vsel %vm623_vm5, %v6988_v50, -inf }
0x123f   :  { %3047 = vmax.xlane.f32.xlu1 %v3046_v42  ;;  %v5021_v61 = vpop.f32.mrf.mxu1 }
0x1240   :  { %v6993_v26 = vadd.f32 %v6915_v36, %v3033_v39 }
0x1241   :  { %v3019_v3 = vpop.f32.mrf.mxu1 }
0x1242   :  { %v3034_v40 = vmul.f32 0.25, %v3019_v3  ;;  %v3049_v47 = vsel %vm623_vm5, %v6993_v26, -inf }
0x1243   :  { %3050 = vmax.xlane.f32.xlu0 %v3049_v47  ;;  %v5022_v60 = vpop.f32.mrf.mxu1 }
0x1244   :  { %v6998_v13 = vadd.f32 %v6925_v19, %v3034_v40 }
0x1245   :  { %v3024_v25 = vpop.f32.mrf.mxu1 }
0x1246   :  { %v3035_v5 = vmul.f32 0.25, %v3024_v25  ;;  %v3052_v22 = vsel %vm623_vm5, %v6998_v13, -inf }
0x1247   :  { %3053 = vmax.xlane.f32.xlu1 %v3052_v22  ;;  %v5025_v15 = vpop.f32.mrf.mxu1 }
0x1248   :  { %v7003_v62 = vadd.f32 %v6935_v54, %v3035_v5 }
0x1249   :  { %v3027_v11 = vpop.f32.mrf.mxu1 }
0x124a   :  { %v3036_v7 = vmul.f32 0.25, %v3027_v11  ;;  %v3055_v41 = vsel %vm623_vm5, %v7003_v62, -inf }
0x124b   :  { %3056 = vmax.xlane.f32.xlu0 %v3055_v41  ;;  %v5026_v58 = vpop.f32.mrf.mxu1 }
0x124c   :  { %v7008_v24 = vadd.f32 %v6945_v14, %v3036_v7 }
0x124d   :  { %v3251_v56 = vpop.f32.mrf.mxu1 }
0x124e   :  { %v3274_v0 = vmul.f32 0.25, %v3251_v56  ;;  %v3058_v34 = vsel %vm623_vm5, %v7008_v24, -inf }
0x124f   :  { %3059 = vmax.xlane.f32.xlu1 %v3058_v34  ;;  %v5053_v38 = vpop.f32.mrf.mxu1 }
0x1250   :  { %v7013_v48 = vadd.f32 %v6895_v37, %v3274_v0 }
0x1251   :  { %v3254_v46 = vpop.f32.mrf.mxu1 }
0x1252   :  { %v3275_v4 = vmul.f32 0.25, %v3254_v46  ;;  %v3286_v39 = vsel %vm623_vm5, %v7013_v48, -inf }
0x1253   :  { %3287 = vmax.xlane.f32.xlu0 %v3286_v39  ;;  %v5054_v42 = vpop.f32.mrf.mxu1 }
0x1254   :  { %v7018_v61 = vadd.f32 %v6905_v23, %v3275_v4  ;;  %v7042_v4 = vpop.permute.xlu0 %2869 }
0x1255   :  { %v3259_v3 = vpop.f32.mrf.mxu1 }
0x1256   :  { %v3276_v40 = vmul.f32 0.25, %v3259_v3  ;;  %v3289_v47 = vsel %vm623_vm5, %v7018_v61, -inf }
0x1257   :  { %3290 = vmax.xlane.f32.xlu1 %v3289_v47  ;;  %v5057_v60 = vpop.f32.mrf.mxu1 }
0x1258   :  { %v7023_v37 = vadd.f32 %v6915_v36, %v3276_v40  ;;  %v7044_v39 = vpop.permute.xlu0 %2873 }
0x1259   :  { %v3262_v25 = vpop.f32.mrf.mxu1 }
0x125a   :  { %v3277_v5 = vmul.f32 0.25, %v3262_v25  ;;  %v3292_v22 = vsel %vm623_vm5, %v7023_v37, -inf }
0x125b   :  { %3293 = vmax.xlane.f32.xlu0 %v3292_v22  ;;  %v5058_v15 = vpop.f32.mrf.mxu1 }
0x125c   :  { %v7028_v23 = vadd.f32 %v6925_v19, %v3277_v5 }
0x125d   :  { %v3267_v11 = vpop.f32.mrf.mxu1 }
0x125e   :  { %v3278_v7 = vmul.f32 0.25, %v3267_v11  ;;  %v3295_v41 = vsel %vm623_vm5, %v7028_v23, -inf }
0x125f   :  { %3296 = vmax.xlane.f32.xlu1 %v3295_v41  ;;  %v5061_v58 = vpop.f32.mrf.mxu1 }
0x1260   :  { %v7033_v36 = vadd.f32 %v6935_v54, %v3278_v7  ;;  %v7046_v54 = vpop.permute.xlu1 %2871 }
0x1261   :  { %v3270_v56 = vpop.f32.mrf.mxu1 }
0x1262   :  { %v3279_v0 = vmul.f32 0.25, %v3270_v56  ;;  %v3298_v34 = vsel %vm623_vm5, %v7033_v36, -inf }
0x1263   :  { %3299 = vmax.xlane.f32.xlu0 %v3298_v34  ;;  %v5062_v38 = vpop.f32.mrf.mxu1 }
0x1264   :  { %v7038_v19 = vadd.f32 %v6945_v14, %v3279_v0 }
0x1266   :  { %v3301_v46 = vsel %vm623_vm5, %v7038_v19, -inf }
0x1267   :  { %3302 = vmax.xlane.f32.xlu1 %v3301_v46 }
0x1294   :  { %v2565_v42 = vpop.xlane.xlu0 %2564 }
0x1295   :  { %v2581_v3 = vsub.f32 %v6898_v8, %v2565_v42 }
0x1297   :  { %v2587_v40 = vmul.f32 1.442695, %v2581_v3 }
0x1298   :  { %v2568_v47 = vpop.xlane.xlu1 %2567 }
0x1299   :  { %5508 = vpow2.f32 %v2587_v40  ;;  %v2582_v60 = vsub.f32 %v6908_v53, %v2568_v47 }
0x129b   :  { %v2589_v14 = vmul.f32 1.442695, %v2582_v60 }
0x129c   :  { %v2571_v8 = vpop.xlane.xlu0 %2570 }
0x129d   :  { %5510 = vpow2.f32 %v2589_v14  ;;  %v2583_v11 = vsub.f32 %v6918_v35, %v2571_v8 }
0x129f   :  { %v2591_v56 = vmul.f32 1.442695, %v2583_v11 }
0x12a0   :  { %v2574_v53 = vpop.xlane.xlu0 %2573 }
0x12a1   :  { %v2584_v58 = vsub.f32 %v6928_v55, %v2574_v53  ;;  %5512 = vpow2.f32 %v2591_v56 }
0x12a3   :  { %v2593_v46 = vmul.f32 1.442695, %v2584_v58 }
0x12a4   :  { %v2577_v7 = vpop.xlane.xlu0 %2576 }
0x12a5   :  { %v2585_v0 = vsub.f32 %v6938_v32, %v2577_v7  ;;  %5514 = vpow2.f32 %v2593_v46 }
0x12a6   :  { %v7050_v25 = vpop.eup %5508 }
0x12a7   :  { %v2599_v5 = vsel %vm623_vm5, %v7050_v25, 0.0  ;;  %v2595_v3 = vmul.f32 1.442695, %v2585_v0 }
0x12a8   :  { %2600 = vadd.xlane.f32.xlu0 %v2599_v5  ;;  %v2580_v41 = vpop.xlane.xlu1 %2579 }
0x12a9   :  { %v2586_v42 = vsub.f32 %v6948_v20, %v2580_v41  ;;  %5516 = vpow2.f32 %v2595_v3 }
0x12aa   :  { %v7054_v22 = vpop.eup %5510 }
0x12ab   :  { %v2602_v15 = vsel %vm623_vm5, %v7054_v22, 0.0  ;;  %v2597_v35 = vmul.f32 1.442695, %v2586_v42 }
0x12ac   :  { %2603 = vadd.xlane.f32.xlu1 %v2602_v15  ;;  %v2799_v34 = vpop.xlane.xlu0 %2798 }
0x12ad   :  { %v2815_v40 = vsub.f32 %v6953_v45, %v2799_v34  ;;  %5518 = vpow2.f32 %v2597_v35 }
0x12af   :  { %v2821_v55 = vmul.f32 1.442695, %v2815_v40 }
0x12b0   :  { %v2802_v38 = vpop.xlane.xlu1 %2801 }
0x12b1   :  { %v2816_v14 = vsub.f32 %v6958_v31, %v2802_v38  ;;  %5520 = vpow2.f32 %v2821_v55 }
0x12b3   :  { %v2823_v8 = vmul.f32 1.442695, %v2816_v14 }
0x12b4   :  { %v2805_v47 = vpop.xlane.xlu0 %2804 }
0x12b5   :  { %v2817_v5 = vsub.f32 %v6963_v2, %v2805_v47  ;;  %5522 = vpow2.f32 %v2823_v8  ;;  %v7073_v2 = vpop.eup %5512 }
0x12b6   :  { %v7075_v34 = vpop.eup %5514  ;;  %v2605_v38 = vsel %vm623_vm5, %v7073_v2, 0.0 }
0x12b7   :  { %v2825_v53 = vmul.f32 1.442695, %v2817_v5  ;;  %v7080_v46 = vpop.eup %5516 }
0x12b8   :  { %v2808_v60 = vpop.xlane.xlu1 %2807 }
0x12b9   :  { %v2818_v20 = vsub.f32 %v6968_v12, %v2808_v60  ;;  %5524 = vpow2.f32 %v2825_v53 }
0x12ba   :  { %v7084_v42 = vpop.eup %5518 }
0x12bb   :  { %v2827_v7 = vmul.f32 1.442695, %v2818_v20  ;;  %v2614_v35 = vsel %vm623_vm5, %v7084_v42, 0.0 }
0x12bc   :  { %v2811_v32 = vpop.xlane.xlu0 %2810 }
0x12bd   :  { %3116 = vrot.lane.b32.xlu1 %v6773_v18, %s5669_s13  ;;  %v2819_v45 = vsub.f32 %v6973_v21, %v2811_v32  ;;  %5526 = vpow2.f32 %v2827_v7 }
0x12be   :  { %3114 = vrot.lane.b32.xlu0 %v6781_v49, %s5669_s13  ;;  %v7089_v47 = vpop.eup %5520 }
0x12bf   :  { %v2829_v31 = vmul.f32 1.442695, %v2819_v45 }
0x12c0   :  { %v2814_v15 = vpop.xlane.xlu1 %2813 }
0x12c1   :  { %v2820_v41 = vsub.f32 %v6978_v9, %v2814_v15  ;;  %5528 = vpow2.f32 %v2829_v31 }
0x12c2   :  { %v7093_v14 = vpop.eup %5522 }
0x12c3   :  { %v2831_v0 = vmul.f32 1.442695, %v2820_v41  ;;  %v2836_v8 = vsel %vm623_vm5, %v7093_v14, 0.0 }
0x12c4   :  { %v3045_v56 = vpop.xlane.xlu0 %3044 }
0x12c5   :  { %v3061_v12 = vsub.f32 %v6983_v27, %v3045_v56  ;;  %5530 = vpow2.f32 %v2831_v0  ;;  %v2611_v27 = vsel %vm623_vm5, %v7080_v46, 0.0 }
0x12c6   :  { %v7098_v32 = vpop.eup %5524 }
0x12c7   :  { %v3067_v3 = vmul.f32 1.442695, %v3061_v12 }
0x12c8   :  { %v3048_v11 = vpop.xlane.xlu1 %3047 }
0x12c9   :  { %v3062_v58 = vsub.f32 %v6988_v50, %v3048_v11  ;;  %v2608_v50 = vsel %vm623_vm5, %v7075_v34, 0.0 }
0x12ca   :  { %v7102_v20 = vpop.eup %5526 }
0x12cb   :  { %v3069_v21 = vmul.f32 1.442695, %v3062_v58  ;;  %v2842_v41 = vsel %vm623_vm5, %v7102_v20, 0.0 }
0x12cc   :  { %v3051_v9 = vpop.xlane.xlu0 %3050 }
0x12cd   :  { %5532 = vpow2.f32 %v3069_v21  ;;  %v3063_v40 = vsub.f32 %v6993_v26, %v3051_v9  ;;  %v2833_v26 = vsel %vm623_vm5, %v7089_v47, 0.0 }
0x12ce   :  { %5534 = vpow2.f32 %v3067_v3  ;;  %v7107_v11 = vpop.eup %5528 }
0x12cf   :  { %v3071_v55 = vmul.f32 1.442695, %v3063_v40 }
0x12d0   :  { %v3054_v60 = vpop.xlane.xlu1 %3053 }
0x12d1   :  { %v3064_v5 = vsub.f32 %v6998_v13, %v3054_v60  ;;  %5536 = vpow2.f32 %v3071_v55  ;;  %v2839_v13 = vsel %vm623_vm5, %v7098_v32, 0.0 }
0x12d2   :  { %v7111_v31 = vpop.eup %5530 }
0x12d3   :  { %v3073_v53 = vmul.f32 1.442695, %v3064_v5 }
0x12d4   :  { %v3057_v15 = vpop.xlane.xlu0 %3056 }
0x12d5   :  { %v3065_v45 = vsub.f32 %v7003_v62, %v3057_v15  ;;  %5538 = vpow2.f32 %v3073_v53  ;;  %v2845_v62 = vsel %vm623_vm5, %v7107_v11, 0.0 }
0x12d7   :  { %v3075_v58 = vmul.f32 1.442695, %v3065_v45 }
0x12d8   :  { %v3060_v7 = vpop.xlane.xlu1 %3059 }
0x12d9   :  { %v3066_v56 = vsub.f32 %v7008_v24, %v3060_v7  ;;  %5540 = vpow2.f32 %v3075_v58 }
0x12da   :  { %v7116_v0 = vpop.eup %5532 }
0x12db   :  { %v3077_v9 = vmul.f32 1.442695, %v3066_v56  ;;  %v3082_v3 = vsel %vm623_vm5, %v7116_v0, 0.0  ;;  %v7123_v24 = vpop.eup %5534 }
0x12dc   :  { %v3288_v12 = vpop.xlane.xlu0 %3287 }
0x12dd   :  { %2606 = vadd.xlane.f32.xlu0 %v2605_v38  ;;  %v2848_v38 = vsel %vm623_vm5, %v7111_v31, 0.0  ;;  %5542 = vpow2.f32 %v3077_v9 }
0x12de   :  { %v7128_v55 = vpop.eup %5536 }
0x12df   :  { %v3085_v15 = vsel %vm623_vm5, %v7128_v55, 0.0 }
0x12e0   :  { %v3291_v21 = vpop.xlane.xlu1 %3290 }
0x12e1   :  { %2612 = vadd.xlane.f32.xlu0 %v2611_v27  ;;  %2609 = vadd.xlane.f32.xlu1 %v2608_v50  ;;  %v3305_v50 = vsub.f32 %v7018_v61, %v3291_v21 }
0x12e3   :  { %v3312_v27 = vmul.f32 1.442695, %v3305_v50 }
0x12e4   :  { %v3294_v40 = vpop.xlane.xlu0 %3293 }
0x12e5   :  { %2834 = vadd.xlane.f32.xlu0 %v2833_v26  ;;  %2615 = vadd.xlane.f32.xlu1 %v2614_v35  ;;  %v3306_v60 = vsub.f32 %v7023_v37, %v3294_v40  ;;  %v3079_v35 = vsel %vm623_vm5, %v7123_v24, 0.0  ;;  %5544 = vpow2.f32 %v3312_v27 }
0x12e7   :  { %v3314_v61 = vmul.f32 1.442695, %v3306_v60 }
0x12e8   :  { %v3297_v5 = vpop.xlane.xlu1 %3296 }
0x12e9   :  { %2840 = vadd.xlane.f32.xlu0 %v2839_v13  ;;  %2837 = vadd.xlane.f32.xlu1 %v2836_v8  ;;  %v3307_v26 = vsub.f32 %v7028_v23, %v3297_v5  ;;  %v7133_v8 = vpop.eup %5538  ;;  %5546 = vpow2.f32 %v3314_v61 }
0x12ea   :  { %v3088_v37 = vsel %vm623_vm5, %v7133_v8, 0.0  ;;  %v7137_v45 = vpop.eup %5540 }
0x12eb   :  { %v3316_v53 = vmul.f32 1.442695, %v3307_v26  ;;  %v3091_v13 = vsel %vm623_vm5, %v7137_v45, 0.0  ;;  %v7141_v7 = vpop.eup %5542 }
0x12ec   :  { %v3094_v23 = vsel %vm623_vm5, %v7141_v7, 0.0  ;;  %v3300_v60 = vpop.xlane.xlu0 %3299 }
0x12ed   :  { %2846 = vadd.xlane.f32.xlu0 %v2845_v62  ;;  %2843 = vadd.xlane.f32.xlu1 %v2842_v41  ;;  %5548 = vpow2.f32 %v3316_v53 }
0x12f0   :  { %v3303_v27 = vpop.xlane.xlu1 %3302 }
0x12f1   :  { %2849 = vadd.xlane.f32.xlu1 %v2848_v38  ;;  %3083 = vadd.xlane.f32.xlu0 %v3082_v3  ;;  %v3304_v38 = vsub.f32 %v7013_v48, %v3288_v12  ;;  %v3309_v48 = vsub.f32 %v7038_v19, %v3303_v27 }
0x12f2   :  { %v7145_v41 = vpop.eup %5544 }
0x12f3   :  { %v3325_v58 = vsel %vm623_vm5, %v7145_v41, 0.0  ;;  %v3310_v50 = vmul.f32 1.442695, %v3304_v38  ;;  %v3320_v12 = vmul.f32 1.442695, %v3309_v48 }
0x12f5   :  { %3080 = vadd.xlane.f32.xlu1 %v3079_v35  ;;  %5550 = vpow2.f32 %v3310_v50 }
0x12f6   :  { %v7151_v56 = vpop.eup %5546 }
0x12f7   :  { %v3328_v62 = vsel %vm623_vm5, %v7151_v56, 0.0 }
0x12f9   :  { %3086 = vadd.xlane.f32.xlu1 %v3085_v15 }
0x12fa   :  { %v7155_v21 = vpop.eup %5548 }
0x12fb   :  { %v3331_v9 = vsel %vm623_vm5, %v7155_v21, 0.0 }
0x12fd   :  { %3089 = vadd.xlane.f32.xlu1 %v3088_v37  ;;  %v3308_v37 = vsub.f32 %v7033_v36, %v3300_v60 }
0x1301   :  { %3092 = vadd.xlane.f32.xlu1 %v3091_v13 }
0x1302   :  { %v7160_v3 = vpop.eup %5550 }
0x1303   :  { %v3322_v40 = vsel %vm623_vm5, %v7160_v3, 0.0 }
0x1305   :  { %3095 = vadd.xlane.f32.xlu1 %v3094_v23 }
0x1307   :  { %3112 = vrot.lane.b32.xlu0 %v6789_v57, %s5669_s13 }
0x1309   :  { %3326 = vadd.xlane.f32.xlu1 %v3325_v58 }
0x130d   :  { %3329 = vadd.xlane.f32.xlu1 %v3328_v62 }
0x1311   :  { %3332 = vadd.xlane.f32.xlu1 %v3331_v9 }
0x1322   :  { %3359 = vrot.lane.b32.xlu1 %v6773_v18, %s5670_s14 }
0x1326   :  { %3323 = vadd.xlane.f32.xlu0 %v3322_v40 }
0x1331   :  { %v2601_v35 = vpop.xlane.xlu0 %2600 }
0x1332   :  { %5552 = vrcp.f32 %v2601_v35 }
0x1333   :  { %5554 = vpow2.f32 %v3320_v12 }
0x1335   :  { %v2604_v5 = vpop.xlane.xlu1 %2603 }
0x1336   :  { %5556 = vrcp.f32 %v2604_v5 }
0x133c   :  { %3357 = vrot.lane.b32.xlu0 %v6781_v49, %s5670_s14  ;;  %v3318_v49 = vmul.f32 1.442695, %v3308_v37 }
0x133e   :  { %5558 = vpow2.f32 %v3318_v49 }
0x133f   :  { %v5553_v18 = vpop.eup %5552 }
0x1340   :  { %3355 = vrot.lane.b32.xlu0 %v6789_v57, %s5670_s14  ;;  %v7171_v61 = vpop.eup %5554  ;;  %v2623_v15 = vmul.f32 %v5553_v18, %v7050_v25  ;;  %v3117_v25 = vpop.permute.xlu1 %3116 }
0x1341   :  { %v3337_v53 = vsel %vm623_vm5, %v7171_v61, 0.0 }
0x1343   :  { %v5557_v26 = vpop.eup %5556 }
0x1344   :  { %v2624_v19 = vmul.f32 %v5557_v26, %v7054_v22 }
0x1346   :  { %v2629_v13 = vpack.c.bf16 %v2624_v19, %v2623_v15  ;;  %3338 = vadd.xlane.f32.xlu1 %v3337_v53 }
0x1348   :  { %4962 = vmatmul.mubr.msk.bf16.vlgmr.msra.gmra.mxu0 %vm623_vm5, %v2629_v13 }
0x1349   :  { %4992 = vmatpush3.bf16.msra.mxu0 %v7044_v39  ;;  %4965 = vmatprep.mubr.msk.bf16.mxu0 %vm5666_vm3, %v5665_v30  ;;  %v3115_v39 = vpop.permute.xlu0 %3114 }
0x134a   :  { %4993 = vmatprep.subr.bf16.mxu0 %v5665_v30 }
0x134b   :  { %v7187_v57 = vpop.eup %5558 }
0x134c   :  { %v3334_v36 = vsel %vm623_vm5, %v7187_v57, 0.0 }
0x134d   :  { %4994 = vmatpush3.bf16.msra.mxu0 %v7046_v54 }
0x134e   :  { %4995 = vmatprep.subr.bf16.mxu0 %v5665_v30 }
0x1351   :  { %4996 = vmatpush3.bf16.msra.mxu0 %v7042_v4 }
0x1352   :  { %5027 = vmatprep.subr.bf16.mxu0 %v5665_v30 }
0x135f   :  { %3335 = vadd.xlane.f32.xlu0 %v3334_v36 }
0x1366   :  { %v2607_v22 = vpop.xlane.xlu0 %2606 }
0x1367   :  { %5560 = vrcp.f32 %v2607_v22 }
0x136a   :  { %v2610_v23 = vpop.xlane.xlu1 %2609  ;;  %v2613_v58 = vpop.xlane.xlu0 %2612 }
0x136b   :  { %5562 = vrcp.f32 %v2610_v23 }
0x136e   :  { %v2616_v54 = vpop.xlane.xlu1 %2615  ;;  %v2835_v9 = vpop.xlane.xlu0 %2834 }
0x136f   :  { %5564 = vrcp.f32 %v2616_v54 }
0x1370   :  { %5566 = vrcp.f32 %v2613_v58 }
0x1372   :  { %v2838_v62 = vpop.xlane.xlu1 %2837  ;;  %v2841_v18 = vpop.xlane.xlu0 %2840 }
0x1373   :  { %5568 = vrcp.f32 %v2838_v62 }
0x1374   :  { %v5561_v38 = vpop.eup %5560  ;;  %5570 = vrcp.f32 %v2835_v9 }
0x1375   :  { %v2625_v27 = vmul.f32 %v5561_v38, %v7073_v2 }
0x1376   :  { %v2844_v4 = vpop.xlane.xlu1 %2843  ;;  %v2847_v13 = vpop.xlane.xlu0 %2846 }
0x1377   :  { %5572 = vrcp.f32 %v2844_v4 }
0x1378   :  { %v5563_v50 = vpop.eup %5562  ;;  %5574 = vrcp.f32 %v2841_v18 }
0x1379   :  { %v2626_v60 = vmul.f32 %v5563_v50, %v7075_v34 }
0x137a   :  { %v2850_v40 = vpop.xlane.xlu1 %2849  ;;  %v3084_v58 = vpop.xlane.xlu0 %3083 }
0x137b   :  { %v2630_v48 = vpack.c.bf16 %v2626_v60, %v2625_v27  ;;  %5576 = vrcp.f32 %v2850_v40 }
0x137c   :  { %v5565_v12 = vpop.eup %5564  ;;  %5578 = vrcp.f32 %v2847_v13 }
0x137d   :  { %4966 = vmatmul.mubr.msk.bf16.gmra.mxu0 %vm623_vm5, %v2630_v48  ;;  %v5567_v5 = vpop.eup %5566  ;;  %v2628_v26 = vmul.f32 %v5565_v12, %v7084_v42 }
0x137e   :  { %v3081_v35 = vpop.xlane.xlu1 %3080  ;;  %4969 = vmatprep.mubr.msk.bf16.mxu0 %vm5666_vm3, %v5665_v30  ;;  %v2627_v19 = vmul.f32 %v5567_v5, %v7080_v46  ;;  %v3113_v9 = vpop.permute.xlu0 %3112 }
0x137f   :  { %5580 = vrcp.f32 %v3081_v35 }
0x1380   :  { %v2631_v2 = vpack.c.bf16 %v2628_v26, %v2627_v19  ;;  %v5569_v53 = vpop.eup %5568  ;;  %5582 = vrcp.f32 %v3084_v58 }
0x1381   :  { %v5571_v37 = vpop.eup %5570  ;;  %v2858_v49 = vmul.f32 %v5569_v53, %v7093_v14 }
0x1382   :  { %v3087_v15 = vpop.xlane.xlu1 %3086  ;;  %v2857_v36 = vmul.f32 %v5571_v37, %v7089_v47 }
0x1384   :  { %v2863_v22 = vpack.c.bf16 %v2858_v49, %v2857_v36  ;;  %v5573_v23 = vpop.eup %5572 }
0x1385   :  { %4970 = vmatmul.mubr.msk.bf16.gmra.mxu0 %vm623_vm5, %v2631_v2  ;;  %v5575_v54 = vpop.eup %5574  ;;  %v2860_v14 = vmul.f32 %v5573_v23, %v7102_v20 }
0x1386   :  { %v3090_v34 = vpop.xlane.xlu1 %3089  ;;  %4997 = vmatprep.mubr.msk.bf16.mxu0 %vm5666_vm3, %v5665_v30  ;;  %v2859_v47 = vmul.f32 %v5575_v54, %v7098_v32 }
0x1387   :  { %5584 = vrcp.f32 %v3090_v34 }
0x1388   :  { %v2864_v4 = vpack.c.bf16 %v2860_v14, %v2859_v47  ;;  %v5577_v38 = vpop.eup %5576  ;;  %5586 = vrcp.f32 %v3087_v15 }
0x1389   :  { %v2862_v20 = vmul.f32 %v5577_v38, %v7111_v31 }
0x138a   :  { %v3093_v42 = vpop.xlane.xlu1 %3092 }
0x138d   :  { %4998 = vmatmul.mubr.msk.bf16.vlgmr.msra.gmra.mxu0 %vm623_vm5, %v2863_v22 }
0x138e   :  { %v3096_v46 = vpop.xlane.xlu1 %3095  ;;  %5028 = vmatpush3.bf16.msra.mxu0 %v3117_v25  ;;  %5001 = vmatprep.mubr.msk.bf16.mxu0 %vm5666_vm3, %v5665_v30  ;;  %v5579_v25 = vpop.eup %5578 }
0x138f   :  { %5029 = vmatprep.subr.bf16.mxu0 %v5665_v30  ;;  %v5581_v40 = vpop.eup %5580  ;;  %5588 = vrcp.f32 %v3096_v46 }
0x1390   :  { %v5583_v27 = vpop.eup %5582  ;;  %v3103_v60 = vmul.f32 %v5581_v40, %v7123_v24  ;;  %5590 = vrcp.f32 %v3093_v42 }
0x1391   :  { %v3104_v31 = vmul.f32 %v5583_v27, %v7116_v0 }
0x1392   :  { %5030 = vmatpush3.bf16.msra.mxu0 %v3115_v39  ;;  %v3327_v62 = vpop.xlane.xlu1 %3326  ;;  %v2861_v39 = vmul.f32 %v5579_v25, %v7107_v11 }
0x1393   :  { %5031 = vmatprep.subr.bf16.mxu0 %v5665_v30  ;;  %v3109_v12 = vpack.c.bf16 %v3104_v31, %v3103_v60  ;;  %5592 = vrcp.f32 %v3327_v62 }
0x1394   :  { %v2865_v50 = vpack.c.bf16 %v2862_v20, %v2861_v39  ;;  %v5585_v35 = vpop.eup %5584 }
0x1395   :  { %5002 = vmatmul.mubr.msk.bf16.gmra.mxu0 %vm623_vm5, %v2864_v4  ;;  %v5587_v11 = vpop.eup %5586  ;;  %v3106_v18 = vmul.f32 %v5585_v35, %v7133_v8 }
0x1396   :  { %5032 = vmatpush3.bf16.msra.mxu0 %v3113_v9  ;;  %5005 = vmatprep.mubr.msk.bf16.mxu0 %vm5666_vm3, %v5665_v30  ;;  %v3330_v32 = vpop.xlane.xlu1 %3329  ;;  %v3105_v24 = vmul.f32 %v5587_v11, %v7128_v55 }
0x1397   :  { %5063 = vmatprep.subr.bf16.mxu0 %v5665_v30 }
0x1398   :  { %v3110_v26 = vpack.c.bf16 %v3106_v18, %v3105_v24 }
0x139a   :  { %v3333_v48 = vpop.xlane.xlu1 %3332 }
0x139c   :  { %v5589_v15 = vpop.eup %5588 }
0x139d   :  { %5006 = vmatmul.mubr.msk.bf16.gmra.mxu0 %vm623_vm5, %v2865_v50  ;;  %v5591_v0 = vpop.eup %5590  ;;  %v3108_v2 = vmul.f32 %v5589_v15, %v7141_v7 }
0x139e   :  { %5033 = vmatprep.mubr.msk.bf16.mxu0 %vm5666_vm3, %v5665_v30  ;;  %v3360_v5 = vpop.permute.xlu1 %3359  ;;  %v3107_v53 = vmul.f32 %v5591_v0, %v7137_v45 }
0x13a0   :  { %v3111_v34 = vpack.c.bf16 %v3108_v2, %v3107_v53  ;;  %v5593_v37 = vpop.eup %5592 }
0x13a1   :  { %v3347_v7 = vmul.f32 %v5593_v37, %v7145_v41 }
0x13a5   :  { %5034 = vmatmul.mubr.msk.bf16.vlgmr.msra.gmra.mxu0 %vm623_vm5, %v3109_v12 }
0x13a6   :  { %5064 = vmatpush3.bf16.msra.mxu0 %v3360_v5  ;;  %5037 = vmatprep.mubr.msk.bf16.mxu0 %vm5666_vm3, %v5665_v30 }
0x13a7   :  { %5065 = vmatprep.subr.bf16.mxu0 %v5665_v30 }
0x13ad   :  { %5038 = vmatmul.mubr.msk.bf16.gmra.mxu0 %vm623_vm5, %v3110_v26 }
0x13ae   :  { %5041 = vmatprep.mubr.msk.bf16.mxu0 %vm5666_vm3, %v5665_v30 }
0x13af   :  { %v3324_v19 = vpop.xlane.xlu0 %3323 }
0x13b0   :  { %5594 = vrcp.f32 %v3324_v19 }
0x13b1   :  { %5596 = vrcp.f32 %v3333_v48 }
0x13b2   :  { %5598 = vrcp.f32 %v3330_v32 }
0x13b3   :  { %v3358_v8 = vpop.permute.xlu0 %3357 }
0x13b4   :  { %5066 = vmatpush3.bf16.msra.mxu0 %v3358_v8 }
0x13b5   :  { %5067 = vmatprep.subr.bf16.mxu0 %v5665_v30  ;;  %5042 = vmatmul.mubr.msk.bf16.gmra.mxu0 %vm623_vm5, %v3111_v34 }
0x13b6   :  { %5069 = vmatprep.mubr.msk.bf16.mxu0 %vm5666_vm3, %v5665_v30 }
0x13b7   :  { %v3356_v55 = vpop.permute.xlu0 %3355 }
0x13b8   :  { %5068 = vmatpush3.bf16.msra.mxu0 %v3356_v55  ;;  %v5300_v55 = vld [vmem:[%s7590_s6 + $0x38] sm:$0xff]  }
0x13b9   :  { %5082 = vmatpush3.bf16.msra.mxu1 %v5300_v55 }
0x13ba   :  { %5083 = vmatprep.subr.bf16.mxu1 %v5665_v30 }
0x13bd   :  { %v5595_v13 = vpop.eup %5594 }
0x13be   :  { %v3346_v45 = vmul.f32 %v5595_v13, %v7160_v3  ;;  %v5597_v36 = vpop.eup %5596  ;;  %v5301_v13 = vld [vmem:[%s7590_s6 + $0x30] sm:$0xff]  }
0x13bf   :  { %v5599_v42 = vpop.eup %5598  ;;  %v3349_v22 = vmul.f32 %v5597_v36, %v7155_v21  ;;  %5084 = vmatpush3.bf16.msra.mxu1 %v5301_v13  ;;  %v5302_v36 = vld [vmem:[%s7590_s6 + $0x28] sm:$0xff]  }
0x13c0   :  { %v3352_v49 = vpack.c.bf16 %v3347_v7, %v3346_v45  ;;  %v3348_v23 = vmul.f32 %v5599_v42, %v7151_v56  ;;  %5085 = vmatprep.subr.bf16.mxu1 %v5665_v30 }
0x13c2   :  { %5070 = vmatmul.mubr.msk.bf16.vlgmr.msra.gmra.mxu0 %vm623_vm5, %v3352_v49  ;;  %v3353_v46 = vpack.c.bf16 %v3349_v22, %v3348_v23 }
0x13c3   :  { %5073 = vmatprep.mubr.msk.bf16.mxu0 %vm5666_vm3, %v5665_v30  ;;  %5086 = vmatpush3.bf16.msra.mxu1 %v5302_v36 }
0x13c4   :  { %5087 = vmatprep.subr.bf16.mxu1 %v5665_v30 }
0x13ca   :  { %5074 = vmatmul.mubr.msk.bf16.gmra.mxu0 %vm623_vm5, %v3353_v46 }
0x13cb   :  { %5077 = vmatprep.mubr.msk.bf16.mxu0 %vm5666_vm3, %v5665_v30 }
0x13cf   :  { %v3339_v41 = vpop.xlane.xlu1 %3338 }
0x13d0   :  { %5600 = vrcp.f32 %v3339_v41 }
0x13dd   :  { %v5601_v54 = vpop.eup %5600 }
0x13de   :  { %v3351_v47 = vmul.f32 %v5601_v54, %v7171_v61 }
0x13e8   :  { %v3336_v3 = vpop.xlane.xlu0 %3335 }
0x13e9   :  { %5602 = vrcp.f32 %v3336_v3  ;;  %v5303_v3 = vld [vmem:[%s7590_s6 + $0x20] sm:$0xff]  }
0x13ea   :  { %5088 = vmatpush3.bf16.msra.mxu1 %v5303_v3 }
0x13f6   :  { %v5603_v58 = vpop.eup %5602 }
0x13f7   :  { %v3350_v14 = vmul.f32 %v5603_v58, %v7187_v57 }
0x13f9   :  { %v3354_v62 = vpack.c.bf16 %v3351_v47, %v3350_v14 }
0x13fb   :  { %5078 = vmatmul.mubr.msk.bf16.gmra.mxu0 %vm623_vm5, %v3354_v62 }
0x13fc   :  { %3831 = vmatprep.mubr.bf16.mxu0 %v5663_v1 }
0x1408   :  { %v7250_v56 = vpop.f32.mrf.mxu0 }
0x140a   :  { %v4963_v21 = vpop.f32.mrf.mxu0 }
0x140c   :  { %v7252_v4 = vpop.f32.mrf.mxu0 }
0x140e   :  { %v4964_v38 = vpop.f32.mrf.mxu0 }
0x143d   :  { %v7254_v9 = vpop.f32.mrf.mxu0 }
0x143f   :  { %v4967_v25 = vpop.f32.mrf.mxu0 }
0x1441   :  { %v7256_v20 = vpop.f32.mrf.mxu0 }
0x1443   :  { %v4968_v32 = vpop.f32.mrf.mxu0 }
0x1445   :  { %v7258_v57 = vpop.f32.mrf.mxu0 }
0x1447   :  { %v4971_v61 = vpop.f32.mrf.mxu0 }
0x1449   :  { %v7260_v39 = vpop.f32.mrf.mxu0 }
0x144b   :  { %v4972_v50 = vpop.f32.mrf.mxu0 }
0x144d   :  { %v2921_v40 = vpop.f32.mrf.mxu0 }
0x144f   :  { %v4999_v27 = vpop.f32.mrf.mxu0 }
0x1451   :  { %v2924_v60 = vpop.f32.mrf.mxu0 }
0x1452   :  { %v5176_v48 = vpack.i.bf16 %v2924_v60, %v2921_v40 }
0x1453   :  { %v5000_v31 = vpop.f32.mrf.mxu0 }
0x1454   :  { %5177 = vrot.lane.b32.xlu0 %v5176_v48, %s5672_s16 }
0x1455   :  { %v2929_v12 = vpop.f32.mrf.mxu0 }
0x1457   :  { %v5003_v35 = vpop.f32.mrf.mxu0 }
0x1459   :  { %v2932_v5 = vpop.f32.mrf.mxu0 }
0x145a   :  { %v5191_v38 = vpack.i.bf16 %v2932_v5, %v2929_v12 }
0x145b   :  { %v5004_v11 = vpop.f32.mrf.mxu0 }
0x145d   :  { %v2937_v18 = vpop.f32.mrf.mxu0 }
0x145f   :  { %v5007_v24 = vpop.f32.mrf.mxu0 }
0x1461   :  { %v2940_v26 = vpop.f32.mrf.mxu0 }
0x1462   :  { %v5206_v22 = vpack.i.bf16 %v2940_v26, %v2937_v18 }
0x1463   :  { %v5008_v15 = vpop.f32.mrf.mxu0 }
0x1465   :  { %v3164_v0 = vpop.f32.mrf.mxu0 }
0x1467   :  { %v5035_v19 = vpop.f32.mrf.mxu0 }
0x1469   :  { %v3167_v2 = vpop.f32.mrf.mxu0 }
0x146a   :  { %v5181_v53 = vpack.i.bf16 %v3167_v2, %v3164_v0 }
0x146b   :  { %v5036_v8 = vpop.f32.mrf.mxu0 }
0x146c   :  { %5182 = vrot.lane.b32.xlu1 %v5181_v53, %s5671_s15 }
0x146d   :  { %v3172_v34 = vpop.f32.mrf.mxu0 }
0x146f   :  { %v5039_v37 = vpop.f32.mrf.mxu0 }
0x1471   :  { %v3175_v7 = vpop.f32.mrf.mxu0 }
0x1472   :  { %v5196_v45 = vpack.i.bf16 %v3175_v7, %v3172_v34 }
0x1473   :  { %v5040_v49 = vpop.f32.mrf.mxu0 }
0x1474   :  { %5197 = vrot.lane.b32.xlu1 %v5196_v45, %s5671_s15 }
0x1475   :  { %v3180_v42 = vpop.f32.mrf.mxu0 }
0x1477   :  { %v5043_v23 = vpop.f32.mrf.mxu0 }
0x1478   :  { %5207 = vrot.lane.b32.xlu1 %v5206_v22, %s5672_s16 }
0x1479   :  { %v3183_v46 = vpop.f32.mrf.mxu0 }
0x147a   :  { %v5211_v40 = vpack.i.bf16 %v3183_v46, %v3180_v42 }
0x147b   :  { %v5044_v41 = vpop.f32.mrf.mxu0 }
0x1482   :  { %v3407_v54 = vpop.f32.mrf.mxu0 }
0x1484   :  { %v5071_v58 = vpop.f32.mrf.mxu0 }
0x1486   :  { %v3410_v14 = vpop.f32.mrf.mxu0 }
0x1487   :  { %v5186_v47 = vpack.i.bf16 %v3410_v14, %v3407_v54 }
0x1488   :  { %v5072_v62 = vpop.f32.mrf.mxu0 }
0x1489   :  { %5187 = vrot.lane.b32.xlu0 %v5186_v47, %s5667_s11 }
0x148a   :  { %v3415_v21 = vpop.f32.mrf.mxu0 }
0x148c   :  { %v5075_v25 = vpop.f32.mrf.mxu0 }
0x148d   :  { %5192 = vrot.lane.b32.xlu0 %v5191_v38, %s5672_s16 }
0x148e   :  { %v3418_v32 = vpop.f32.mrf.mxu0 }
0x148f   :  { %v5201_v61 = vpack.i.bf16 %v3418_v32, %v3415_v21 }
0x1490   :  { %v5076_v50 = vpop.f32.mrf.mxu0 }
0x1491   :  { %5202 = vrot.lane.b32.xlu0 %v5201_v61, %s5667_s11 }
0x1495   :  { %5212 = vrot.lane.b32.xlu0 %v5211_v40, %s5671_s15 }
0x14bb   :  { %v3423_v27 = vpop.f32.mrf.mxu0 }
0x14bd   :  { %v5079_v60 = vpop.f32.mrf.mxu0 }
0x14bf   :  { %v3426_v48 = vpop.f32.mrf.mxu0 }
0x14c0   :  { %v5216_v31 = vpack.i.bf16 %v3426_v48, %v3423_v27 }
0x14c1   :  { %v5080_v35 = vpop.f32.mrf.mxu0 }
0x14c2   :  { %5217 = vrot.lane.b32.xlu1 %v5216_v31, %s5667_s11 }
0x14c6   :  { %v5178_v11 = vpop.permute.xlu0 %5177 }
0x14c7   :  { %v5180_v5 = vunpack.i.h.bf16 %v5178_v11  ;;  %v5179_v18 = vunpack.i.l.bf16 %v5178_v11 }
0x14c9   :  { %v3503_v0 = vsel %vm535_vm4, %v7252_v4, %v5180_v5  ;;  %v3502_v19 = vsel %vm535_vm4, %v7250_v56, %v5179_v18 }
0x14de   :  { %v5183_v12 = vpop.permute.xlu1 %5182 }
0x14df   :  { %v5185_v24 = vunpack.i.h.bf16 %v5183_v12  ;;  %v5184_v26 = vunpack.i.l.bf16 %v5183_v12 }
0x14e1   :  { %v3509_v8 = vsel %vm1569_vm6, %v3503_v0, %v5185_v24  ;;  %v3508_v34 = vsel %vm1569_vm6, %v3502_v19, %v5184_v26 }
0x14e6   :  { %v5198_v45 = vpop.permute.xlu1 %5197 }
0x14e7   :  { %v5200_v42 = vunpack.i.h.bf16 %v5198_v45  ;;  %v5199_v22 = vunpack.i.l.bf16 %v5198_v45 }
0x14fb   :  { %v5188_v15 = vpop.permute.xlu0 %5187 }
0x14fc   :  { %v5190_v2 = vunpack.i.h.bf16 %v5188_v15  ;;  %v5189_v53 = vunpack.i.l.bf16 %v5188_v15 }
0x14fe   :  { %v3514_v55 = vsel %vm623_vm5, %v3508_v34, %v5189_v53  ;;  %v3515_v37 = vsel %vm623_vm5, %v3509_v8, %v5190_v2 }
0x14ff   :  { %v3520_v13 = vpack.c.bf16 %v3515_v37, %v3514_v55  ;;  %v5193_v7 = vpop.permute.xlu0 %5192 }
0x1500   :  { %v5195_v49 = vunpack.i.h.bf16 %v5193_v7  ;;  %v5194_v36 = vunpack.i.l.bf16 %v5193_v7 }
0x1501   :  { %5090 = vmatmul.mubr.msk.bf16.vlgmr.msra.gmra.mxu1 %vm191_vm2, %v3520_v13 }
0x1502   :  { %v3505_v56 = vsel %vm535_vm4, %v7256_v20, %v5195_v49  ;;  %v3504_v4 = vsel %vm535_vm4, %v7254_v9, %v5194_v36  ;;  %5093 = vmatprep.mubr.msk.bf16.mxu1 %vm5666_vm3, %v5665_v30  ;;  %v5208_v9 = vpop.permute.xlu1 %5207 }
0x1503   :  { %v5203_v23 = vpop.permute.xlu0 %5202  ;;  %v3510_v3 = vsel %vm1569_vm6, %v3504_v4, %v5199_v22  ;;  %v3511_v54 = vsel %vm1569_vm6, %v3505_v56, %v5200_v42  ;;  %v5210_v62 = vunpack.i.h.bf16 %v5208_v9  ;;  %v5209_v21 = vunpack.i.l.bf16 %v5208_v9 }
0x1504   :  { %v5205_v46 = vunpack.i.h.bf16 %v5203_v23  ;;  %v5204_v41 = vunpack.i.l.bf16 %v5203_v23 }
0x1505   :  { %v3507_v61 = vsel %vm535_vm4, %v7260_v39, %v5210_v62  ;;  %v3506_v50 = vsel %vm535_vm4, %v7258_v57, %v5209_v21  ;;  %v7320_v39 = vld [vmem:[%s7588_s3 + $0x10] sm:$0xff] }
0x1506   :  { %v3516_v58 = vsel %vm623_vm5, %v3510_v3, %v5204_v41  ;;  %v3517_v14 = vsel %vm623_vm5, %v3511_v54, %v5205_v46  ;;  %v3535_v57 = vrot.slane %v7320_v39, %v6430_v52 }
0x1507   :  { %v3521_v20 = vpack.c.bf16 %v3517_v14, %v3516_v58  ;;  %v5213_v47 = vpop.permute.xlu0 %5212 }
0x1508   :  { %v5215_v38 = vunpack.i.h.bf16 %v5213_v47  ;;  %v5214_v25 = vunpack.i.l.bf16 %v5213_v47 }
0x1509   :  { %5094 = vmatmul.mubr.msk.bf16.gmra.mxu1 %vm191_vm2, %v3521_v20 }
0x150a   :  { %5097 = vmatprep.mubr.msk.bf16.mxu1 %vm5666_vm3, %v5665_v30  ;;  %v3512_v60 = vsel %vm1569_vm6, %v3506_v50, %v5214_v25  ;;  %v3513_v48 = vsel %vm1569_vm6, %v3507_v61, %v5215_v38 }
0x1534   :  { %v5218_v32 = vpop.permute.xlu1 %5217 }
0x1535   :  { %v5220_v40 = vunpack.i.h.bf16 %v5218_v32  ;;  %v5219_v27 = vunpack.i.l.bf16 %v5218_v32 }
0x1537   :  { %v3518_v31 = vsel %vm623_vm5, %v3512_v60, %v5219_v27  ;;  %v3519_v35 = vsel %vm623_vm5, %v3513_v48, %v5220_v40 }
0x1538   :  { %v3522_v11 = vpack.c.bf16 %v3519_v35, %v3518_v31  ;;  %v5306_v31 = vld [vmem:[%s7591_s7 + $0x74] ss:$8 sps:$4 sm:$0xff]   ;;  %v5304_v35 = vld [vmem:[%s7591_s7 + $0x70] ss:$8 sps:$4 sm:$0xff]  }
0x1539   :  { %3807 = vmatprep.subr.bf16.mxu0 %v5306_v31 }
0x153a   :  { %5098 = vmatmul.mubr.msk.bf16.gmra.mxu1 %vm191_vm2, %v3522_v11  ;;  %3808 = vmatpush1.bf16.msra.mxu0 %v5304_v35  ;;  %v5309_v11 = vld [vmem:[%s7591_s7 + $0x64] ss:$8 sps:$4 sm:$0xff]  }
0x153b   :  { %3809 = vmatprep.subr.bf16.mxu0 %v5309_v11 }
0x15c1   :  { %v3603_v12 = vpop.f32.mrf.mxu1 }
0x15c2   :  { %v3604_v5 = vadd.f32 %v3603_v12, %v3535_v57  ;;  %v5312_v12 = vld [vmem:[%s7591_s7 + $0x54] ss:$8 sps:$4 sm:$0xff]  }
0x15c3   :  { %v5091_v18 = vpop.f32.mrf.mxu1 }
0x15c4   :  { %v3626_v24 = vadd.f32 %v3604_v5, %v6655_v63  ;;  %v5310_v5 = vld [vmem:[%s7591_s7 + $0x50] ss:$8 sps:$4 sm:$0xff]   ;;  %v5315_v18 = vld [vmem:[%s7591_s7 + $0x44] ss:$8 sps:$4 sm:$0xff]  }
0x15c5   :  { %v3606_v26 = vpop.f32.mrf.mxu1 }
0x15c6   :  { %v3607_v15 = vadd.f32 %v3606_v26, %v3535_v57  ;;  %v3632_v0 = vsel %vm191_vm2, %v3626_v24, 0.0 }
0x15c7   :  { %3633 = vadd.xlane.f32.xlu0 %v3632_v0  ;;  %v5092_v19 = vpop.f32.mrf.mxu1 }
0x15c8   :  { %v3627_v2 = vadd.f32 %v3607_v15, %v6660_v44 }
0x15c9   :  { %v3611_v53 = vpop.f32.mrf.mxu1 }
0x15ca   :  { %v3612_v8 = vadd.f32 %v3611_v53, %v3535_v57  ;;  %v3635_v34 = vsel %vm191_vm2, %v3627_v2, 0.0 }
0x15cb   :  { %3636 = vadd.xlane.f32.xlu1 %v3635_v34  ;;  %v5095_v55 = vpop.f32.mrf.mxu1 }
0x15cc   :  { %v7329_v37 = vadd.f32 %v3612_v8, %v6665_v29 }
0x15cd   :  { %v3614_v13 = vpop.f32.mrf.mxu1 }
0x15ce   :  { %v3615_v7 = vadd.f32 %v3614_v13, %v3535_v57  ;;  %v3638_v63 = vsel %vm191_vm2, %v7329_v37, 0.0 }
0x15cf   :  { %3639 = vadd.xlane.f32.xlu0 %v3638_v63  ;;  %v5096_v45 = vpop.f32.mrf.mxu1 }
0x15d0   :  { %v7334_v49 = vadd.f32 %v3615_v7, %v6670_v6 }
0x15d2   :  { %v3641_v44 = vsel %vm191_vm2, %v7334_v49, 0.0 }
0x15d3   :  { %3642 = vadd.xlane.f32.xlu0 %v3641_v44 }
0x15fa   :  { %v3619_v36 = vpop.f32.mrf.mxu1 }
0x15fb   :  { %v3620_v56 = vadd.f32 %v3619_v36, %v3535_v57 }
0x15fc   :  { %v5099_v4 = vpop.f32.mrf.mxu1 }
0x15fd   :  { %v7339_v29 = vadd.f32 %v3620_v56, %v6675_v51 }
0x15fe   :  { %v3622_v42 = vpop.f32.mrf.mxu1 }
0x15ff   :  { %v3623_v22 = vadd.f32 %v3622_v42, %v3535_v57  ;;  %v3644_v23 = vsel %vm191_vm2, %v7339_v29, 0.0  ;;  %v5307_v57 = vld [vmem:[%s7591_s7 + $0x60] ss:$8 sps:$4 sm:$0xff]  }
0x1600   :  { %3645 = vadd.xlane.f32.xlu0 %v3644_v23  ;;  %v5100_v46 = vpop.f32.mrf.mxu1  ;;  %3810 = vmatpush1.bf16.msra.mxu0 %v5307_v57 }
0x1601   :  { %v7344_v6 = vadd.f32 %v3623_v22, %v6680_v28  ;;  %3811 = vmatprep.subr.bf16.mxu0 %v5312_v12 }
0x1603   :  { %v3647_v41 = vsel %vm191_vm2, %v7344_v6, 0.0 }
0x1604   :  { %3648 = vadd.xlane.f32.xlu1 %v3647_v41  ;;  %3812 = vmatpush1.bf16.msra.mxu0 %v5310_v5 }
0x1605   :  { %3813 = vmatprep.subr.bf16.mxu0 %v5315_v18 }
0x1650   :  { %v3634_v3 = vpop.xlane.xlu0 %3633 }
0x1651   :  { %v3650_v54 = vmul.f32 0.015625, %v3634_v3 }
0x1653   :  { %v7348_v58 = vsub.f32 %v3626_v24, %v3650_v54  ;;  %v5313_v24 = vld [vmem:[%s7591_s7 + $0x40] ss:$8 sps:$4 sm:$0xff]   ;;  %v3713_v54 = vrot.slane %v7320_v39, %v6526_v33 }
0x1654   :  { %v3637_v51 = vpop.xlane.xlu1 %3636  ;;  %3814 = vmatpush1.bf16.msra.mxu0 %v5313_v24 }
0x1655   :  { %v3651_v14 = vmul.f32 0.015625, %v3637_v51  ;;  %v3662_v20 = vmul.f32 %v7348_v58, %v7348_v58  ;;  %5101 = vmatprep.subr.bf16.mxu0 %v5665_v30 }
0x1657   :  { %v7352_v9 = vsub.f32 %v3627_v2, %v3651_v14  ;;  %v3668_v47 = vsel %vm191_vm2, %v3662_v20, 0.0  ;;  %v3723_v20 = vrot.slane %v7320_v39, %v6532_v59 }
0x1658   :  { %v3640_v62 = vpop.xlane.xlu0 %3639  ;;  %3669 = vadd.xlane.f32.xlu0 %v3668_v47 }
0x1659   :  { %v3652_v28 = vmul.f32 0.015625, %v3640_v62  ;;  %v3663_v21 = vmul.f32 %v7352_v9, %v7352_v9 }
0x165b   :  { %v7358_v38 = vsub.f32 %v7329_v37, %v3652_v28  ;;  %v3671_v25 = vsel %vm191_vm2, %v3663_v21, 0.0 }
0x165c   :  { %v3643_v32 = vpop.xlane.xlu0 %3642  ;;  %3672 = vadd.xlane.f32.xlu1 %v3671_v25 }
0x165d   :  { %v3653_v61 = vmul.f32 0.015625, %v3643_v32  ;;  %v3664_v50 = vmul.f32 %v7358_v38, %v7358_v38 }
0x165f   :  { %v7364_v40 = vsub.f32 %v7334_v49, %v3653_v61  ;;  %v3674_v27 = vsel %vm191_vm2, %v3664_v50, 0.0 }
0x1660   :  { %3675 = vadd.xlane.f32.xlu0 %v3674_v27 }
0x1661   :  { %v3665_v60 = vmul.f32 %v7364_v40, %v7364_v40 }
0x1663   :  { %v3677_v48 = vsel %vm191_vm2, %v3665_v60, 0.0 }
0x1664   :  { %3678 = vadd.xlane.f32.xlu1 %v3677_v48 }
0x1689   :  { %v3646_v26 = vpop.xlane.xlu0 %3645 }
0x168a   :  { %v3654_v15 = vmul.f32 0.015625, %v3646_v26 }
0x168c   :  { %v3660_v0 = vsub.f32 %v7339_v29, %v3654_v15 }
0x168d   :  { %v3649_v19 = vpop.xlane.xlu1 %3648 }
0x168e   :  { %v3655_v2 = vmul.f32 0.015625, %v3649_v19  ;;  %v3666_v53 = vmul.f32 %v3660_v0, %v3660_v0 }
0x1690   :  { %v3661_v8 = vsub.f32 %v7344_v6, %v3655_v2  ;;  %v3680_v34 = vsel %vm191_vm2, %v3666_v53, 0.0 }
0x1691   :  { %3681 = vadd.xlane.f32.xlu0 %v3680_v34 }
0x1692   :  { %v3667_v55 = vmul.f32 %v3661_v8, %v3661_v8 }
0x1694   :  { %v3683_v13 = vsel %vm191_vm2, %v3667_v55, 0.0 }
0x1695   :  { %3684 = vadd.xlane.f32.xlu1 %v3683_v13  ;;  %v5319_v13 = vld [vmem:[%s7592_s8 + $0xb0] sm:$0xff]  }
0x16e1   :  { %v3670_v7 = vpop.xlane.xlu0 %3669 }
0x16e2   :  { %v3686_v63 = vmul.f32 0.015625, %v3670_v7  ;;  %v5320_v7 = vld [vmem:[%s7592_s8 + $0xe8] sm:$0xff]  }
0x16e4   :  { %v3692_v45 = vadd.f32 1e-05, %v3686_v63  ;;  %v5321_v63 = vld [vmem:[%s7592_s8 + $0xa8] sm:$0xff]  }
0x16e5   :  { %v3673_v44 = vpop.xlane.xlu1 %3672 }
0x16e6   :  { %5604 = vrsqrt.f32 %v3692_v45  ;;  %v3687_v36 = vmul.f32 0.015625, %v3673_v44  ;;  %v5322_v45 = vld [vmem:[%s7592_s8 + $0xe0] sm:$0xff]  }
0x16e7   :  { %v5323_v44 = vld [vmem:[%s7592_s8 + $0xa0] sm:$0xff]  }
0x16e8   :  { %v3693_v56 = vadd.f32 1e-05, %v3687_v36  ;;  %v5324_v36 = vld [vmem:[%s7592_s8 + $0xd8] sm:$0xff]  }
0x16e9   :  { %v3676_v4 = vpop.xlane.xlu0 %3675 }
0x16ea   :  { %5606 = vrsqrt.f32 %v3693_v56  ;;  %v3688_v42 = vmul.f32 0.015625, %v3676_v4  ;;  %v5325_v56 = vld [vmem:[%s7592_s8 + $0x98] sm:$0xff]   ;;  %v5326_v4 = vld [vmem:[%s7592_s8 + $0xd0] sm:$0xff]  }
0x16ec   :  { %v3694_v22 = vadd.f32 1e-05, %v3688_v42  ;;  %v5327_v42 = vld [vmem:[%s7592_s8 + $0x90] sm:$0xff]  }
0x16ed   :  { %v3679_v23 = vpop.xlane.xlu1 %3678 }
0x16ee   :  { %5608 = vrsqrt.f32 %v3694_v22  ;;  %v3689_v46 = vmul.f32 0.015625, %v3679_v23  ;;  %v5328_v22 = vld [vmem:[%s7592_s8 + $0xc8] sm:$0xff]  }
0x16ef   :  { %v5329_v23 = vld [vmem:[%s7592_s8 + $0x88] sm:$0xff]  }
0x16f0   :  { %v3695_v41 = vadd.f32 1e-05, %v3689_v46  ;;  %v5330_v46 = vld [vmem:[%s7592_s8 + $0xc0] sm:$0xff]  }
0x16f2   :  { %5610 = vrsqrt.f32 %v3695_v41  ;;  %v5331_v41 = vld [vmem:[%s7592_s8 + $0x80] sm:$0xff]  }
0x16f3   :  { %v5605_v3 = vpop.eup %5604 }
0x16f4   :  { %v3704_v51 = vmul.f32 %v5605_v3, %v7348_v58  ;;  %v7464_v3 = vrot.slane %v7320_v39, %v6596_v43 }
0x16f6   :  { %v3714_v47 = vmul.f32 %v3713_v54, %v3704_v51 }
0x16f7   :  { %v5607_v14 = vpop.eup %5606 }
0x16f8   :  { %v3705_v62 = vmul.f32 %v5607_v14, %v7352_v9  ;;  %v3724_v25 = vadd.f32 %v3723_v20, %v3714_v47 }
0x16fa   :  { %v3715_v28 = vmul.f32 %v3713_v54, %v3705_v62 }
0x16fb   :  { %v5609_v21 = vpop.eup %5608 }
0x16fc   :  { %v3725_v32 = vadd.f32 %v3723_v20, %v3715_v28  ;;  %v3706_v61 = vmul.f32 %v5609_v21, %v7358_v38 }
0x16fe   :  { %v3730_v50 = vpack.c.bf16 %v3725_v32, %v3724_v25  ;;  %v3716_v58 = vmul.f32 %v3713_v54, %v3706_v61 }
0x16ff   :  { %v5611_v27 = vpop.eup %5610 }
0x1700   :  { %v3707_v60 = vmul.f32 %v5611_v27, %v7364_v40  ;;  %4527 = vmatmul.mubr.msk.bf16.vlgmr.msra.gmra.mxu0 %vm191_vm2, %v3730_v50  ;;  %v3726_v31 = vadd.f32 %v3723_v20, %v3716_v58 }
0x1701   :  { %3841 = vmatprep.mubr.bf16.mxu0 %v5663_v1 }
0x1702   :  { %v3717_v48 = vmul.f32 %v3713_v54, %v3707_v60 }
0x1704   :  { %v3727_v35 = vadd.f32 %v3723_v20, %v3717_v48 }
0x1706   :  { %v3731_v11 = vpack.c.bf16 %v3727_v35, %v3726_v31 }
0x1708   :  { %4528 = vmatmul.mubr.msk.bf16.gmra.mxu0 %vm191_vm2, %v3731_v11 }
0x1709   :  { %3851 = vmatprep.mubr.bf16.mxu0 %v5663_v1  ;;  %v5316_v1 = vld [vmem:[%s7592_s8 + $0xf8] sm:$0xff]  }
0x170a   :  { %4730 = vmatprep.subr.bf16.mxu1 %v5316_v1 }
0x171a   :  { %v3682_v9 = vpop.xlane.xlu0 %3681 }
0x171b   :  { %v3690_v57 = vmul.f32 0.015625, %v3682_v9 }
0x171d   :  { %v3696_v38 = vadd.f32 1e-05, %v3690_v57 }
0x171e   :  { %v3685_v12 = vpop.xlane.xlu1 %3684 }
0x171f   :  { %5612 = vrsqrt.f32 %v3696_v38  ;;  %v3691_v5 = vmul.f32 0.015625, %v3685_v12 }
0x1721   :  { %v3697_v40 = vadd.f32 1e-05, %v3691_v5 }
0x1723   :  { %5614 = vrsqrt.f32 %v3697_v40 }
0x172c   :  { %v5613_v18 = vpop.eup %5612 }
0x172d   :  { %v3708_v24 = vmul.f32 %v5613_v18, %v3660_v0  ;;  %v5317_v0 = vld [vmem:[%s7592_s8 + $0xb8] sm:$0xff]  }
0x172e   :  { %4731 = vmatpush3.bf16.msra.mxu1 %v5317_v0 }
0x172f   :  { %v3718_v19 = vmul.f32 %v3713_v54, %v3708_v24 }
0x1730   :  { %v5615_v26 = vpop.eup %5614 }
0x1731   :  { %v3709_v15 = vmul.f32 %v5615_v26, %v3661_v8  ;;  %v3728_v53 = vadd.f32 %v3723_v20, %v3718_v19  ;;  %v5318_v8 = vld [vmem:[%s7592_s8 + $0xf0] sm:$0xff]  }
0x1732   :  { %4732 = vmatprep.subr.bf16.mxu1 %v5318_v8 }
0x1733   :  { %v3719_v2 = vmul.f32 %v3713_v54, %v3709_v15  ;;  %4733 = vmatpush3.bf16.msra.mxu1 %v5319_v13  ;;  %v5661_v54 = vld [vmem:[%s7588_s3 + $0x18] sm:$0xff] }
0x1734   :  { %4734 = vmatprep.subr.bf16.mxu1 %v5320_v7  ;;  %v7470_v51 = vrot.slane %v5661_v54, %v6596_v43 }
0x1735   :  { %v3729_v34 = vadd.f32 %v3723_v20, %v3719_v2 }
0x1737   :  { %v3732_v55 = vpack.c.bf16 %v3729_v34, %v3728_v53  ;;  %4735 = vmatpush3.bf16.msra.mxu1 %v5321_v63 }
0x1738   :  { %4736 = vmatprep.subr.bf16.mxu1 %v5322_v45 }
0x1739   :  { %4529 = vmatmul.mubr.msk.bf16.gmra.mxu0 %vm191_vm2, %v3732_v55 }
0x173a   :  { %5117 = vmatprep.mubr.msk.bf16.mxu0 %vm5666_vm3, %v5665_v30 }
0x173b   :  { %4737 = vmatpush3.bf16.msra.mxu1 %v5323_v44 }
0x173c   :  { %4738 = vmatprep.subr.bf16.mxu1 %v5324_v36 }
0x173f   :  { %4739 = vmatpush3.bf16.msra.mxu1 %v5325_v56 }
0x1740   :  { %4740 = vmatprep.subr.bf16.mxu1 %v5326_v4 }
0x1743   :  { %4741 = vmatpush3.bf16.msra.mxu1 %v5327_v42 }
0x1744   :  { %4742 = vmatprep.subr.bf16.mxu1 %v5328_v22 }
0x1747   :  { %4743 = vmatpush3.bf16.msra.mxu1 %v5329_v23 }
0x1748   :  { %4744 = vmatprep.subr.bf16.mxu1 %v5330_v46 }
0x174b   :  { %4745 = vmatpush3.bf16.msra.mxu1 %v5331_v41 }
0x17c0   :  { %v3833_v14 = vpop.f32.mrf.mxu0 }
0x17c1   :  { %v7473_v20 = vadd.f32 %v3833_v14, %v7464_v3 }
0x17c2   :  { %v3835_v47 = vpop.f32.mrf.mxu0 }
0x17c3   :  { %v3874_v62 = vmul.f32 0.044715, %v7473_v20  ;;  %v7477_v28 = vadd.f32 %v3835_v47, %v7470_v51 }
0x17c4   :  { %v3837_v21 = vpop.f32.mrf.mxu0 }
0x17c5   :  { %v3886_v25 = vmul.f32 %v3874_v62, %v7473_v20  ;;  %v3875_v32 = vmul.f32 0.044715, %v7477_v28  ;;  %v3838_v61 = vadd.f32 %v3837_v21, %v7464_v3 }
0x17c6   :  { %v3839_v50 = vpop.f32.mrf.mxu0 }
0x17c7   :  { %v3898_v43 = vmul.f32 %v3886_v25, %v7473_v20  ;;  %v3887_v27 = vmul.f32 %v3875_v32, %v7477_v28  ;;  %v3876_v60 = vmul.f32 0.044715, %v3838_v61  ;;  %v3840_v58 = vadd.f32 %v3839_v50, %v7470_v51 }
0x17c8   :  { %v3843_v48 = vpop.f32.mrf.mxu0 }
0x17c9   :  { %v3910_v31 = vadd.f32 %v3898_v43, %v7473_v20  ;;  %v3899_v35 = vmul.f32 %v3887_v27, %v7477_v28  ;;  %v3888_v11 = vmul.f32 %v3876_v60, %v3838_v61  ;;  %v7488_v9 = vadd.f32 %v3843_v48, %v7464_v3 }
0x17ca   :  { %v3877_v57 = vmul.f32 0.044715, %v3840_v58  ;;  %v3845_v38 = vpop.f32.mrf.mxu0 }
0x17cb   :  { %v3922_v12 = vmul.f32 0.7978846, %v3910_v31  ;;  %v3900_v5 = vmul.f32 %v3888_v11, %v3838_v61  ;;  %v3878_v40 = vmul.f32 0.044715, %v7488_v9  ;;  %v7492_v18 = vadd.f32 %v3845_v38, %v7470_v51 }
0x17cc   :  { %v3889_v24 = vmul.f32 %v3877_v57, %v3840_v58  ;;  %v3847_v26 = vpop.f32.mrf.mxu0  ;;  %v3911_v15 = vadd.f32 %v3899_v35, %v7477_v28  ;;  %v3864_v11 = vmul.f32 0.5, %v3838_v61  ;;  %v3863_v57 = vmul.f32 0.5, %v7477_v28 }
0x17cd   :  { %v3912_v19 = vadd.f32 %v3900_v5, %v3838_v61  ;;  %v3890_v2 = vmul.f32 %v3878_v40, %v7488_v9  ;;  %v3879_v53 = vmul.f32 0.044715, %v7492_v18  ;;  %5616 = vtanh.f32 %v3922_v12 }
0x17ce   :  { %v3901_v34 = vmul.f32 %v3889_v24, %v3840_v58  ;;  %v3848_v55 = vadd.f32 %v3847_v26, %v7464_v3  ;;  %v3849_v1 = vpop.f32.mrf.mxu0  ;;  %v3923_v0 = vmul.f32 0.7978846, %v3911_v15  ;;  %v3865_v38 = vmul.f32 0.5, %v3840_v58 }
0x17cf   :  { %v3924_v8 = vmul.f32 0.7978846, %v3912_v19  ;;  %v3902_v13 = vmul.f32 %v3890_v2, %v7488_v9  ;;  %v3891_v7 = vmul.f32 %v3879_v53, %v7492_v18  ;;  %v3850_v63 = vadd.f32 %v3849_v1, %v7470_v51 }
0x17d0   :  { %v3880_v45 = vmul.f32 0.044715, %v3848_v55  ;;  %v3913_v44 = vadd.f32 %v3901_v34, %v3840_v58  ;;  %5618 = vtanh.f32 %v3923_v0  ;;  %v3862_v5 = vmul.f32 0.5, %v7473_v20 }
0x17d1   :  { %5620 = vtanh.f32 %v3924_v8  ;;  %v3914_v36 = vadd.f32 %v3902_v13, %v7488_v9  ;;  %v3903_v56 = vmul.f32 %v3891_v7, %v7492_v18  ;;  %v3881_v4 = vmul.f32 0.044715, %v3850_v63 }
0x17d2   :  { %v3892_v42 = vmul.f32 %v3880_v45, %v3848_v55  ;;  %v3925_v22 = vmul.f32 0.7978846, %v3913_v44  ;;  %v3867_v61 = vmul.f32 0.5, %v7492_v18  ;;  %v3869_v28 = vmul.f32 0.5, %v3850_v63 }
0x17d3   :  { %v3893_v23 = vmul.f32 %v3881_v4, %v3850_v63  ;;  %v3915_v46 = vadd.f32 %v3903_v56, %v7492_v18  ;;  %v3926_v54 = vmul.f32 0.7978846, %v3914_v36  ;;  %v3868_v7 = vmul.f32 0.5, %v3848_v55 }
0x17d4   :  { %v3904_v41 = vmul.f32 %v3892_v42, %v3848_v55  ;;  %5622 = vtanh.f32 %v3925_v22  ;;  %v3866_v36 = vmul.f32 0.5, %v7488_v9 }
0x17d5   :  { %v3905_v14 = vmul.f32 %v3893_v23, %v3850_v63  ;;  %v3927_v47 = vmul.f32 0.7978846, %v3915_v46 }
0x17d6   :  { %v3916_v62 = vadd.f32 %v3904_v41, %v3848_v55 }
0x17d7   :  { %v3917_v21 = vadd.f32 %v3905_v14, %v3850_v63  ;;  %5624 = vtanh.f32 %v3927_v47 }
0x17d8   :  { %v3928_v25 = vmul.f32 0.7978846, %v3916_v62  ;;  %5626 = vtanh.f32 %v3926_v54 }
0x17d9   :  { %v3929_v32 = vmul.f32 0.7978846, %v3917_v21 }
0x17da   :  { %5628 = vtanh.f32 %v3928_v25  ;;  %v5617_v50 = vpop.eup %5616 }
0x17db   :  { %5630 = vtanh.f32 %v3929_v32  ;;  %v3946_v35 = vadd.f32 1.0, %v5617_v50 }
0x17dd   :  { %v5619_v43 = vpop.eup %5618  ;;  %v3958_v19 = vmul.f32 %v3946_v35, %v3862_v5 }
0x17de   :  { %v5621_v27 = vpop.eup %5620  ;;  %v3947_v48 = vadd.f32 1.0, %v5619_v43 }
0x17df   :  { %v3948_v60 = vadd.f32 1.0, %v5621_v27 }
0x17e0   :  { %v3959_v26 = vmul.f32 %v3947_v48, %v3863_v57 }
0x17e1   :  { %v5623_v31 = vpop.eup %5622  ;;  %v3960_v40 = vmul.f32 %v3948_v60, %v3864_v11 }
0x17e2   :  { %v3949_v12 = vadd.f32 1.0, %v5623_v31 }
0x17e3   :  { %v3970_v1 = vpack.c.bf16 %v3960_v40, %v3958_v19 }
0x17e4   :  { %v5625_v24 = vpop.eup %5624  ;;  %v3961_v15 = vmul.f32 %v3949_v12, %v3865_v38 }
0x17e5   :  { %v5627_v2 = vpop.eup %5626  ;;  %v3951_v0 = vadd.f32 1.0, %v5625_v24 }
0x17e6   :  { %v3971_v53 = vpack.c.bf16 %v3961_v15, %v3959_v26  ;;  %v3950_v20 = vadd.f32 1.0, %v5627_v2 }
0x17e7   :  { %v5629_v34 = vpop.eup %5628  ;;  %v3963_v45 = vmul.f32 %v3951_v0, %v3867_v61 }
0x17e8   :  { %v5631_v8 = vpop.eup %5630  ;;  %4141 = vmatprep.mubr.bf16.mxu1 %v3971_v53  ;;  %v3952_v13 = vadd.f32 1.0, %v5629_v34  ;;  %v3962_v42 = vmul.f32 %v3950_v20, %v3866_v36 }
0x17e9   :  { %4142 = vmatmul.mubr.bf16.vlgmr.msra.gmra.mxu1 %v3970_v1  ;;  %v3953_v58 = vadd.f32 1.0, %v5631_v8 }
0x17ea   :  { %v3964_v56 = vmul.f32 %v3952_v13, %v3868_v7 }
0x17eb   :  { %v3965_v44 = vmul.f32 %v3953_v58, %v3869_v28 }
0x17ec   :  { %v3972_v22 = vpack.c.bf16 %v3964_v56, %v3962_v42 }
0x17ed   :  { %v3973_v4 = vpack.c.bf16 %v3965_v44, %v3963_v45 }
0x17ef   :  { %4147 = vmatprep.mubr.bf16.mxu1 %v3973_v4 }
0x17f1   :  { %4148 = vmatmul.mubr.bf16.gmra.mxu1 %v3972_v22  ;;  %v4012_v22 = vrot.slane %v7320_v39, %v2070_v10 }
0x17f9   :  { %v3853_v23 = vpop.f32.mrf.mxu0 }
0x17fa   :  { %v3854_v46 = vadd.f32 %v3853_v23, %v7464_v3 }
0x17fb   :  { %v3855_v18 = vpop.f32.mrf.mxu0 }
0x17fc   :  { %v3882_v41 = vmul.f32 0.044715, %v3854_v46  ;;  %v3856_v63 = vadd.f32 %v3855_v18, %v7470_v51  ;;  %v3870_v61 = vmul.f32 0.5, %v3854_v46 }
0x17fd   :  { %v3857_v54 = vpop.f32.mrf.mxu0 }
0x17fe   :  { %v3894_v55 = vmul.f32 %v3882_v41, %v3854_v46  ;;  %v3883_v14 = vmul.f32 0.044715, %v3856_v63  ;;  %v3858_v47 = vadd.f32 %v3857_v54, %v7464_v3  ;;  %v3871_v1 = vmul.f32 0.5, %v3856_v63 }
0x17ff   :  { %v3859_v62 = vpop.f32.mrf.mxu0 }
0x1800   :  { %v3906_v9 = vmul.f32 %v3894_v55, %v3854_v46  ;;  %v3895_v21 = vmul.f32 %v3883_v14, %v3856_v63  ;;  %v3884_v25 = vmul.f32 0.044715, %v3858_v47  ;;  %v3860_v32 = vadd.f32 %v3859_v62, %v7470_v51 }
0x1801   :  { %v3872_v53 = vmul.f32 0.5, %v3858_v47 }
0x1802   :  { %v3918_v50 = vadd.f32 %v3906_v9, %v3854_v46  ;;  %v3907_v43 = vmul.f32 %v3895_v21, %v3856_v63  ;;  %v3896_v27 = vmul.f32 %v3884_v25, %v3858_v47  ;;  %v3885_v60 = vmul.f32 0.044715, %v3860_v32 }
0x1803   :  { %v3873_v0 = vmul.f32 0.5, %v3860_v32 }
0x1804   :  { %v3908_v48 = vmul.f32 %v3896_v27, %v3858_v47  ;;  %v3897_v31 = vmul.f32 %v3885_v60, %v3860_v32  ;;  %v3919_v35 = vadd.f32 %v3907_v43, %v3856_v63  ;;  %v3930_v11 = vmul.f32 0.7978846, %v3918_v50 }
0x1806   :  { %v3920_v57 = vadd.f32 %v3908_v48, %v3858_v47  ;;  %v3909_v38 = vmul.f32 %v3897_v31, %v3860_v32  ;;  %v3931_v12 = vmul.f32 0.7978846, %v3919_v35 }
0x1808   :  { %v3932_v5 = vmul.f32 0.7978846, %v3920_v57  ;;  %v3921_v40 = vadd.f32 %v3909_v38, %v3860_v32  ;;  %5632 = vtanh.f32 %v3931_v12 }
0x1809   :  { %5634 = vtanh.f32 %v3930_v11 }
0x180a   :  { %5636 = vtanh.f32 %v3932_v5  ;;  %v3933_v3 = vmul.f32 0.7978846, %v3921_v40 }
0x180c   :  { %5638 = vtanh.f32 %v3933_v3 }
0x1815   :  { %v5633_v24 = vpop.eup %5632 }
0x1816   :  { %v5635_v51 = vpop.eup %5634  ;;  %v3955_v15 = vadd.f32 1.0, %v5633_v24 }
0x1817   :  { %v5637_v26 = vpop.eup %5636  ;;  %v3954_v34 = vadd.f32 1.0, %v5635_v51 }
0x1818   :  { %v3956_v19 = vadd.f32 1.0, %v5637_v26  ;;  %v3967_v28 = vmul.f32 %v3955_v15, %v3871_v1  ;;  %v5332_v1 = vld [vmem:[%s7593_s9 + $0x38] sm:$0xff]  }
0x1819   :  { %v5639_v2 = vpop.eup %5638  ;;  %v3966_v7 = vmul.f32 %v3954_v34, %v3870_v61  ;;  %5102 = vmatpush3.bf16.msra.mxu0 %v5332_v1  ;;  %v5335_v61 = vld [vmem:[%s7593_s9 + $0x20] sm:$0xff]  }
0x181a   :  { %v3957_v8 = vadd.f32 1.0, %v5639_v2  ;;  %v3968_v13 = vmul.f32 %v3956_v19, %v3872_v53  ;;  %5103 = vmatprep.subr.bf16.mxu0 %v5665_v30 }
0x181c   :  { %v3969_v58 = vmul.f32 %v3957_v8, %v3873_v0  ;;  %v3974_v45 = vpack.c.bf16 %v3968_v13, %v3966_v7  ;;  %v5333_v0 = vld [vmem:[%s7593_s9 + $0x30] sm:$0xff]   ;;  %v5334_v8 = vld [vmem:[%s7593_s9 + $0x28] sm:$0xff]   ;;  %v5336_v13 = vld [vmem:[%s7593_s9 + $0x18] sm:$0xff]  }
0x181d   :  { %5104 = vmatpush3.bf16.msra.mxu0 %v5333_v0 }
0x181e   :  { %v3975_v20 = vpack.c.bf16 %v3969_v58, %v3967_v28  ;;  %5105 = vmatprep.subr.bf16.mxu0 %v5665_v30  ;;  %v5337_v28 = vld [vmem:[%s7593_s9 + $0x10] sm:$0xff]   ;;  %v5338_v58 = vld [vmem:[%s7593_s9 + $0x8] sm:$0xff]  }
0x1820   :  { %4155 = vmatprep.mubr.bf16.mxu1 %v3975_v20 }
0x1821   :  { %4156 = vmatmul.mubr.bf16.gmra.mxu1 %v3974_v45  ;;  %5106 = vmatpush3.bf16.msra.mxu0 %v5334_v8 }
0x1822   :  { %5107 = vmatprep.subr.bf16.mxu0 %v5665_v30 }
0x1825   :  { %5108 = vmatpush3.bf16.msra.mxu0 %v5335_v61 }
0x1826   :  { %5109 = vmatprep.subr.bf16.mxu0 %v5665_v30 }
0x1829   :  { %5110 = vmatpush3.bf16.msra.mxu0 %v5336_v13 }
0x182a   :  { %5111 = vmatprep.subr.bf16.mxu0 %v5665_v30 }
0x182d   :  { %5112 = vmatpush3.bf16.msra.mxu0 %v5337_v28 }
0x182e   :  { %5113 = vmatprep.subr.bf16.mxu0 %v5665_v30 }
0x1831   :  { %5114 = vmatpush3.bf16.msra.mxu0 %v5338_v58 }
0x1832   :  { %5115 = vmatprep.subr.bf16.mxu0 %v5665_v30  ;;  %v5339_v30 = vld [vmem:[%s7593_s9] sm:$0xff]  }
0x1835   :  { %5116 = vmatpush3.bf16.msra.mxu0 %v5339_v30 }
0x18a9   :  { %v4746_v44 = vpop.f32.mrf.mxu1 }
0x18ab   :  { %v4747_v36 = vpop.f32.mrf.mxu1 }
0x18ad   :  { %v4749_v56 = vpop.f32.mrf.mxu1 }
0x18af   :  { %v4750_v4 = vpop.f32.mrf.mxu1 }
0x18b1   :  { %v4752_v42 = vpop.f32.mrf.mxu1 }
0x18b3   :  { %v4753_v23 = vpop.f32.mrf.mxu1 }
0x18b4   :  { %v4754_v18 = vadd.f32 %v4753_v23, %v4752_v42 }
0x18b5   :  { %v4755_v46 = vpop.f32.mrf.mxu1 }
0x18b6   :  { %v4150_v41 = vadd.f32 %v4754_v18, %v4012_v22 }
0x18b7   :  { %v4756_v63 = vpop.f32.mrf.mxu1 }
0x18b8   :  { %v4757_v54 = vadd.f32 %v4756_v63, %v4755_v46  ;;  %v4164_v55 = vadd.f32 %v4150_v41, %v7329_v37 }
0x18ba   :  { %v4153_v14 = vadd.f32 %v4757_v54, %v4012_v22  ;;  %v4168_v47 = vsel %vm191_vm2, %v4164_v55, 0.0 }
0x18bb   :  { %4169 = vadd.xlane.f32.xlu0 %v4168_v47 }
0x18bc   :  { %v4165_v62 = vadd.f32 %v4153_v14, %v7334_v49 }
0x18be   :  { %v4171_v9 = vsel %vm191_vm2, %v4165_v62, 0.0 }
0x18bf   :  { %4172 = vadd.xlane.f32.xlu1 %v4171_v9 }
0x18e1   :  { %v4758_v17 = vpop.f32.mrf.mxu1 }
0x18e3   :  { %v4759_v21 = vpop.f32.mrf.mxu1 }
0x18e4   :  { %v4760_v10 = vadd.f32 %v4759_v21, %v4758_v17 }
0x18e5   :  { %v4761_v39 = vpop.f32.mrf.mxu1 }
0x18e6   :  { %v4158_v25 = vadd.f32 %v4760_v10, %v4012_v22 }
0x18e7   :  { %v4762_v32 = vpop.f32.mrf.mxu1 }
0x18e8   :  { %v4763_v50 = vadd.f32 %v4762_v32, %v4761_v39  ;;  %v4166_v43 = vadd.f32 %v4158_v25, %v7339_v29 }
0x18ea   :  { %v4161_v27 = vadd.f32 %v4763_v50, %v4012_v22  ;;  %v4174_v37 = vsel %vm191_vm2, %v4166_v43, 0.0  ;;  %v5662_v22 = vld [vmem:[%s7586_s2] sm:$0xff] }
0x18eb   :  { %4175 = vadd.xlane.f32.xlu0 %v4174_v37  ;;  %v4223_v23 = vrot.slane %v5662_v22, %v6430_v52  ;;  %v4231_v63 = vrot.slane %v5662_v22, %v6526_v33 }
0x18ec   :  { %v4167_v60 = vadd.f32 %v4161_v27, %v7344_v6 }
0x18ee   :  { %v4177_v49 = vsel %vm191_vm2, %v4167_v60, 0.0 }
0x18ef   :  { %4178 = vadd.xlane.f32.xlu1 %v4177_v49 }
0x1944   :  { %v4170_v48 = vpop.xlane.xlu0 %4169 }
0x1945   :  { %v4180_v31 = vmul.f32 0.015625, %v4170_v48 }
0x1947   :  { %v4184_v35 = vsub.f32 %v4164_v55, %v4180_v31 }
0x1948   :  { %v4173_v11 = vpop.xlane.xlu1 %4172 }
0x1949   :  { %v4181_v57 = vmul.f32 0.015625, %v4173_v11  ;;  %v4188_v38 = vmul.f32 %v4184_v35, %v4184_v35 }
0x194b   :  { %v4185_v12 = vsub.f32 %v4165_v62, %v4181_v57  ;;  %v4192_v5 = vsel %vm191_vm2, %v4188_v38, 0.0  ;;  %v4266_v57 = vrot.slane %v5662_v22, %v6532_v59 }
0x194c   :  { %4193 = vadd.xlane.f32.xlu0 %v4192_v5 }
0x194d   :  { %v4189_v29 = vmul.f32 %v4185_v12, %v4185_v12 }
0x194f   :  { %v4195_v40 = vsel %vm191_vm2, %v4189_v29, 0.0 }
0x1950   :  { %4196 = vadd.xlane.f32.xlu1 %v4195_v40 }
0x1974   :  { %v4176_v3 = vpop.xlane.xlu0 %4175 }
0x1975   :  { %v4182_v24 = vmul.f32 0.015625, %v4176_v3 }
0x1977   :  { %v7525_v6 = vsub.f32 %v4166_v43, %v4182_v24  ;;  %v4357_v24 = vand.u32 127, %v61_v16 }
0x1978   :  { %v4179_v51 = vpop.xlane.xlu1 %4178 }
0x1979   :  { %v4183_v26 = vmul.f32 0.015625, %v4179_v51  ;;  %v4190_v15 = vmul.f32 %v7525_v6, %v7525_v6  ;;  %vm4358_vm7 = vcmp.lt.s32.totalorder %v4357_v24, 18 }
0x197b   :  { %v7529_v19 = vsub.f32 %v4167_v60, %v4183_v26  ;;  %v4198_v2 = vsel %vm191_vm2, %v4190_v15, 0.0 }
0x197c   :  { %4199 = vadd.xlane.f32.xlu0 %v4198_v2 }
0x197d   :  { %v4191_v53 = vmul.f32 %v7529_v19, %v7529_v19 }
0x197f   :  { %v4201_v34 = vsel %vm191_vm2, %v4191_v53, 0.0 }
0x1980   :  { %4202 = vadd.xlane.f32.xlu1 %v4201_v34 }
0x19d5   :  { %v4194_v7 = vpop.xlane.xlu0 %4193 }
0x19d6   :  { %v4204_v20 = vmul.f32 0.015625, %v4194_v7 }
0x19d8   :  { %v4208_v45 = vadd.f32 1e-05, %v4204_v20 }
0x19d9   :  { %v4197_v44 = vpop.xlane.xlu1 %4196 }
0x19da   :  { %5640 = vrsqrt.f32 %v4208_v45  ;;  %v4205_v36 = vmul.f32 0.015625, %v4197_v44 }
0x19dc   :  { %v4209_v56 = vadd.f32 1e-05, %v4205_v36 }
0x19de   :  { %5642 = vrsqrt.f32 %v4209_v56 }
0x19e7   :  { %v5641_v4 = vpop.eup %5640 }
0x19e8   :  { %v4216_v42 = vmul.f32 %v5641_v4, %v4184_v35 }
0x19ea   :  { %v4224_v41 = vmul.f32 %v4223_v23, %v4216_v42 }
0x19eb   :  { %v5643_v18 = vpop.eup %5642 }
0x19ec   :  { %v4217_v46 = vmul.f32 %v5643_v18, %v4185_v12  ;;  %v4232_v55 = vadd.f32 %v4231_v63, %v4224_v41 }
0x19ee   :  { %v4225_v54 = vmul.f32 %v4223_v23, %v4217_v46 }
0x19f0   :  { %v4233_v14 = vadd.f32 %v4231_v63, %v4225_v54 }
0x19f2   :  { %v5221_v47 = vpack.i.bf16 %v4233_v14, %v4232_v55 }
0x19f4   :  { %5222 = vrot.lane.b32.xlu0 %v5221_v47, %s5664_s0 }
0x1a05   :  { %v4200_v62 = vpop.xlane.xlu0 %4199 }
0x1a06   :  { %v4206_v9 = vmul.f32 0.015625, %v4200_v62 }
0x1a08   :  { %v4210_v17 = vadd.f32 1e-05, %v4206_v9 }
0x1a09   :  { %v4203_v52 = vpop.xlane.xlu1 %4202 }
0x1a0a   :  { %5644 = vrsqrt.f32 %v4210_v17  ;;  %v4207_v21 = vmul.f32 0.015625, %v4203_v52 }
0x1a0c   :  { %v4211_v10 = vadd.f32 1e-05, %v4207_v21 }
0x1a0e   :  { %5646 = vrsqrt.f32 %v4211_v10 }
0x1a17   :  { %v5645_v39 = vpop.eup %5644 }
0x1a18   :  { %v4218_v25 = vmul.f32 %v5645_v39, %v7525_v6 }
0x1a1a   :  { %v4226_v32 = vmul.f32 %v4223_v23, %v4218_v25 }
0x1a1b   :  { %v5647_v50 = vpop.eup %5646 }
0x1a1c   :  { %v4219_v33 = vmul.f32 %v5647_v50, %v7529_v19  ;;  %v4234_v43 = vadd.f32 %v4231_v63, %v4226_v32 }
0x1a1e   :  { %v4227_v27 = vmul.f32 %v4223_v23, %v4219_v33 }
0x1a20   :  { %v4235_v37 = vadd.f32 %v4231_v63, %v4227_v27 }
0x1a66   :  { %v5223_v60 = vpop.permute.xlu0 %5222 }
0x1a67   :  { %v5225_v49 = vunpack.i.h.bf16 %v5223_v60  ;;  %v5224_v48 = vunpack.i.l.bf16 %v5223_v60 }
0x1a69   :  { %v4245_v31 = vsel %vm191_vm2, %v4235_v37, %v5225_v49  ;;  %v4244_v35 = vsel %vm191_vm2, %v4234_v43, %v5224_v48 }
0x1a6a   :  { %v4246_v11 = vpack.c.bf16 %v4245_v31, %v4244_v35 }
0x1a6c   :  { %5118 = vmatmul.mubr.bf16.vlgmr.msra.gmra.mxu0 %v4246_v11 }
0x1b2c   :  { %v4349_v38 = vpop.f32.mrf.mxu0 }
0x1b2d   :  { %v4350_v12 = vadd.f32 %v4349_v38, %v4266_v57 }
0x1b2e   :  { %v5119_v5 = vpop.f32.mrf.mxu0 }
0x1b2f   :  { %5648 = vtanh.f32 %v4350_v12 }
0x1b30   :  { %v4352_v29 = vpop.f32.mrf.mxu0 }
0x1b31   :  { %v4353_v40 = vadd.f32 %v4352_v29, %v4266_v57 }
0x1b32   :  { %v5120_v3 = vpop.f32.mrf.mxu0 }
0x1b33   :  { %5650 = vtanh.f32 %v4353_v40 }
0x1b3c   :  { %v5649_v6 = vpop.eup %5648 }
0x1b3d   :  { %v4361_v51 = vsel %vm4358_vm7, %v4350_v12, %v5649_v6 }
0x1b3e   :  { %4363 = vst [vmem:[%s7594_s10] sm:$0xff] %v4361_v51 }
0x1b40   :  { %v5651_v26 = vpop.eup %5650 }
0x1b41   :  { %v4362_v15 = vsel %vm4358_vm7, %v4353_v40, %v5651_v26 }
0x1b42   :  { %4364 = vst [vmem:[%s7594_s10 + $0x8] sm:$0xff] %v4362_v15 }

</bundles_post_ra>
